<compile_context>
chip_gen: v7x
topology: tpu7x:2x2x1
jax: 0.10.0
libtpu: 0.0.40
codegen_flags: <defaults>
</compile_context>

<pallas_src>
import jax
import jax.numpy as jnp
from jax.experimental import pallas as pl
import numpy as np

# ---------------- model hyper-parameters (small, forward-consistent) --------
VOCAB = 50
EMBED = 16
SEQ = 8            # seq_len
HID = 32           # num_hiddens
LAYERS = 2         # num_layers (bidirectional)
FIRST = 6          # first_labels
SECOND = 20        # second_labels
STATEMENT = 4      # statement_labels
TSIZE = HID // 2   # t_sizea
BATCH = 2


# --------------------------- fused forward kernel ---------------------------
def bigru_fused_kernel(emb_ref,
                       wih0_ref, whh0_ref, bin0_ref, bhn0_ref,
                       wih1_ref, whh1_ref, bin1_ref, bhn1_ref,
                       wdec_ref, bdec_ref, wa_ref, ba_ref,
                       wbt_ref, bb_ref, wc_ref, bc_ref,
                       out_ref):
    seq, batch, _ = emb_ref.shape
    H = HID

    def bigru_layer(x, wih_ref, whh_ref, bin_ref, bhn_ref):
        """One bidirectional GRU layer. x: (seq, batch, in_dim) -> (seq, batch, 2H)."""
        in_dim = x.shape[-1]
        x2 = x.reshape(seq * batch, in_dim)
        dir_outs = []
        for d, reverse in ((0, False), (1, True)):
            wih = wih_ref[d]      # (in_dim, 3H)  gates [r|z|n] stacked along lanes
            whh = whh_ref[d]      # (H, 3H)
            b_in = bin_ref[d]     # (1, 3H)       = bih + [bhh_r, bhh_z, 0]
            b_hn = bhn_ref[d]     # (1, H)        = bhh_n
            # Hoisted input-hidden projection: one matmul for all timesteps & gates.
            gi_all = (jnp.dot(x2, wih, preferred_element_type=jnp.float32)
                      + b_in).reshape(seq, batch, 3 * H)
            h = jnp.zeros((batch, H), jnp.float32)
            hs = [None] * seq
            # seq is static & tiny -> Python loop fully unrolls at trace time
            # (same effect as lax.fori_loop(..., unroll=True), zero grid-step cost).
            steps = range(seq - 1, -1, -1) if reverse else range(seq)
            for t in steps:
                gi = gi_all[t]                                             # (batch, 3H)
                gh = jnp.dot(h, whh, preferred_element_type=jnp.float32)   # (batch, 3H)
                r = jax.nn.sigmoid(gi[:, 0:H] + gh[:, 0:H])
                z = jax.nn.sigmoid(gi[:, H:2 * H] + gh[:, H:2 * H])
                n = jnp.tanh(gi[:, 2 * H:] + r * (gh[:, 2 * H:] + b_hn))
                h = (1.0 - z) * n + z * h
                hs[t] = h
            dir_outs.append(jnp.stack(hs, axis=0))                         # (seq, batch, H)
        return jnp.concatenate(dir_outs, axis=-1)                          # (seq, batch, 2H)

    y = bigru_layer(emb_ref[...], wih0_ref, whh0_ref, bin0_ref, bhn0_ref)
    # TODO(synk): nn.GRU inter-layer dropout (p=0.1) is train-mode only; this is the
    # eval-mode forward.
    y = bigru_layer(y, wih1_ref, whh1_ref, bin1_ref, bhn1_ref)             # (seq, batch, 2H)

    # -------- decoder / Wa / Wb / Wc / softmax head (all batch rows, one store) ----
    hidden = (jnp.dot(y.reshape(seq * batch, 2 * H), wdec_ref[...],
                      preferred_element_type=jnp.float32)
              + bdec_ref[...]).reshape(seq, batch, TSIZE)
    wa, ba = wa_ref[...], ba_ref[...]
    wbt, bb = wbt_ref[...], bb_ref[...]
    wc, bc = wc_ref[...], bc_ref[...]
    preds = []
    for b in range(batch):                                                 # batch static & tiny
        h_b = hidden[:, b, :]                                              # (seq, TSIZE)
        ajt = jnp.dot(wa, h_b, preferred_element_type=jnp.float32) + ba    # (FIRST, TSIZE)
        bjt = jnp.dot(ajt, wbt, preferred_element_type=jnp.float32) + bb   # (FIRST, SECOND)
        ojt = jnp.dot(wc, bjt, preferred_element_type=jnp.float32) + bc    # (STATEMENT, SECOND)
        m = jnp.max(ojt, axis=0, keepdims=True)
        e = jnp.exp(ojt - m)
        preds.append(e / jnp.sum(e, axis=0, keepdims=True))                # exact divide: 1e-5 tol
    out_ref[...] = jnp.stack(preds, axis=0)                                # (batch, STATEMENT, SECOND)


# ------------------- weight repacking (plain-JAX glue, one-time) ------------
def _pack_gru_params(p):
    """Repack per-gate [r,z,n] GRU params into fused lane-stacked layouts."""
    packed = {}
    for l in range(LAYERS):
        wihs, whhs, bins_, bhns = [], [], [], []
        for d in ("f", "b"):
            wih = p[f"wih_l{l}_{d}"]          # (3, in_dim, H)
            whh = p[f"whh_l{l}_{d}"]          # (3, H, H)
            bih = p[f"bih_l{l}_{d}"]          # (3, 1, H)
            bhh = p[f"bhh_l{l}_{d}"]          # (3, 1, H)
            in_dim = wih.shape[1]
            wihs.append(jnp.transpose(wih, (1, 0, 2)).reshape(in_dim, 3 * HID))
            whhs.append(jnp.transpose(whh, (1, 0, 2)).reshape(HID, 3 * HID))
            bins_.append(jnp.concatenate(
                [bih[0] + bhh[0], bih[1] + bhh[1], bih[2]], axis=-1))      # (1, 3H)
            bhns.append(bhh[2])                                            # (1, H)
        packed[f"wih{l}"] = jnp.stack(wihs)    # (2, in_dim, 3H)  [fwd, bwd]
        packed[f"whh{l}"] = jnp.stack(whhs)    # (2, H, 3H)
        packed[f"bin{l}"] = jnp.stack(bins_)   # (2, 1, 3H)
        packed[f"bhn{l}"] = jnp.stack(bhns)    # (2, 1, H)
    return packed


# ------------------------------ full forward --------------------------------
def forward(tokens, p):
    emb = jnp.take(p["embedding"], tokens, axis=0)                 # (batch, seq, embed) glue gather
    emb_tm = jnp.transpose(emb, (1, 0, 2)).astype(jnp.float32)     # (seq, batch, embed) time-major
    g = _pack_gru_params(p)
    # TODO(synk): on v7x the two GRU directions could run on the 2 TensorCores via
    # core_map; the portable single-core fused path is kept for v5e/v6e/v7x.
    return pl.pallas_call(
        bigru_fused_kernel,
        out_shape=jax.ShapeDtypeStruct((BATCH, STATEMENT, SECOND), jnp.float32),
    )(emb_tm,
      g["wih0"], g["whh0"], g["bin0"], g["bhn0"],
      g["wih1"], g["whh1"], g["bin1"], g["bhn1"],
      p["wdecT"], p["bdec"], p["wa"], p["ba"], p["wbT"], p["bb"], p["wc"], p["bc"])


# ------------------------------ pure-JAX reference ---------------------------
def _gru_direction_ref(x, wih, whh, bih, bhh):
    seq, batch, _ = x.shape
    H = whh.shape[-1]

    def step(h, x_t):
        gi = [x_t @ wih[g] + bih[g] for g in range(3)]
        gh = [h @ whh[g] + bhh[g] for g in range(3)]
        r = jax.nn.sigmoid(gi[0] + gh[0])
        z = jax.nn.sigmoid(gi[1] + gh[1])
        n = jnp.tanh(gi[2] + r * gh[2])
        h_new = (1.0 - z) * n + z * h
        return h_new, h_new

    _, ys = jax.lax.scan(step, jnp.zeros((batch, H), jnp.float32), x)
    return ys


def forward_ref(tokens, p):
    emb = jnp.take(p["embedding"], tokens, axis=0)
    layer_in = jnp.transpose(emb, (1, 0, 2))
    for l in range(LAYERS):
        fwd = _gru_direction_ref(layer_in, p[f"wih_l{l}_f"], p[f"whh_l{l}_f"],
                                 p[f"bih_l{l}_f"], p[f"bhh_l{l}_f"])
        bwd = jnp.flip(_gru_direction_ref(jnp.flip(layer_in, axis=0),
                                          p[f"wih_l{l}_b"], p[f"whh_l{l}_b"],
                                          p[f"bih_l{l}_b"], p[f"bhh_l{l}_b"]), axis=0)
        layer_in = jnp.concatenate([fwd, bwd], axis=-1)
    states = jnp.transpose(layer_in, (1, 0, 2))                              # (B, seq, 2H)
    hidden = states @ p["wdecT"] + p["bdec"]                                 # (B, seq, t)
    ajt = jnp.einsum("fs,bst->bft", p["wa"], hidden) + p["ba"][None]         # (B, first, t)
    bjt = jnp.einsum("bft,ts->bfs", ajt, p["wbT"]) + p["bb"][None]           # (B, first, second)
    ojt = jnp.einsum("cf,bfs->bcs", p["wc"], bjt) + p["bc"][None]            # (B, statement, second)
    return jax.nn.softmax(ojt, axis=1)


# ------------------------------ parameter init -------------------------------
def init_params(key):
    p = {}
    k = 1.0 / np.sqrt(HID)

    def u(key, shape, scale=k):
        return jax.random.uniform(key, shape, jnp.float32, -scale, scale)

    keys = iter(jax.random.split(key, 64))
    p["embedding"] = jax.random.normal(next(keys), (VOCAB, EMBED), jnp.float32)
    for l in range(LAYERS):
        in_dim = EMBED if l == 0 else 2 * HID
        for d in ("f", "b"):
            p[f"wih_l{l}_{d}"] = u(next(keys), (3, in_dim, HID))
            p[f"whh_l{l}_{d}"] = u(next(keys), (3, HID, HID))
            p[f"bih_l{l}_{d}"] = u(next(keys), (3, 1, HID))
            p[f"bhh_l{l}_{d}"] = u(next(keys), (3, 1, HID))
    p["wdecT"] = u(next(keys), (2 * HID, TSIZE), 1.0 / np.sqrt(2 * HID))
    p["bdec"] = u(next(keys), (1, TSIZE), 1.0 / np.sqrt(2 * HID))
    p["wa"] = u(next(keys), (FIRST, SEQ), 1.0 / np.sqrt(SEQ))
    p["ba"] = u(next(keys), (FIRST, 1), 1.0 / np.sqrt(SEQ))
    p["wbT"] = u(next(keys), (TSIZE, SECOND), 1.0 / np.sqrt(TSIZE))
    p["bb"] = u(next(keys), (1, SECOND), 1.0 / np.sqrt(TSIZE))
    p["wc"] = u(next(keys), (STATEMENT, FIRST), 1.0 / np.sqrt(FIRST))
    p["bc"] = u(next(keys), (STATEMENT, 1), 1.0 / np.sqrt(FIRST))
    return p


# ----------------------------------- main ------------------------------------
if __name__ == "__main__":
    root = jax.random.PRNGKey(0)
    k_tok, k_par = jax.random.split(root)
    tokens = jax.random.randint(k_tok, (BATCH, SEQ), 0, VOCAB, dtype=jnp.int32)
    params = init_params(k_par)

    out = jax.jit(forward)(tokens, params)
    out = jax.block_until_ready(out)

    ref = jax.block_until_ready(forward_ref(tokens, params))

    assert out.shape == (BATCH, STATEMENT, SECOND), out.shape
    np.testing.assert_allclose(np.asarray(out), np.asarray(ref), rtol=1e-5, atol=1e-5)
    # softmax over dim=1 sums to 1
    np.testing.assert_allclose(np.asarray(out).sum(axis=1), 1.0, rtol=1e-5, atol=1e-5)
    print("KERNEL_OK")
</pallas_src>

<mosaic_0001>
module attributes {stable_mosaic.version = 11 : i64} {
  func.func @bigru_fused_kernel(%arg0: memref<8x2x16xf32, #tpu.memory_space<vmem>>, %arg1: memref<2x16x96xf32, #tpu.memory_space<vmem>>, %arg2: memref<2x32x96xf32, #tpu.memory_space<vmem>>, %arg3: memref<2x1x96xf32, #tpu.memory_space<vmem>>, %arg4: memref<2x1x32xf32, #tpu.memory_space<vmem>>, %arg5: memref<2x64x96xf32, #tpu.memory_space<vmem>>, %arg6: memref<2x32x96xf32, #tpu.memory_space<vmem>>, %arg7: memref<2x1x96xf32, #tpu.memory_space<vmem>>, %arg8: memref<2x1x32xf32, #tpu.memory_space<vmem>>, %arg9: memref<64x16xf32, #tpu.memory_space<vmem>>, %arg10: memref<1x16xf32, #tpu.memory_space<vmem>>, %arg11: memref<6x8xf32, #tpu.memory_space<vmem>>, %arg12: memref<6x1xf32, #tpu.memory_space<vmem>>, %arg13: memref<16x20xf32, #tpu.memory_space<vmem>>, %arg14: memref<1x20xf32, #tpu.memory_space<vmem>>, %arg15: memref<4x6xf32, #tpu.memory_space<vmem>>, %arg16: memref<4x1xf32, #tpu.memory_space<vmem>>, %arg17: memref<2x4x20xf32, #tpu.memory_space<vmem>>) attributes {dimension_semantics = [], scalar_prefetch = 0 : i64, scratch_operands = 0 : i64, tpu.core_type = #tpu.core_type<tc>} {
    %c0 = arith.constant 0 : index
    %c0_0 = arith.constant 0 : index
    %c0_1 = arith.constant 0 : index
    %0 = vector.load %arg0[%c0, %c0_0, %c0_1] : memref<8x2x16xf32, #tpu.memory_space<vmem>>, vector<8x2x16xf32>
    %1 = vector.shape_cast %0 : vector<8x2x16xf32> to vector<16x16xf32>
    %c0_2 = arith.constant 0 : index
    %c0_3 = arith.constant 0 : index
    %c0_4 = arith.constant 0 : index
    %2 = vector.load %arg1[%c0_2, %c0_3, %c0_4] : memref<2x16x96xf32, #tpu.memory_space<vmem>>, vector<1x16x96xf32>
    %3 = vector.shape_cast %2 : vector<1x16x96xf32> to vector<16x96xf32>
    %c0_5 = arith.constant 0 : index
    %c0_6 = arith.constant 0 : index
    %c0_7 = arith.constant 0 : index
    %4 = vector.load %arg2[%c0_5, %c0_6, %c0_7] : memref<2x32x96xf32, #tpu.memory_space<vmem>>, vector<1x32x96xf32>
    %5 = vector.shape_cast %4 : vector<1x32x96xf32> to vector<32x96xf32>
    %c0_8 = arith.constant 0 : index
    %c0_9 = arith.constant 0 : index
    %c0_10 = arith.constant 0 : index
    %6 = vector.load %arg3[%c0_8, %c0_9, %c0_10] : memref<2x1x96xf32, #tpu.memory_space<vmem>>, vector<1x1x96xf32>
    %7 = vector.shape_cast %6 : vector<1x1x96xf32> to vector<1x96xf32>
    %c0_11 = arith.constant 0 : index
    %c0_12 = arith.constant 0 : index
    %c0_13 = arith.constant 0 : index
    %8 = vector.load %arg4[%c0_11, %c0_12, %c0_13] : memref<2x1x32xf32, #tpu.memory_space<vmem>>, vector<1x1x32xf32>
    %9 = vector.shape_cast %8 : vector<1x1x32xf32> to vector<1x32xf32>
    %cst = arith.constant dense<0.000000e+00> : vector<16x96xf32>
    %10 = tpu.matmul %1, %3, %cst {dimension_numbers = #tpu.dot_dimension_numbers<[1], [0], [0], [1], [0, 0, 1, 1], [], []>} : vector<16x16xf32>, vector<16x96xf32>, vector<16x96xf32> -> vector<16x96xf32>
    %11 = vector.broadcast %7 : vector<1x96xf32> to vector<16x96xf32>
    %12 = arith.addf %10, %11 : vector<16x96xf32>
    %13 = vector.shape_cast %12 : vector<16x96xf32> to vector<8x2x96xf32>
    %cst_14 = arith.constant 0.000000e+00 : f32
    %14 = vector.broadcast %cst_14 : f32 to vector<2x32xf32>
    %15 = vector.extract_strided_slice %13 {offsets = [0, 0, 0], sizes = [1, 2, 96], strides = [1, 1, 1]} : vector<8x2x96xf32> to vector<1x2x96xf32>
    %16 = vector.shape_cast %15 : vector<1x2x96xf32> to vector<2x96xf32>
    %cst_15 = arith.constant dense<0.000000e+00> : vector<2x96xf32>
    %17 = tpu.matmul %14, %5, %cst_15 {dimension_numbers = #tpu.dot_dimension_numbers<[1], [0], [0], [1], [0, 0, 1, 1], [], []>} : vector<2x32xf32>, vector<32x96xf32>, vector<2x96xf32> -> vector<2x96xf32>
    %18 = vector.extract_strided_slice %16 {offsets = [0, 0], sizes = [2, 32], strides = [1, 1]} : vector<2x96xf32> to vector<2x32xf32>
    %19 = vector.extract_strided_slice %17 {offsets = [0, 0], sizes = [2, 32], strides = [1, 1]} : vector<2x96xf32> to vector<2x32xf32>
    %20 = arith.addf %18, %19 : vector<2x32xf32>
    %21 = arith.negf %20 : vector<2x32xf32>
    %22 = math.exp %21 : vector<2x32xf32>
    %cst_16 = arith.constant 1.000000e+00 : f32
    %23 = vector.broadcast %cst_16 : f32 to vector<2x32xf32>
    %24 = arith.addf %23, %22 : vector<2x32xf32>
    %25 = arith.divf %23, %24 : vector<2x32xf32>
    %26 = vector.extract_strided_slice %16 {offsets = [0, 32], sizes = [2, 32], strides = [1, 1]} : vector<2x96xf32> to vector<2x32xf32>
    %27 = vector.extract_strided_slice %17 {offsets = [0, 32], sizes = [2, 32], strides = [1, 1]} : vector<2x96xf32> to vector<2x32xf32>
    %28 = arith.addf %26, %27 : vector<2x32xf32>
    %29 = arith.negf %28 : vector<2x32xf32>
    %30 = math.exp %29 : vector<2x32xf32>
    %cst_17 = arith.constant 1.000000e+00 : f32
    %31 = vector.broadcast %cst_17 : f32 to vector<2x32xf32>
    %32 = arith.addf %31, %30 : vector<2x32xf32>
    %33 = arith.divf %31, %32 : vector<2x32xf32>
    %34 = vector.extract_strided_slice %16 {offsets = [0, 64], sizes = [2, 32], strides = [1, 1]} : vector<2x96xf32> to vector<2x32xf32>
    %35 = vector.extract_strided_slice %17 {offsets = [0, 64], sizes = [2, 32], strides = [1, 1]} : vector<2x96xf32> to vector<2x32xf32>
    %36 = vector.broadcast %9 : vector<1x32xf32> to vector<2x32xf32>
    %37 = arith.addf %35, %36 : vector<2x32xf32>
    %38 = arith.mulf %25, %37 : vector<2x32xf32>
    %39 = arith.addf %34, %38 : vector<2x32xf32>
    %40 = math.tanh %39 : vector<2x32xf32>
    %cst_18 = arith.constant 1.000000e+00 : f32
    %41 = vector.broadcast %cst_18 : f32 to vector<2x32xf32>
    %42 = arith.subf %41, %33 : vector<2x32xf32>
    %43 = arith.mulf %42, %40 : vector<2x32xf32>
    %44 = arith.mulf %33, %14 : vector<2x32xf32>
    %45 = arith.addf %43, %44 : vector<2x32xf32>
    %46 = vector.extract_strided_slice %13 {offsets = [1, 0, 0], sizes = [1, 2, 96], strides = [1, 1, 1]} : vector<8x2x96xf32> to vector<1x2x96xf32>
    %47 = vector.shape_cast %46 : vector<1x2x96xf32> to vector<2x96xf32>
    %cst_19 = arith.constant dense<0.000000e+00> : vector<2x96xf32>
    %48 = tpu.matmul %45, %5, %cst_19 {dimension_numbers = #tpu.dot_dimension_numbers<[1], [0], [0], [1], [0, 0, 1, 1], [], []>} : vector<2x32xf32>, vector<32x96xf32>, vector<2x96xf32> -> vector<2x96xf32>
    %49 = vector.extract_strided_slice %47 {offsets = [0, 0], sizes = [2, 32], strides = [1, 1]} : vector<2x96xf32> to vector<2x32xf32>
    %50 = vector.extract_strided_slice %48 {offsets = [0, 0], sizes = [2, 32], strides = [1, 1]} : vector<2x96xf32> to vector<2x32xf32>
    %51 = arith.addf %49, %50 : vector<2x32xf32>
    %52 = arith.negf %51 : vector<2x32xf32>
    %53 = math.exp %52 : vector<2x32xf32>
    %cst_20 = arith.constant 1.000000e+00 : f32
    %54 = vector.broadcast %cst_20 : f32 to vector<2x32xf32>
    %55 = arith.addf %54, %53 : vector<2x32xf32>
    %56 = arith.divf %54, %55 : vector<2x32xf32>
    %57 = vector.extract_strided_slice %47 {offsets = [0, 32], sizes = [2, 32], strides = [1, 1]} : vector<2x96xf32> to vector<2x32xf32>
    %58 = vector.extract_strided_slice %48 {offsets = [0, 32], sizes = [2, 32], strides = [1, 1]} : vector<2x96xf32> to vector<2x32xf32>
    %59 = arith.addf %57, %58 : vector<2x32xf32>
    %60 = arith.negf %59 : vector<2x32xf32>
    %61 = math.exp %60 : vector<2x32xf32>
    %cst_21 = arith.constant 1.000000e+00 : f32
    %62 = vector.broadcast %cst_21 : f32 to vector<2x32xf32>
    %63 = arith.addf %62, %61 : vector<2x32xf32>
    %64 = arith.divf %62, %63 : vector<2x32xf32>
    %65 = vector.extract_strided_slice %47 {offsets = [0, 64], sizes = [2, 32], strides = [1, 1]} : vector<2x96xf32> to vector<2x32xf32>
    %66 = vector.extract_strided_slice %48 {offsets = [0, 64], sizes = [2, 32], strides = [1, 1]} : vector<2x96xf32> to vector<2x32xf32>
    %67 = vector.broadcast %9 : vector<1x32xf32> to vector<2x32xf32>
    %68 = arith.addf %66, %67 : vector<2x32xf32>
    %69 = arith.mulf %56, %68 : vector<2x32xf32>
    %70 = arith.addf %65, %69 : vector<2x32xf32>
    %71 = math.tanh %70 : vector<2x32xf32>
    %cst_22 = arith.constant 1.000000e+00 : f32
    %72 = vector.broadcast %cst_22 : f32 to vector<2x32xf32>
    %73 = arith.subf %72, %64 : vector<2x32xf32>
    %74 = arith.mulf %73, %71 : vector<2x32xf32>
    %75 = arith.mulf %64, %45 : vector<2x32xf32>
    %76 = arith.addf %74, %75 : vector<2x32xf32>
    %77 = vector.extract_strided_slice %13 {offsets = [2, 0, 0], sizes = [1, 2, 96], strides = [1, 1, 1]} : vector<8x2x96xf32> to vector<1x2x96xf32>
    %78 = vector.shape_cast %77 : vector<1x2x96xf32> to vector<2x96xf32>
    %cst_23 = arith.constant dense<0.000000e+00> : vector<2x96xf32>
    %79 = tpu.matmul %76, %5, %cst_23 {dimension_numbers = #tpu.dot_dimension_numbers<[1], [0], [0], [1], [0, 0, 1, 1], [], []>} : vector<2x32xf32>, vector<32x96xf32>, vector<2x96xf32> -> vector<2x96xf32>
    %80 = vector.extract_strided_slice %78 {offsets = [0, 0], sizes = [2, 32], strides = [1, 1]} : vector<2x96xf32> to vector<2x32xf32>
    %81 = vector.extract_strided_slice %79 {offsets = [0, 0], sizes = [2, 32], strides = [1, 1]} : vector<2x96xf32> to vector<2x32xf32>
    %82 = arith.addf %80, %81 : vector<2x32xf32>
    %83 = arith.negf %82 : vector<2x32xf32>
    %84 = math.exp %83 : vector<2x32xf32>
    %cst_24 = arith.constant 1.000000e+00 : f32
    %85 = vector.broadcast %cst_24 : f32 to vector<2x32xf32>
    %86 = arith.addf %85, %84 : vector<2x32xf32>
    %87 = arith.divf %85, %86 : vector<2x32xf32>
    %88 = vector.extract_strided_slice %78 {offsets = [0, 32], sizes = [2, 32], strides = [1, 1]} : vector<2x96xf32> to vector<2x32xf32>
    %89 = vector.extract_strided_slice %79 {offsets = [0, 32], sizes = [2, 32], strides = [1, 1]} : vector<2x96xf32> to vector<2x32xf32>
    %90 = arith.addf %88, %89 : vector<2x32xf32>
    %91 = arith.negf %90 : vector<2x32xf32>
    %92 = math.exp %91 : vector<2x32xf32>
    %cst_25 = arith.constant 1.000000e+00 : f32
    %93 = vector.broadcast %cst_25 : f32 to vector<2x32xf32>
    %94 = arith.addf %93, %92 : vector<2x32xf32>
    %95 = arith.divf %93, %94 : vector<2x32xf32>
    %96 = vector.extract_strided_slice %78 {offsets = [0, 64], sizes = [2, 32], strides = [1, 1]} : vector<2x96xf32> to vector<2x32xf32>
    %97 = vector.extract_strided_slice %79 {offsets = [0, 64], sizes = [2, 32], strides = [1, 1]} : vector<2x96xf32> to vector<2x32xf32>
    %98 = vector.broadcast %9 : vector<1x32xf32> to vector<2x32xf32>
    %99 = arith.addf %97, %98 : vector<2x32xf32>
    %100 = arith.mulf %87, %99 : vector<2x32xf32>
    %101 = arith.addf %96, %100 : vector<2x32xf32>
    %102 = math.tanh %101 : vector<2x32xf32>
    %cst_26 = arith.constant 1.000000e+00 : f32
    %103 = vector.broadcast %cst_26 : f32 to vector<2x32xf32>
    %104 = arith.subf %103, %95 : vector<2x32xf32>
    %105 = arith.mulf %104, %102 : vector<2x32xf32>
    %106 = arith.mulf %95, %76 : vector<2x32xf32>
    %107 = arith.addf %105, %106 : vector<2x32xf32>
    %108 = vector.extract_strided_slice %13 {offsets = [3, 0, 0], sizes = [1, 2, 96], strides = [1, 1, 1]} : vector<8x2x96xf32> to vector<1x2x96xf32>
    %109 = vector.shape_cast %108 : vector<1x2x96xf32> to vector<2x96xf32>
    %cst_27 = arith.constant dense<0.000000e+00> : vector<2x96xf32>
    %110 = tpu.matmul %107, %5, %cst_27 {dimension_numbers = #tpu.dot_dimension_numbers<[1], [0], [0], [1], [0, 0, 1, 1], [], []>} : vector<2x32xf32>, vector<32x96xf32>, vector<2x96xf32> -> vector<2x96xf32>
    %111 = vector.extract_strided_slice %109 {offsets = [0, 0], sizes = [2, 32], strides = [1, 1]} : vector<2x96xf32> to vector<2x32xf32>
    %112 = vector.extract_strided_slice %110 {offsets = [0, 0], sizes = [2, 32], strides = [1, 1]} : vector<2x96xf32> to vector<2x32xf32>
    %113 = arith.addf %111, %112 : vector<2x32xf32>
    %114 = arith.negf %113 : vector<2x32xf32>
    %115 = math.exp %114 : vector<2x32xf32>
    %cst_28 = arith.constant 1.000000e+00 : f32
    %116 = vector.broadcast %cst_28 : f32 to vector<2x32xf32>
    %117 = arith.addf %116, %115 : vector<2x32xf32>
    %118 = arith.divf %116, %117 : vector<2x32xf32>
    %119 = vector.extract_strided_slice %109 {offsets = [0, 32], sizes = [2, 32], strides = [1, 1]} : vector<2x96xf32> to vector<2x32xf32>
    %120 = vector.extract_strided_slice %110 {offsets = [0, 32], sizes = [2, 32], strides = [1, 1]} : vector<2x96xf32> to vector<2x32xf32>
    %121 = arith.addf %119, %120 : vector<2x32xf32>
    %122 = arith.negf %121 : vector<2x32xf32>
    %123 = math.exp %122 : vector<2x32xf32>
    %cst_29 = arith.constant 1.000000e+00 : f32
    %124 = vector.broadcast %cst_29 : f32 to vector<2x32xf32>
    %125 = arith.addf %124, %123 : vector<2x32xf32>
    %126 = arith.divf %124, %125 : vector<2x32xf32>
    %127 = vector.extract_strided_slice %109 {offsets = [0, 64], sizes = [2, 32], strides = [1, 1]} : vector<2x96xf32> to vector<2x32xf32>
    %128 = vector.extract_strided_slice %110 {offsets = [0, 64], sizes = [2, 32], strides = [1, 1]} : vector<2x96xf32> to vector<2x32xf32>
    %129 = vector.broadcast %9 : vector<1x32xf32> to vector<2x32xf32>
    %130 = arith.addf %128, %129 : vector<2x32xf32>
    %131 = arith.mulf %118, %130 : vector<2x32xf32>
    %132 = arith.addf %127, %131 : vector<2x32xf32>
    %133 = math.tanh %132 : vector<2x32xf32>
    %cst_30 = arith.constant 1.000000e+00 : f32
    %134 = vector.broadcast %cst_30 : f32 to vector<2x32xf32>
    %135 = arith.subf %134, %126 : vector<2x32xf32>
    %136 = arith.mulf %135, %133 : vector<2x32xf32>
    %137 = arith.mulf %126, %107 : vector<2x32xf32>
    %138 = arith.addf %136, %137 : vector<2x32xf32>
    %139 = vector.extract_strided_slice %13 {offsets = [4, 0, 0], sizes = [1, 2, 96], strides = [1, 1, 1]} : vector<8x2x96xf32> to vector<1x2x96xf32>
    %140 = vector.shape_cast %139 : vector<1x2x96xf32> to vector<2x96xf32>
    %cst_31 = arith.constant dense<0.000000e+00> : vector<2x96xf32>
    %141 = tpu.matmul %138, %5, %cst_31 {dimension_numbers = #tpu.dot_dimension_numbers<[1], [0], [0], [1], [0, 0, 1, 1], [], []>} : vector<2x32xf32>, vector<32x96xf32>, vector<2x96xf32> -> vector<2x96xf32>
    %142 = vector.extract_strided_slice %140 {offsets = [0, 0], sizes = [2, 32], strides = [1, 1]} : vector<2x96xf32> to vector<2x32xf32>
    %143 = vector.extract_strided_slice %141 {offsets = [0, 0], sizes = [2, 32], strides = [1, 1]} : vector<2x96xf32> to vector<2x32xf32>
    %144 = arith.addf %142, %143 : vector<2x32xf32>
    %145 = arith.negf %144 : vector<2x32xf32>
    %146 = math.exp %145 : vector<2x32xf32>
    %cst_32 = arith.constant 1.000000e+00 : f32
    %147 = vector.broadcast %cst_32 : f32 to vector<2x32xf32>
    %148 = arith.addf %147, %146 : vector<2x32xf32>
    %149 = arith.divf %147, %148 : vector<2x32xf32>
    %150 = vector.extract_strided_slice %140 {offsets = [0, 32], sizes = [2, 32], strides = [1, 1]} : vector<2x96xf32> to vector<2x32xf32>
    %151 = vector.extract_strided_slice %141 {offsets = [0, 32], sizes = [2, 32], strides = [1, 1]} : vector<2x96xf32> to vector<2x32xf32>
    %152 = arith.addf %150, %151 : vector<2x32xf32>
    %153 = arith.negf %152 : vector<2x32xf32>
    %154 = math.exp %153 : vector<2x32xf32>
    %cst_33 = arith.constant 1.000000e+00 : f32
    %155 = vector.broadcast %cst_33 : f32 to vector<2x32xf32>
    %156 = arith.addf %155, %154 : vector<2x32xf32>
    %157 = arith.divf %155, %156 : vector<2x32xf32>
    %158 = vector.extract_strided_slice %140 {offsets = [0, 64], sizes = [2, 32], strides = [1, 1]} : vector<2x96xf32> to vector<2x32xf32>
    %159 = vector.extract_strided_slice %141 {offsets = [0, 64], sizes = [2, 32], strides = [1, 1]} : vector<2x96xf32> to vector<2x32xf32>
    %160 = vector.broadcast %9 : vector<1x32xf32> to vector<2x32xf32>
    %161 = arith.addf %159, %160 : vector<2x32xf32>
    %162 = arith.mulf %149, %161 : vector<2x32xf32>
    %163 = arith.addf %158, %162 : vector<2x32xf32>
    %164 = math.tanh %163 : vector<2x32xf32>
    %cst_34 = arith.constant 1.000000e+00 : f32
    %165 = vector.broadcast %cst_34 : f32 to vector<2x32xf32>
    %166 = arith.subf %165, %157 : vector<2x32xf32>
    %167 = arith.mulf %166, %164 : vector<2x32xf32>
    %168 = arith.mulf %157, %138 : vector<2x32xf32>
    %169 = arith.addf %167, %168 : vector<2x32xf32>
    %170 = vector.extract_strided_slice %13 {offsets = [5, 0, 0], sizes = [1, 2, 96], strides = [1, 1, 1]} : vector<8x2x96xf32> to vector<1x2x96xf32>
    %171 = vector.shape_cast %170 : vector<1x2x96xf32> to vector<2x96xf32>
    %cst_35 = arith.constant dense<0.000000e+00> : vector<2x96xf32>
    %172 = tpu.matmul %169, %5, %cst_35 {dimension_numbers = #tpu.dot_dimension_numbers<[1], [0], [0], [1], [0, 0, 1, 1], [], []>} : vector<2x32xf32>, vector<32x96xf32>, vector<2x96xf32> -> vector<2x96xf32>
    %173 = vector.extract_strided_slice %171 {offsets = [0, 0], sizes = [2, 32], strides = [1, 1]} : vector<2x96xf32> to vector<2x32xf32>
    %174 = vector.extract_strided_slice %172 {offsets = [0, 0], sizes = [2, 32], strides = [1, 1]} : vector<2x96xf32> to vector<2x32xf32>
    %175 = arith.addf %173, %174 : vector<2x32xf32>
    %176 = arith.negf %175 : vector<2x32xf32>
    %177 = math.exp %176 : vector<2x32xf32>
    %cst_36 = arith.constant 1.000000e+00 : f32
    %178 = vector.broadcast %cst_36 : f32 to vector<2x32xf32>
    %179 = arith.addf %178, %177 : vector<2x32xf32>
    %180 = arith.divf %178, %179 : vector<2x32xf32>
    %181 = vector.extract_strided_slice %171 {offsets = [0, 32], sizes = [2, 32], strides = [1, 1]} : vector<2x96xf32> to vector<2x32xf32>
    %182 = vector.extract_strided_slice %172 {offsets = [0, 32], sizes = [2, 32], strides = [1, 1]} : vector<2x96xf32> to vector<2x32xf32>
    %183 = arith.addf %181, %182 : vector<2x32xf32>
    %184 = arith.negf %183 : vector<2x32xf32>
    %185 = math.exp %184 : vector<2x32xf32>
    %cst_37 = arith.constant 1.000000e+00 : f32
    %186 = vector.broadcast %cst_37 : f32 to vector<2x32xf32>
    %187 = arith.addf %186, %185 : vector<2x32xf32>
    %188 = arith.divf %186, %187 : vector<2x32xf32>
    %189 = vector.extract_strided_slice %171 {offsets = [0, 64], sizes = [2, 32], strides = [1, 1]} : vector<2x96xf32> to vector<2x32xf32>
    %190 = vector.extract_strided_slice %172 {offsets = [0, 64], sizes = [2, 32], strides = [1, 1]} : vector<2x96xf32> to vector<2x32xf32>
    %191 = vector.broadcast %9 : vector<1x32xf32> to vector<2x32xf32>
    %192 = arith.addf %190, %191 : vector<2x32xf32>
    %193 = arith.mulf %180, %192 : vector<2x32xf32>
    %194 = arith.addf %189, %193 : vector<2x32xf32>
    %195 = math.tanh %194 : vector<2x32xf32>
    %cst_38 = arith.constant 1.000000e+00 : f32
    %196 = vector.broadcast %cst_38 : f32 to vector<2x32xf32>
    %197 = arith.subf %196, %188 : vector<2x32xf32>
    %198 = arith.mulf %197, %195 : vector<2x32xf32>
    %199 = arith.mulf %188, %169 : vector<2x32xf32>
    %200 = arith.addf %198, %199 : vector<2x32xf32>
    %201 = vector.extract_strided_slice %13 {offsets = [6, 0, 0], sizes = [1, 2, 96], strides = [1, 1, 1]} : vector<8x2x96xf32> to vector<1x2x96xf32>
    %202 = vector.shape_cast %201 : vector<1x2x96xf32> to vector<2x96xf32>
    %cst_39 = arith.constant dense<0.000000e+00> : vector<2x96xf32>
    %203 = tpu.matmul %200, %5, %cst_39 {dimension_numbers = #tpu.dot_dimension_numbers<[1], [0], [0], [1], [0, 0, 1, 1], [], []>} : vector<2x32xf32>, vector<32x96xf32>, vector<2x96xf32> -> vector<2x96xf32>
    %204 = vector.extract_strided_slice %202 {offsets = [0, 0], sizes = [2, 32], strides = [1, 1]} : vector<2x96xf32> to vector<2x32xf32>
    %205 = vector.extract_strided_slice %203 {offsets = [0, 0], sizes = [2, 32], strides = [1, 1]} : vector<2x96xf32> to vector<2x32xf32>
    %206 = arith.addf %204, %205 : vector<2x32xf32>
    %207 = arith.negf %206 : vector<2x32xf32>
    %208 = math.exp %207 : vector<2x32xf32>
    %cst_40 = arith.constant 1.000000e+00 : f32
    %209 = vector.broadcast %cst_40 : f32 to vector<2x32xf32>
    %210 = arith.addf %209, %208 : vector<2x32xf32>
    %211 = arith.divf %209, %210 : vector<2x32xf32>
    %212 = vector.extract_strided_slice %202 {offsets = [0, 32], sizes = [2, 32], strides = [1, 1]} : vector<2x96xf32> to vector<2x32xf32>
    %213 = vector.extract_strided_slice %203 {offsets = [0, 32], sizes = [2, 32], strides = [1, 1]} : vector<2x96xf32> to vector<2x32xf32>
    %214 = arith.addf %212, %213 : vector<2x32xf32>
    %215 = arith.negf %214 : vector<2x32xf32>
    %216 = math.exp %215 : vector<2x32xf32>
    %cst_41 = arith.constant 1.000000e+00 : f32
    %217 = vector.broadcast %cst_41 : f32 to vector<2x32xf32>
    %218 = arith.addf %217, %216 : vector<2x32xf32>
    %219 = arith.divf %217, %218 : vector<2x32xf32>
    %220 = vector.extract_strided_slice %202 {offsets = [0, 64], sizes = [2, 32], strides = [1, 1]} : vector<2x96xf32> to vector<2x32xf32>
    %221 = vector.extract_strided_slice %203 {offsets = [0, 64], sizes = [2, 32], strides = [1, 1]} : vector<2x96xf32> to vector<2x32xf32>
    %222 = vector.broadcast %9 : vector<1x32xf32> to vector<2x32xf32>
    %223 = arith.addf %221, %222 : vector<2x32xf32>
    %224 = arith.mulf %211, %223 : vector<2x32xf32>
    %225 = arith.addf %220, %224 : vector<2x32xf32>
    %226 = math.tanh %225 : vector<2x32xf32>
    %cst_42 = arith.constant 1.000000e+00 : f32
    %227 = vector.broadcast %cst_42 : f32 to vector<2x32xf32>
    %228 = arith.subf %227, %219 : vector<2x32xf32>
    %229 = arith.mulf %228, %226 : vector<2x32xf32>
    %230 = arith.mulf %219, %200 : vector<2x32xf32>
    %231 = arith.addf %229, %230 : vector<2x32xf32>
    %232 = vector.extract_strided_slice %13 {offsets = [7, 0, 0], sizes = [1, 2, 96], strides = [1, 1, 1]} : vector<8x2x96xf32> to vector<1x2x96xf32>
    %233 = vector.shape_cast %232 : vector<1x2x96xf32> to vector<2x96xf32>
    %cst_43 = arith.constant dense<0.000000e+00> : vector<2x96xf32>
    %234 = tpu.matmul %231, %5, %cst_43 {dimension_numbers = #tpu.dot_dimension_numbers<[1], [0], [0], [1], [0, 0, 1, 1], [], []>} : vector<2x32xf32>, vector<32x96xf32>, vector<2x96xf32> -> vector<2x96xf32>
    %235 = vector.extract_strided_slice %233 {offsets = [0, 0], sizes = [2, 32], strides = [1, 1]} : vector<2x96xf32> to vector<2x32xf32>
    %236 = vector.extract_strided_slice %234 {offsets = [0, 0], sizes = [2, 32], strides = [1, 1]} : vector<2x96xf32> to vector<2x32xf32>
    %237 = arith.addf %235, %236 : vector<2x32xf32>
    %238 = arith.negf %237 : vector<2x32xf32>
    %239 = math.exp %238 : vector<2x32xf32>
    %cst_44 = arith.constant 1.000000e+00 : f32
    %240 = vector.broadcast %cst_44 : f32 to vector<2x32xf32>
    %241 = arith.addf %240, %239 : vector<2x32xf32>
    %242 = arith.divf %240, %241 : vector<2x32xf32>
    %243 = vector.extract_strided_slice %233 {offsets = [0, 32], sizes = [2, 32], strides = [1, 1]} : vector<2x96xf32> to vector<2x32xf32>
    %244 = vector.extract_strided_slice %234 {offsets = [0, 32], sizes = [2, 32], strides = [1, 1]} : vector<2x96xf32> to vector<2x32xf32>
    %245 = arith.addf %243, %244 : vector<2x32xf32>
    %246 = arith.negf %245 : vector<2x32xf32>
    %247 = math.exp %246 : vector<2x32xf32>
    %cst_45 = arith.constant 1.000000e+00 : f32
    %248 = vector.broadcast %cst_45 : f32 to vector<2x32xf32>
    %249 = arith.addf %248, %247 : vector<2x32xf32>
    %250 = arith.divf %248, %249 : vector<2x32xf32>
    %251 = vector.extract_strided_slice %233 {offsets = [0, 64], sizes = [2, 32], strides = [1, 1]} : vector<2x96xf32> to vector<2x32xf32>
    %252 = vector.extract_strided_slice %234 {offsets = [0, 64], sizes = [2, 32], strides = [1, 1]} : vector<2x96xf32> to vector<2x32xf32>
    %253 = vector.broadcast %9 : vector<1x32xf32> to vector<2x32xf32>
    %254 = arith.addf %252, %253 : vector<2x32xf32>
    %255 = arith.mulf %242, %254 : vector<2x32xf32>
    %256 = arith.addf %251, %255 : vector<2x32xf32>
    %257 = math.tanh %256 : vector<2x32xf32>
    %cst_46 = arith.constant 1.000000e+00 : f32
    %258 = vector.broadcast %cst_46 : f32 to vector<2x32xf32>
    %259 = arith.subf %258, %250 : vector<2x32xf32>
    %260 = arith.mulf %259, %257 : vector<2x32xf32>
    %261 = arith.mulf %250, %231 : vector<2x32xf32>
    %262 = arith.addf %260, %261 : vector<2x32xf32>
    %263 = vector.shape_cast %45 : vector<2x32xf32> to vector<1x2x32xf32>
    %264 = vector.shape_cast %76 : vector<2x32xf32> to vector<1x2x32xf32>
    %265 = vector.shape_cast %107 : vector<2x32xf32> to vector<1x2x32xf32>
    %266 = vector.shape_cast %138 : vector<2x32xf32> to vector<1x2x32xf32>
    %267 = vector.shape_cast %169 : vector<2x32xf32> to vector<1x2x32xf32>
    %268 = vector.shape_cast %200 : vector<2x32xf32> to vector<1x2x32xf32>
    %269 = vector.shape_cast %231 : vector<2x32xf32> to vector<1x2x32xf32>
    %270 = vector.shape_cast %262 : vector<2x32xf32> to vector<1x2x32xf32>
    %271 = tpu.concatenate %263, %264, %265, %266, %267, %268, %269, %270 in 0 : vector<1x2x32xf32>, vector<1x2x32xf32>, vector<1x2x32xf32>, vector<1x2x32xf32>, vector<1x2x32xf32>, vector<1x2x32xf32>, vector<1x2x32xf32>, vector<1x2x32xf32> -> vector<8x2x32xf32>
    %c1 = arith.constant 1 : index
    %c0_47 = arith.constant 0 : index
    %c0_48 = arith.constant 0 : index
    %272 = vector.load %arg1[%c1, %c0_47, %c0_48] : memref<2x16x96xf32, #tpu.memory_space<vmem>>, vector<1x16x96xf32>
    %273 = vector.shape_cast %272 : vector<1x16x96xf32> to vector<16x96xf32>
    %c1_49 = arith.constant 1 : index
    %c0_50 = arith.constant 0 : index
    %c0_51 = arith.constant 0 : index
    %274 = vector.load %arg2[%c1_49, %c0_50, %c0_51] : memref<2x32x96xf32, #tpu.memory_space<vmem>>, vector<1x32x96xf32>
    %275 = vector.shape_cast %274 : vector<1x32x96xf32> to vector<32x96xf32>
    %c1_52 = arith.constant 1 : index
    %c0_53 = arith.constant 0 : index
    %c0_54 = arith.constant 0 : index
    %276 = vector.load %arg3[%c1_52, %c0_53, %c0_54] : memref<2x1x96xf32, #tpu.memory_space<vmem>>, vector<1x1x96xf32>
    %277 = vector.shape_cast %276 : vector<1x1x96xf32> to vector<1x96xf32>
    %c1_55 = arith.constant 1 : index
    %c0_56 = arith.constant 0 : index
    %c0_57 = arith.constant 0 : index
    %278 = vector.load %arg4[%c1_55, %c0_56, %c0_57] : memref<2x1x32xf32, #tpu.memory_space<vmem>>, vector<1x1x32xf32>
    %279 = vector.shape_cast %278 : vector<1x1x32xf32> to vector<1x32xf32>
    %cst_58 = arith.constant dense<0.000000e+00> : vector<16x96xf32>
    %280 = tpu.matmul %1, %273, %cst_58 {dimension_numbers = #tpu.dot_dimension_numbers<[1], [0], [0], [1], [0, 0, 1, 1], [], []>} : vector<16x16xf32>, vector<16x96xf32>, vector<16x96xf32> -> vector<16x96xf32>
    %281 = vector.broadcast %277 : vector<1x96xf32> to vector<16x96xf32>
    %282 = arith.addf %280, %281 : vector<16x96xf32>
    %283 = vector.shape_cast %282 : vector<16x96xf32> to vector<8x2x96xf32>
    %cst_59 = arith.constant 0.000000e+00 : f32
    %284 = vector.broadcast %cst_59 : f32 to vector<2x32xf32>
    %285 = vector.extract_strided_slice %283 {offsets = [7, 0, 0], sizes = [1, 2, 96], strides = [1, 1, 1]} : vector<8x2x96xf32> to vector<1x2x96xf32>
    %286 = vector.shape_cast %285 : vector<1x2x96xf32> to vector<2x96xf32>
    %cst_60 = arith.constant dense<0.000000e+00> : vector<2x96xf32>
    %287 = tpu.matmul %284, %275, %cst_60 {dimension_numbers = #tpu.dot_dimension_numbers<[1], [0], [0], [1], [0, 0, 1, 1], [], []>} : vector<2x32xf32>, vector<32x96xf32>, vector<2x96xf32> -> vector<2x96xf32>
    %288 = vector.extract_strided_slice %286 {offsets = [0, 0], sizes = [2, 32], strides = [1, 1]} : vector<2x96xf32> to vector<2x32xf32>
    %289 = vector.extract_strided_slice %287 {offsets = [0, 0], sizes = [2, 32], strides = [1, 1]} : vector<2x96xf32> to vector<2x32xf32>
    %290 = arith.addf %288, %289 : vector<2x32xf32>
    %291 = arith.negf %290 : vector<2x32xf32>
    %292 = math.exp %291 : vector<2x32xf32>
    %cst_61 = arith.constant 1.000000e+00 : f32
    %293 = vector.broadcast %cst_61 : f32 to vector<2x32xf32>
    %294 = arith.addf %293, %292 : vector<2x32xf32>
    %295 = arith.divf %293, %294 : vector<2x32xf32>
    %296 = vector.extract_strided_slice %286 {offsets = [0, 32], sizes = [2, 32], strides = [1, 1]} : vector<2x96xf32> to vector<2x32xf32>
    %297 = vector.extract_strided_slice %287 {offsets = [0, 32], sizes = [2, 32], strides = [1, 1]} : vector<2x96xf32> to vector<2x32xf32>
    %298 = arith.addf %296, %297 : vector<2x32xf32>
    %299 = arith.negf %298 : vector<2x32xf32>
    %300 = math.exp %299 : vector<2x32xf32>
    %cst_62 = arith.constant 1.000000e+00 : f32
    %301 = vector.broadcast %cst_62 : f32 to vector<2x32xf32>
    %302 = arith.addf %301, %300 : vector<2x32xf32>
    %303 = arith.divf %301, %302 : vector<2x32xf32>
    %304 = vector.extract_strided_slice %286 {offsets = [0, 64], sizes = [2, 32], strides = [1, 1]} : vector<2x96xf32> to vector<2x32xf32>
    %305 = vector.extract_strided_slice %287 {offsets = [0, 64], sizes = [2, 32], strides = [1, 1]} : vector<2x96xf32> to vector<2x32xf32>
    %306 = vector.broadcast %279 : vector<1x32xf32> to vector<2x32xf32>
    %307 = arith.addf %305, %306 : vector<2x32xf32>
    %308 = arith.mulf %295, %307 : vector<2x32xf32>
    %309 = arith.addf %304, %308 : vector<2x32xf32>
    %310 = math.tanh %309 : vector<2x32xf32>
    %cst_63 = arith.constant 1.000000e+00 : f32
    %311 = vector.broadcast %cst_63 : f32 to vector<2x32xf32>
    %312 = arith.subf %311, %303 : vector<2x32xf32>
    %313 = arith.mulf %312, %310 : vector<2x32xf32>
    %314 = arith.mulf %303, %284 : vector<2x32xf32>
    %315 = arith.addf %313, %314 : vector<2x32xf32>
    %316 = vector.extract_strided_slice %283 {offsets = [6, 0, 0], sizes = [1, 2, 96], strides = [1, 1, 1]} : vector<8x2x96xf32> to vector<1x2x96xf32>
    %317 = vector.shape_cast %316 : vector<1x2x96xf32> to vector<2x96xf32>
    %cst_64 = arith.constant dense<0.000000e+00> : vector<2x96xf32>
    %318 = tpu.matmul %315, %275, %cst_64 {dimension_numbers = #tpu.dot_dimension_numbers<[1], [0], [0], [1], [0, 0, 1, 1], [], []>} : vector<2x32xf32>, vector<32x96xf32>, vector<2x96xf32> -> vector<2x96xf32>
    %319 = vector.extract_strided_slice %317 {offsets = [0, 0], sizes = [2, 32], strides = [1, 1]} : vector<2x96xf32> to vector<2x32xf32>
    %320 = vector.extract_strided_slice %318 {offsets = [0, 0], sizes = [2, 32], strides = [1, 1]} : vector<2x96xf32> to vector<2x32xf32>
    %321 = arith.addf %319, %320 : vector<2x32xf32>
    %322 = arith.negf %321 : vector<2x32xf32>
    %323 = math.exp %322 : vector<2x32xf32>
    %cst_65 = arith.constant 1.000000e+00 : f32
    %324 = vector.broadcast %cst_65 : f32 to vector<2x32xf32>
    %325 = arith.addf %324, %323 : vector<2x32xf32>
    %326 = arith.divf %324, %325 : vector<2x32xf32>
    %327 = vector.extract_strided_slice %317 {offsets = [0, 32], sizes = [2, 32], strides = [1, 1]} : vector<2x96xf32> to vector<2x32xf32>
    %328 = vector.extract_strided_slice %318 {offsets = [0, 32], sizes = [2, 32], strides = [1, 1]} : vector<2x96xf32> to vector<2x32xf32>
    %329 = arith.addf %327, %328 : vector<2x32xf32>
    %330 = arith.negf %329 : vector<2x32xf32>
    %331 = math.exp %330 : vector<2x32xf32>
    %cst_66 = arith.constant 1.000000e+00 : f32
    %332 = vector.broadcast %cst_66 : f32 to vector<2x32xf32>
    %333 = arith.addf %332, %331 : vector<2x32xf32>
    %334 = arith.divf %332, %333 : vector<2x32xf32>
    %335 = vector.extract_strided_slice %317 {offsets = [0, 64], sizes = [2, 32], strides = [1, 1]} : vector<2x96xf32> to vector<2x32xf32>
    %336 = vector.extract_strided_slice %318 {offsets = [0, 64], sizes = [2, 32], strides = [1, 1]} : vector<2x96xf32> to vector<2x32xf32>
    %337 = vector.broadcast %279 : vector<1x32xf32> to vector<2x32xf32>
    %338 = arith.addf %336, %337 : vector<2x32xf32>
    %339 = arith.mulf %326, %338 : vector<2x32xf32>
    %340 = arith.addf %335, %339 : vector<2x32xf32>
    %341 = math.tanh %340 : vector<2x32xf32>
    %cst_67 = arith.constant 1.000000e+00 : f32
    %342 = vector.broadcast %cst_67 : f32 to vector<2x32xf32>
    %343 = arith.subf %342, %334 : vector<2x32xf32>
    %344 = arith.mulf %343, %341 : vector<2x32xf32>
    %345 = arith.mulf %334, %315 : vector<2x32xf32>
    %346 = arith.addf %344, %345 : vector<2x32xf32>
    %347 = vector.extract_strided_slice %283 {offsets = [5, 0, 0], sizes = [1, 2, 96], strides = [1, 1, 1]} : vector<8x2x96xf32> to vector<1x2x96xf32>
    %348 = vector.shape_cast %347 : vector<1x2x96xf32> to vector<2x96xf32>
    %cst_68 = arith.constant dense<0.000000e+00> : vector<2x96xf32>
    %349 = tpu.matmul %346, %275, %cst_68 {dimension_numbers = #tpu.dot_dimension_numbers<[1], [0], [0], [1], [0, 0, 1, 1], [], []>} : vector<2x32xf32>, vector<32x96xf32>, vector<2x96xf32> -> vector<2x96xf32>
    %350 = vector.extract_strided_slice %348 {offsets = [0, 0], sizes = [2, 32], strides = [1, 1]} : vector<2x96xf32> to vector<2x32xf32>
    %351 = vector.extract_strided_slice %349 {offsets = [0, 0], sizes = [2, 32], strides = [1, 1]} : vector<2x96xf32> to vector<2x32xf32>
    %352 = arith.addf %350, %351 : vector<2x32xf32>
    %353 = arith.negf %352 : vector<2x32xf32>
    %354 = math.exp %353 : vector<2x32xf32>
    %cst_69 = arith.constant 1.000000e+00 : f32
    %355 = vector.broadcast %cst_69 : f32 to vector<2x32xf32>
    %356 = arith.addf %355, %354 : vector<2x32xf32>
    %357 = arith.divf %355, %356 : vector<2x32xf32>
    %358 = vector.extract_strided_slice %348 {offsets = [0, 32], sizes = [2, 32], strides = [1, 1]} : vector<2x96xf32> to vector<2x32xf32>
    %359 = vector.extract_strided_slice %349 {offsets = [0, 32], sizes = [2, 32], strides = [1, 1]} : vector<2x96xf32> to vector<2x32xf32>
    %360 = arith.addf %358, %359 : vector<2x32xf32>
    %361 = arith.negf %360 : vector<2x32xf32>
    %362 = math.exp %361 : vector<2x32xf32>
    %cst_70 = arith.constant 1.000000e+00 : f32
    %363 = vector.broadcast %cst_70 : f32 to vector<2x32xf32>
    %364 = arith.addf %363, %362 : vector<2x32xf32>
    %365 = arith.divf %363, %364 : vector<2x32xf32>
    %366 = vector.extract_strided_slice %348 {offsets = [0, 64], sizes = [2, 32], strides = [1, 1]} : vector<2x96xf32> to vector<2x32xf32>
    %367 = vector.extract_strided_slice %349 {offsets = [0, 64], sizes = [2, 32], strides = [1, 1]} : vector<2x96xf32> to vector<2x32xf32>
    %368 = vector.broadcast %279 : vector<1x32xf32> to vector<2x32xf32>
    %369 = arith.addf %367, %368 : vector<2x32xf32>
    %370 = arith.mulf %357, %369 : vector<2x32xf32>
    %371 = arith.addf %366, %370 : vector<2x32xf32>
    %372 = math.tanh %371 : vector<2x32xf32>
    %cst_71 = arith.constant 1.000000e+00 : f32
    %373 = vector.broadcast %cst_71 : f32 to vector<2x32xf32>
    %374 = arith.subf %373, %365 : vector<2x32xf32>
    %375 = arith.mulf %374, %372 : vector<2x32xf32>
    %376 = arith.mulf %365, %346 : vector<2x32xf32>
    %377 = arith.addf %375, %376 : vector<2x32xf32>
    %378 = vector.extract_strided_slice %283 {offsets = [4, 0, 0], sizes = [1, 2, 96], strides = [1, 1, 1]} : vector<8x2x96xf32> to vector<1x2x96xf32>
    %379 = vector.shape_cast %378 : vector<1x2x96xf32> to vector<2x96xf32>
    %cst_72 = arith.constant dense<0.000000e+00> : vector<2x96xf32>
    %380 = tpu.matmul %377, %275, %cst_72 {dimension_numbers = #tpu.dot_dimension_numbers<[1], [0], [0], [1], [0, 0, 1, 1], [], []>} : vector<2x32xf32>, vector<32x96xf32>, vector<2x96xf32> -> vector<2x96xf32>
    %381 = vector.extract_strided_slice %379 {offsets = [0, 0], sizes = [2, 32], strides = [1, 1]} : vector<2x96xf32> to vector<2x32xf32>
    %382 = vector.extract_strided_slice %380 {offsets = [0, 0], sizes = [2, 32], strides = [1, 1]} : vector<2x96xf32> to vector<2x32xf32>
    %383 = arith.addf %381, %382 : vector<2x32xf32>
    %384 = arith.negf %383 : vector<2x32xf32>
    %385 = math.exp %384 : vector<2x32xf32>
    %cst_73 = arith.constant 1.000000e+00 : f32
    %386 = vector.broadcast %cst_73 : f32 to vector<2x32xf32>
    %387 = arith.addf %386, %385 : vector<2x32xf32>
    %388 = arith.divf %386, %387 : vector<2x32xf32>
    %389 = vector.extract_strided_slice %379 {offsets = [0, 32], sizes = [2, 32], strides = [1, 1]} : vector<2x96xf32> to vector<2x32xf32>
    %390 = vector.extract_strided_slice %380 {offsets = [0, 32], sizes = [2, 32], strides = [1, 1]} : vector<2x96xf32> to vector<2x32xf32>
    %391 = arith.addf %389, %390 : vector<2x32xf32>
    %392 = arith.negf %391 : vector<2x32xf32>
    %393 = math.exp %392 : vector<2x32xf32>
    %cst_74 = arith.constant 1.000000e+00 : f32
    %394 = vector.broadcast %cst_74 : f32 to vector<2x32xf32>
    %395 = arith.addf %394, %393 : vector<2x32xf32>
    %396 = arith.divf %394, %395 : vector<2x32xf32>
    %397 = vector.extract_strided_slice %379 {offsets = [0, 64], sizes = [2, 32], strides = [1, 1]} : vector<2x96xf32> to vector<2x32xf32>
    %398 = vector.extract_strided_slice %380 {offsets = [0, 64], sizes = [2, 32], strides = [1, 1]} : vector<2x96xf32> to vector<2x32xf32>
    %399 = vector.broadcast %279 : vector<1x32xf32> to vector<2x32xf32>
    %400 = arith.addf %398, %399 : vector<2x32xf32>
    %401 = arith.mulf %388, %400 : vector<2x32xf32>
    %402 = arith.addf %397, %401 : vector<2x32xf32>
    %403 = math.tanh %402 : vector<2x32xf32>
    %cst_75 = arith.constant 1.000000e+00 : f32
    %404 = vector.broadcast %cst_75 : f32 to vector<2x32xf32>
    %405 = arith.subf %404, %396 : vector<2x32xf32>
    %406 = arith.mulf %405, %403 : vector<2x32xf32>
    %407 = arith.mulf %396, %377 : vector<2x32xf32>
    %408 = arith.addf %406, %407 : vector<2x32xf32>
    %409 = vector.extract_strided_slice %283 {offsets = [3, 0, 0], sizes = [1, 2, 96], strides = [1, 1, 1]} : vector<8x2x96xf32> to vector<1x2x96xf32>
    %410 = vector.shape_cast %409 : vector<1x2x96xf32> to vector<2x96xf32>
    %cst_76 = arith.constant dense<0.000000e+00> : vector<2x96xf32>
    %411 = tpu.matmul %408, %275, %cst_76 {dimension_numbers = #tpu.dot_dimension_numbers<[1], [0], [0], [1], [0, 0, 1, 1], [], []>} : vector<2x32xf32>, vector<32x96xf32>, vector<2x96xf32> -> vector<2x96xf32>
    %412 = vector.extract_strided_slice %410 {offsets = [0, 0], sizes = [2, 32], strides = [1, 1]} : vector<2x96xf32> to vector<2x32xf32>
    %413 = vector.extract_strided_slice %411 {offsets = [0, 0], sizes = [2, 32], strides = [1, 1]} : vector<2x96xf32> to vector<2x32xf32>
    %414 = arith.addf %412, %413 : vector<2x32xf32>
    %415 = arith.negf %414 : vector<2x32xf32>
    %416 = math.exp %415 : vector<2x32xf32>
    %cst_77 = arith.constant 1.000000e+00 : f32
    %417 = vector.broadcast %cst_77 : f32 to vector<2x32xf32>
    %418 = arith.addf %417, %416 : vector<2x32xf32>
    %419 = arith.divf %417, %418 : vector<2x32xf32>
    %420 = vector.extract_strided_slice %410 {offsets = [0, 32], sizes = [2, 32], strides = [1, 1]} : vector<2x96xf32> to vector<2x32xf32>
    %421 = vector.extract_strided_slice %411 {offsets = [0, 32], sizes = [2, 32], strides = [1, 1]} : vector<2x96xf32> to vector<2x32xf32>
    %422 = arith.addf %420, %421 : vector<2x32xf32>
    %423 = arith.negf %422 : vector<2x32xf32>
    %424 = math.exp %423 : vector<2x32xf32>
    %cst_78 = arith.constant 1.000000e+00 : f32
    %425 = vector.broadcast %cst_78 : f32 to vector<2x32xf32>
    %426 = arith.addf %425, %424 : vector<2x32xf32>
    %427 = arith.divf %425, %426 : vector<2x32xf32>
    %428 = vector.extract_strided_slice %410 {offsets = [0, 64], sizes = [2, 32], strides = [1, 1]} : vector<2x96xf32> to vector<2x32xf32>
    %429 = vector.extract_strided_slice %411 {offsets = [0, 64], sizes = [2, 32], strides = [1, 1]} : vector<2x96xf32> to vector<2x32xf32>
    %430 = vector.broadcast %279 : vector<1x32xf32> to vector<2x32xf32>
    %431 = arith.addf %429, %430 : vector<2x32xf32>
    %432 = arith.mulf %419, %431 : vector<2x32xf32>
    %433 = arith.addf %428, %432 : vector<2x32xf32>
    %434 = math.tanh %433 : vector<2x32xf32>
    %cst_79 = arith.constant 1.000000e+00 : f32
    %435 = vector.broadcast %cst_79 : f32 to vector<2x32xf32>
    %436 = arith.subf %435, %427 : vector<2x32xf32>
    %437 = arith.mulf %436, %434 : vector<2x32xf32>
    %438 = arith.mulf %427, %408 : vector<2x32xf32>
    %439 = arith.addf %437, %438 : vector<2x32xf32>
    %440 = vector.extract_strided_slice %283 {offsets = [2, 0, 0], sizes = [1, 2, 96], strides = [1, 1, 1]} : vector<8x2x96xf32> to vector<1x2x96xf32>
    %441 = vector.shape_cast %440 : vector<1x2x96xf32> to vector<2x96xf32>
    %cst_80 = arith.constant dense<0.000000e+00> : vector<2x96xf32>
    %442 = tpu.matmul %439, %275, %cst_80 {dimension_numbers = #tpu.dot_dimension_numbers<[1], [0], [0], [1], [0, 0, 1, 1], [], []>} : vector<2x32xf32>, vector<32x96xf32>, vector<2x96xf32> -> vector<2x96xf32>
    %443 = vector.extract_strided_slice %441 {offsets = [0, 0], sizes = [2, 32], strides = [1, 1]} : vector<2x96xf32> to vector<2x32xf32>
    %444 = vector.extract_strided_slice %442 {offsets = [0, 0], sizes = [2, 32], strides = [1, 1]} : vector<2x96xf32> to vector<2x32xf32>
    %445 = arith.addf %443, %444 : vector<2x32xf32>
    %446 = arith.negf %445 : vector<2x32xf32>
    %447 = math.exp %446 : vector<2x32xf32>
    %cst_81 = arith.constant 1.000000e+00 : f32
    %448 = vector.broadcast %cst_81 : f32 to vector<2x32xf32>
    %449 = arith.addf %448, %447 : vector<2x32xf32>
    %450 = arith.divf %448, %449 : vector<2x32xf32>
    %451 = vector.extract_strided_slice %441 {offsets = [0, 32], sizes = [2, 32], strides = [1, 1]} : vector<2x96xf32> to vector<2x32xf32>
    %452 = vector.extract_strided_slice %442 {offsets = [0, 32], sizes = [2, 32], strides = [1, 1]} : vector<2x96xf32> to vector<2x32xf32>
    %453 = arith.addf %451, %452 : vector<2x32xf32>
    %454 = arith.negf %453 : vector<2x32xf32>
    %455 = math.exp %454 : vector<2x32xf32>
    %cst_82 = arith.constant 1.000000e+00 : f32
    %456 = vector.broadcast %cst_82 : f32 to vector<2x32xf32>
    %457 = arith.addf %456, %455 : vector<2x32xf32>
    %458 = arith.divf %456, %457 : vector<2x32xf32>
    %459 = vector.extract_strided_slice %441 {offsets = [0, 64], sizes = [2, 32], strides = [1, 1]} : vector<2x96xf32> to vector<2x32xf32>
    %460 = vector.extract_strided_slice %442 {offsets = [0, 64], sizes = [2, 32], strides = [1, 1]} : vector<2x96xf32> to vector<2x32xf32>
    %461 = vector.broadcast %279 : vector<1x32xf32> to vector<2x32xf32>
    %462 = arith.addf %460, %461 : vector<2x32xf32>
    %463 = arith.mulf %450, %462 : vector<2x32xf32>
    %464 = arith.addf %459, %463 : vector<2x32xf32>
    %465 = math.tanh %464 : vector<2x32xf32>
    %cst_83 = arith.constant 1.000000e+00 : f32
    %466 = vector.broadcast %cst_83 : f32 to vector<2x32xf32>
    %467 = arith.subf %466, %458 : vector<2x32xf32>
    %468 = arith.mulf %467, %465 : vector<2x32xf32>
    %469 = arith.mulf %458, %439 : vector<2x32xf32>
    %470 = arith.addf %468, %469 : vector<2x32xf32>
    %471 = vector.extract_strided_slice %283 {offsets = [1, 0, 0], sizes = [1, 2, 96], strides = [1, 1, 1]} : vector<8x2x96xf32> to vector<1x2x96xf32>
    %472 = vector.shape_cast %471 : vector<1x2x96xf32> to vector<2x96xf32>
    %cst_84 = arith.constant dense<0.000000e+00> : vector<2x96xf32>
    %473 = tpu.matmul %470, %275, %cst_84 {dimension_numbers = #tpu.dot_dimension_numbers<[1], [0], [0], [1], [0, 0, 1, 1], [], []>} : vector<2x32xf32>, vector<32x96xf32>, vector<2x96xf32> -> vector<2x96xf32>
    %474 = vector.extract_strided_slice %472 {offsets = [0, 0], sizes = [2, 32], strides = [1, 1]} : vector<2x96xf32> to vector<2x32xf32>
    %475 = vector.extract_strided_slice %473 {offsets = [0, 0], sizes = [2, 32], strides = [1, 1]} : vector<2x96xf32> to vector<2x32xf32>
    %476 = arith.addf %474, %475 : vector<2x32xf32>
    %477 = arith.negf %476 : vector<2x32xf32>
    %478 = math.exp %477 : vector<2x32xf32>
    %cst_85 = arith.constant 1.000000e+00 : f32
    %479 = vector.broadcast %cst_85 : f32 to vector<2x32xf32>
    %480 = arith.addf %479, %478 : vector<2x32xf32>
    %481 = arith.divf %479, %480 : vector<2x32xf32>
    %482 = vector.extract_strided_slice %472 {offsets = [0, 32], sizes = [2, 32], strides = [1, 1]} : vector<2x96xf32> to vector<2x32xf32>
    %483 = vector.extract_strided_slice %473 {offsets = [0, 32], sizes = [2, 32], strides = [1, 1]} : vector<2x96xf32> to vector<2x32xf32>
    %484 = arith.addf %482, %483 : vector<2x32xf32>
    %485 = arith.negf %484 : vector<2x32xf32>
    %486 = math.exp %485 : vector<2x32xf32>
    %cst_86 = arith.constant 1.000000e+00 : f32
    %487 = vector.broadcast %cst_86 : f32 to vector<2x32xf32>
    %488 = arith.addf %487, %486 : vector<2x32xf32>
    %489 = arith.divf %487, %488 : vector<2x32xf32>
    %490 = vector.extract_strided_slice %472 {offsets = [0, 64], sizes = [2, 32], strides = [1, 1]} : vector<2x96xf32> to vector<2x32xf32>
    %491 = vector.extract_strided_slice %473 {offsets = [0, 64], sizes = [2, 32], strides = [1, 1]} : vector<2x96xf32> to vector<2x32xf32>
    %492 = vector.broadcast %279 : vector<1x32xf32> to vector<2x32xf32>
    %493 = arith.addf %491, %492 : vector<2x32xf32>
    %494 = arith.mulf %481, %493 : vector<2x32xf32>
    %495 = arith.addf %490, %494 : vector<2x32xf32>
    %496 = math.tanh %495 : vector<2x32xf32>
    %cst_87 = arith.constant 1.000000e+00 : f32
    %497 = vector.broadcast %cst_87 : f32 to vector<2x32xf32>
    %498 = arith.subf %497, %489 : vector<2x32xf32>
    %499 = arith.mulf %498, %496 : vector<2x32xf32>
    %500 = arith.mulf %489, %470 : vector<2x32xf32>
    %501 = arith.addf %499, %500 : vector<2x32xf32>
    %502 = vector.extract_strided_slice %283 {offsets = [0, 0, 0], sizes = [1, 2, 96], strides = [1, 1, 1]} : vector<8x2x96xf32> to vector<1x2x96xf32>
    %503 = vector.shape_cast %502 : vector<1x2x96xf32> to vector<2x96xf32>
    %cst_88 = arith.constant dense<0.000000e+00> : vector<2x96xf32>
    %504 = tpu.matmul %501, %275, %cst_88 {dimension_numbers = #tpu.dot_dimension_numbers<[1], [0], [0], [1], [0, 0, 1, 1], [], []>} : vector<2x32xf32>, vector<32x96xf32>, vector<2x96xf32> -> vector<2x96xf32>
    %505 = vector.extract_strided_slice %503 {offsets = [0, 0], sizes = [2, 32], strides = [1, 1]} : vector<2x96xf32> to vector<2x32xf32>
    %506 = vector.extract_strided_slice %504 {offsets = [0, 0], sizes = [2, 32], strides = [1, 1]} : vector<2x96xf32> to vector<2x32xf32>
    %507 = arith.addf %505, %506 : vector<2x32xf32>
    %508 = arith.negf %507 : vector<2x32xf32>
    %509 = math.exp %508 : vector<2x32xf32>
    %cst_89 = arith.constant 1.000000e+00 : f32
    %510 = vector.broadcast %cst_89 : f32 to vector<2x32xf32>
    %511 = arith.addf %510, %509 : vector<2x32xf32>
    %512 = arith.divf %510, %511 : vector<2x32xf32>
    %513 = vector.extract_strided_slice %503 {offsets = [0, 32], sizes = [2, 32], strides = [1, 1]} : vector<2x96xf32> to vector<2x32xf32>
    %514 = vector.extract_strided_slice %504 {offsets = [0, 32], sizes = [2, 32], strides = [1, 1]} : vector<2x96xf32> to vector<2x32xf32>
    %515 = arith.addf %513, %514 : vector<2x32xf32>
    %516 = arith.negf %515 : vector<2x32xf32>
    %517 = math.exp %516 : vector<2x32xf32>
    %cst_90 = arith.constant 1.000000e+00 : f32
    %518 = vector.broadcast %cst_90 : f32 to vector<2x32xf32>
    %519 = arith.addf %518, %517 : vector<2x32xf32>
    %520 = arith.divf %518, %519 : vector<2x32xf32>
    %521 = vector.extract_strided_slice %503 {offsets = [0, 64], sizes = [2, 32], strides = [1, 1]} : vector<2x96xf32> to vector<2x32xf32>
    %522 = vector.extract_strided_slice %504 {offsets = [0, 64], sizes = [2, 32], strides = [1, 1]} : vector<2x96xf32> to vector<2x32xf32>
    %523 = vector.broadcast %279 : vector<1x32xf32> to vector<2x32xf32>
    %524 = arith.addf %522, %523 : vector<2x32xf32>
    %525 = arith.mulf %512, %524 : vector<2x32xf32>
    %526 = arith.addf %521, %525 : vector<2x32xf32>
    %527 = math.tanh %526 : vector<2x32xf32>
    %cst_91 = arith.constant 1.000000e+00 : f32
    %528 = vector.broadcast %cst_91 : f32 to vector<2x32xf32>
    %529 = arith.subf %528, %520 : vector<2x32xf32>
    %530 = arith.mulf %529, %527 : vector<2x32xf32>
    %531 = arith.mulf %520, %501 : vector<2x32xf32>
    %532 = arith.addf %530, %531 : vector<2x32xf32>
    %533 = vector.shape_cast %532 : vector<2x32xf32> to vector<1x2x32xf32>
    %534 = vector.shape_cast %501 : vector<2x32xf32> to vector<1x2x32xf32>
    %535 = vector.shape_cast %470 : vector<2x32xf32> to vector<1x2x32xf32>
    %536 = vector.shape_cast %439 : vector<2x32xf32> to vector<1x2x32xf32>
    %537 = vector.shape_cast %408 : vector<2x32xf32> to vector<1x2x32xf32>
    %538 = vector.shape_cast %377 : vector<2x32xf32> to vector<1x2x32xf32>
    %539 = vector.shape_cast %346 : vector<2x32xf32> to vector<1x2x32xf32>
    %540 = vector.shape_cast %315 : vector<2x32xf32> to vector<1x2x32xf32>
    %541 = tpu.concatenate %533, %534, %535, %536, %537, %538, %539, %540 in 0 : vector<1x2x32xf32>, vector<1x2x32xf32>, vector<1x2x32xf32>, vector<1x2x32xf32>, vector<1x2x32xf32>, vector<1x2x32xf32>, vector<1x2x32xf32>, vector<1x2x32xf32> -> vector<8x2x32xf32>
    %542 = tpu.concatenate %271, %541 in 2 : vector<8x2x32xf32>, vector<8x2x32xf32> -> vector<8x2x64xf32>
    %543 = vector.shape_cast %542 : vector<8x2x64xf32> to vector<16x64xf32>
    %c0_92 = arith.constant 0 : index
    %c0_93 = arith.constant 0 : index
    %c0_94 = arith.constant 0 : index
    %544 = vector.load %arg5[%c0_92, %c0_93, %c0_94] : memref<2x64x96xf32, #tpu.memory_space<vmem>>, vector<1x64x96xf32>
    %545 = vector.shape_cast %544 : vector<1x64x96xf32> to vector<64x96xf32>
    %c0_95 = arith.constant 0 : index
    %c0_96 = arith.constant 0 : index
    %c0_97 = arith.constant 0 : index
    %546 = vector.load %arg6[%c0_95, %c0_96, %c0_97] : memref<2x32x96xf32, #tpu.memory_space<vmem>>, vector<1x32x96xf32>
    %547 = vector.shape_cast %546 : vector<1x32x96xf32> to vector<32x96xf32>
    %c0_98 = arith.constant 0 : index
    %c0_99 = arith.constant 0 : index
    %c0_100 = arith.constant 0 : index
    %548 = vector.load %arg7[%c0_98, %c0_99, %c0_100] : memref<2x1x96xf32, #tpu.memory_space<vmem>>, vector<1x1x96xf32>
    %549 = vector.shape_cast %548 : vector<1x1x96xf32> to vector<1x96xf32>
    %c0_101 = arith.constant 0 : index
    %c0_102 = arith.constant 0 : index
    %c0_103 = arith.constant 0 : index
    %550 = vector.load %arg8[%c0_101, %c0_102, %c0_103] : memref<2x1x32xf32, #tpu.memory_space<vmem>>, vector<1x1x32xf32>
    %551 = vector.shape_cast %550 : vector<1x1x32xf32> to vector<1x32xf32>
    %cst_104 = arith.constant dense<0.000000e+00> : vector<16x96xf32>
    %552 = tpu.matmul %543, %545, %cst_104 {dimension_numbers = #tpu.dot_dimension_numbers<[1], [0], [0], [1], [0, 0, 1, 1], [], []>} : vector<16x64xf32>, vector<64x96xf32>, vector<16x96xf32> -> vector<16x96xf32>
    %553 = vector.broadcast %549 : vector<1x96xf32> to vector<16x96xf32>
    %554 = arith.addf %552, %553 : vector<16x96xf32>
    %555 = vector.shape_cast %554 : vector<16x96xf32> to vector<8x2x96xf32>
    %cst_105 = arith.constant 0.000000e+00 : f32
    %556 = vector.broadcast %cst_105 : f32 to vector<2x32xf32>
    %557 = vector.extract_strided_slice %555 {offsets = [0, 0, 0], sizes = [1, 2, 96], strides = [1, 1, 1]} : vector<8x2x96xf32> to vector<1x2x96xf32>
    %558 = vector.shape_cast %557 : vector<1x2x96xf32> to vector<2x96xf32>
    %cst_106 = arith.constant dense<0.000000e+00> : vector<2x96xf32>
    %559 = tpu.matmul %556, %547, %cst_106 {dimension_numbers = #tpu.dot_dimension_numbers<[1], [0], [0], [1], [0, 0, 1, 1], [], []>} : vector<2x32xf32>, vector<32x96xf32>, vector<2x96xf32> -> vector<2x96xf32>
    %560 = vector.extract_strided_slice %558 {offsets = [0, 0], sizes = [2, 32], strides = [1, 1]} : vector<2x96xf32> to vector<2x32xf32>
    %561 = vector.extract_strided_slice %559 {offsets = [0, 0], sizes = [2, 32], strides = [1, 1]} : vector<2x96xf32> to vector<2x32xf32>
    %562 = arith.addf %560, %561 : vector<2x32xf32>
    %563 = arith.negf %562 : vector<2x32xf32>
    %564 = math.exp %563 : vector<2x32xf32>
    %cst_107 = arith.constant 1.000000e+00 : f32
    %565 = vector.broadcast %cst_107 : f32 to vector<2x32xf32>
    %566 = arith.addf %565, %564 : vector<2x32xf32>
    %567 = arith.divf %565, %566 : vector<2x32xf32>
    %568 = vector.extract_strided_slice %558 {offsets = [0, 32], sizes = [2, 32], strides = [1, 1]} : vector<2x96xf32> to vector<2x32xf32>
    %569 = vector.extract_strided_slice %559 {offsets = [0, 32], sizes = [2, 32], strides = [1, 1]} : vector<2x96xf32> to vector<2x32xf32>
    %570 = arith.addf %568, %569 : vector<2x32xf32>
    %571 = arith.negf %570 : vector<2x32xf32>
    %572 = math.exp %571 : vector<2x32xf32>
    %cst_108 = arith.constant 1.000000e+00 : f32
    %573 = vector.broadcast %cst_108 : f32 to vector<2x32xf32>
    %574 = arith.addf %573, %572 : vector<2x32xf32>
    %575 = arith.divf %573, %574 : vector<2x32xf32>
    %576 = vector.extract_strided_slice %558 {offsets = [0, 64], sizes = [2, 32], strides = [1, 1]} : vector<2x96xf32> to vector<2x32xf32>
    %577 = vector.extract_strided_slice %559 {offsets = [0, 64], sizes = [2, 32], strides = [1, 1]} : vector<2x96xf32> to vector<2x32xf32>
    %578 = vector.broadcast %551 : vector<1x32xf32> to vector<2x32xf32>
    %579 = arith.addf %577, %578 : vector<2x32xf32>
    %580 = arith.mulf %567, %579 : vector<2x32xf32>
    %581 = arith.addf %576, %580 : vector<2x32xf32>
    %582 = math.tanh %581 : vector<2x32xf32>
    %cst_109 = arith.constant 1.000000e+00 : f32
    %583 = vector.broadcast %cst_109 : f32 to vector<2x32xf32>
    %584 = arith.subf %583, %575 : vector<2x32xf32>
    %585 = arith.mulf %584, %582 : vector<2x32xf32>
    %586 = arith.mulf %575, %556 : vector<2x32xf32>
    %587 = arith.addf %585, %586 : vector<2x32xf32>
    %588 = vector.extract_strided_slice %555 {offsets = [1, 0, 0], sizes = [1, 2, 96], strides = [1, 1, 1]} : vector<8x2x96xf32> to vector<1x2x96xf32>
    %589 = vector.shape_cast %588 : vector<1x2x96xf32> to vector<2x96xf32>
    %cst_110 = arith.constant dense<0.000000e+00> : vector<2x96xf32>
    %590 = tpu.matmul %587, %547, %cst_110 {dimension_numbers = #tpu.dot_dimension_numbers<[1], [0], [0], [1], [0, 0, 1, 1], [], []>} : vector<2x32xf32>, vector<32x96xf32>, vector<2x96xf32> -> vector<2x96xf32>
    %591 = vector.extract_strided_slice %589 {offsets = [0, 0], sizes = [2, 32], strides = [1, 1]} : vector<2x96xf32> to vector<2x32xf32>
    %592 = vector.extract_strided_slice %590 {offsets = [0, 0], sizes = [2, 32], strides = [1, 1]} : vector<2x96xf32> to vector<2x32xf32>
    %593 = arith.addf %591, %592 : vector<2x32xf32>
    %594 = arith.negf %593 : vector<2x32xf32>
    %595 = math.exp %594 : vector<2x32xf32>
    %cst_111 = arith.constant 1.000000e+00 : f32
    %596 = vector.broadcast %cst_111 : f32 to vector<2x32xf32>
    %597 = arith.addf %596, %595 : vector<2x32xf32>
    %598 = arith.divf %596, %597 : vector<2x32xf32>
    %599 = vector.extract_strided_slice %589 {offsets = [0, 32], sizes = [2, 32], strides = [1, 1]} : vector<2x96xf32> to vector<2x32xf32>
    %600 = vector.extract_strided_slice %590 {offsets = [0, 32], sizes = [2, 32], strides = [1, 1]} : vector<2x96xf32> to vector<2x32xf32>
    %601 = arith.addf %599, %600 : vector<2x32xf32>
    %602 = arith.negf %601 : vector<2x32xf32>
    %603 = math.exp %602 : vector<2x32xf32>
    %cst_112 = arith.constant 1.000000e+00 : f32
    %604 = vector.broadcast %cst_112 : f32 to vector<2x32xf32>
    %605 = arith.addf %604, %603 : vector<2x32xf32>
    %606 = arith.divf %604, %605 : vector<2x32xf32>
    %607 = vector.extract_strided_slice %589 {offsets = [0, 64], sizes = [2, 32], strides = [1, 1]} : vector<2x96xf32> to vector<2x32xf32>
    %608 = vector.extract_strided_slice %590 {offsets = [0, 64], sizes = [2, 32], strides = [1, 1]} : vector<2x96xf32> to vector<2x32xf32>
    %609 = vector.broadcast %551 : vector<1x32xf32> to vector<2x32xf32>
    %610 = arith.addf %608, %609 : vector<2x32xf32>
    %611 = arith.mulf %598, %610 : vector<2x32xf32>
    %612 = arith.addf %607, %611 : vector<2x32xf32>
    %613 = math.tanh %612 : vector<2x32xf32>
    %cst_113 = arith.constant 1.000000e+00 : f32
    %614 = vector.broadcast %cst_113 : f32 to vector<2x32xf32>
    %615 = arith.subf %614, %606 : vector<2x32xf32>
    %616 = arith.mulf %615, %613 : vector<2x32xf32>
    %617 = arith.mulf %606, %587 : vector<2x32xf32>
    %618 = arith.addf %616, %617 : vector<2x32xf32>
    %619 = vector.extract_strided_slice %555 {offsets = [2, 0, 0], sizes = [1, 2, 96], strides = [1, 1, 1]} : vector<8x2x96xf32> to vector<1x2x96xf32>
    %620 = vector.shape_cast %619 : vector<1x2x96xf32> to vector<2x96xf32>
    %cst_114 = arith.constant dense<0.000000e+00> : vector<2x96xf32>
    %621 = tpu.matmul %618, %547, %cst_114 {dimension_numbers = #tpu.dot_dimension_numbers<[1], [0], [0], [1], [0, 0, 1, 1], [], []>} : vector<2x32xf32>, vector<32x96xf32>, vector<2x96xf32> -> vector<2x96xf32>
    %622 = vector.extract_strided_slice %620 {offsets = [0, 0], sizes = [2, 32], strides = [1, 1]} : vector<2x96xf32> to vector<2x32xf32>
    %623 = vector.extract_strided_slice %621 {offsets = [0, 0], sizes = [2, 32], strides = [1, 1]} : vector<2x96xf32> to vector<2x32xf32>
    %624 = arith.addf %622, %623 : vector<2x32xf32>
    %625 = arith.negf %624 : vector<2x32xf32>
    %626 = math.exp %625 : vector<2x32xf32>
    %cst_115 = arith.constant 1.000000e+00 : f32
    %627 = vector.broadcast %cst_115 : f32 to vector<2x32xf32>
    %628 = arith.addf %627, %626 : vector<2x32xf32>
    %629 = arith.divf %627, %628 : vector<2x32xf32>
    %630 = vector.extract_strided_slice %620 {offsets = [0, 32], sizes = [2, 32], strides = [1, 1]} : vector<2x96xf32> to vector<2x32xf32>
    %631 = vector.extract_strided_slice %621 {offsets = [0, 32], sizes = [2, 32], strides = [1, 1]} : vector<2x96xf32> to vector<2x32xf32>
    %632 = arith.addf %630, %631 : vector<2x32xf32>
    %633 = arith.negf %632 : vector<2x32xf32>
    %634 = math.exp %633 : vector<2x32xf32>
    %cst_116 = arith.constant 1.000000e+00 : f32
    %635 = vector.broadcast %cst_116 : f32 to vector<2x32xf32>
    %636 = arith.addf %635, %634 : vector<2x32xf32>
    %637 = arith.divf %635, %636 : vector<2x32xf32>
    %638 = vector.extract_strided_slice %620 {offsets = [0, 64], sizes = [2, 32], strides = [1, 1]} : vector<2x96xf32> to vector<2x32xf32>
    %639 = vector.extract_strided_slice %621 {offsets = [0, 64], sizes = [2, 32], strides = [1, 1]} : vector<2x96xf32> to vector<2x32xf32>
    %640 = vector.broadcast %551 : vector<1x32xf32> to vector<2x32xf32>
    %641 = arith.addf %639, %640 : vector<2x32xf32>
    %642 = arith.mulf %629, %641 : vector<2x32xf32>
    %643 = arith.addf %638, %642 : vector<2x32xf32>
    %644 = math.tanh %643 : vector<2x32xf32>
    %cst_117 = arith.constant 1.000000e+00 : f32
    %645 = vector.broadcast %cst_117 : f32 to vector<2x32xf32>
    %646 = arith.subf %645, %637 : vector<2x32xf32>
    %647 = arith.mulf %646, %644 : vector<2x32xf32>
    %648 = arith.mulf %637, %618 : vector<2x32xf32>
    %649 = arith.addf %647, %648 : vector<2x32xf32>
    %650 = vector.extract_strided_slice %555 {offsets = [3, 0, 0], sizes = [1, 2, 96], strides = [1, 1, 1]} : vector<8x2x96xf32> to vector<1x2x96xf32>
    %651 = vector.shape_cast %650 : vector<1x2x96xf32> to vector<2x96xf32>
    %cst_118 = arith.constant dense<0.000000e+00> : vector<2x96xf32>
    %652 = tpu.matmul %649, %547, %cst_118 {dimension_numbers = #tpu.dot_dimension_numbers<[1], [0], [0], [1], [0, 0, 1, 1], [], []>} : vector<2x32xf32>, vector<32x96xf32>, vector<2x96xf32> -> vector<2x96xf32>
    %653 = vector.extract_strided_slice %651 {offsets = [0, 0], sizes = [2, 32], strides = [1, 1]} : vector<2x96xf32> to vector<2x32xf32>
    %654 = vector.extract_strided_slice %652 {offsets = [0, 0], sizes = [2, 32], strides = [1, 1]} : vector<2x96xf32> to vector<2x32xf32>
    %655 = arith.addf %653, %654 : vector<2x32xf32>
    %656 = arith.negf %655 : vector<2x32xf32>
    %657 = math.exp %656 : vector<2x32xf32>
    %cst_119 = arith.constant 1.000000e+00 : f32
    %658 = vector.broadcast %cst_119 : f32 to vector<2x32xf32>
    %659 = arith.addf %658, %657 : vector<2x32xf32>
    %660 = arith.divf %658, %659 : vector<2x32xf32>
    %661 = vector.extract_strided_slice %651 {offsets = [0, 32], sizes = [2, 32], strides = [1, 1]} : vector<2x96xf32> to vector<2x32xf32>
    %662 = vector.extract_strided_slice %652 {offsets = [0, 32], sizes = [2, 32], strides = [1, 1]} : vector<2x96xf32> to vector<2x32xf32>
    %663 = arith.addf %661, %662 : vector<2x32xf32>
    %664 = arith.negf %663 : vector<2x32xf32>
    %665 = math.exp %664 : vector<2x32xf32>
    %cst_120 = arith.constant 1.000000e+00 : f32
    %666 = vector.broadcast %cst_120 : f32 to vector<2x32xf32>
    %667 = arith.addf %666, %665 : vector<2x32xf32>
    %668 = arith.divf %666, %667 : vector<2x32xf32>
    %669 = vector.extract_strided_slice %651 {offsets = [0, 64], sizes = [2, 32], strides = [1, 1]} : vector<2x96xf32> to vector<2x32xf32>
    %670 = vector.extract_strided_slice %652 {offsets = [0, 64], sizes = [2, 32], strides = [1, 1]} : vector<2x96xf32> to vector<2x32xf32>
    %671 = vector.broadcast %551 : vector<1x32xf32> to vector<2x32xf32>
    %672 = arith.addf %670, %671 : vector<2x32xf32>
    %673 = arith.mulf %660, %672 : vector<2x32xf32>
    %674 = arith.addf %669, %673 : vector<2x32xf32>
    %675 = math.tanh %674 : vector<2x32xf32>
    %cst_121 = arith.constant 1.000000e+00 : f32
    %676 = vector.broadcast %cst_121 : f32 to vector<2x32xf32>
    %677 = arith.subf %676, %668 : vector<2x32xf32>
    %678 = arith.mulf %677, %675 : vector<2x32xf32>
    %679 = arith.mulf %668, %649 : vector<2x32xf32>
    %680 = arith.addf %678, %679 : vector<2x32xf32>
    %681 = vector.extract_strided_slice %555 {offsets = [4, 0, 0], sizes = [1, 2, 96], strides = [1, 1, 1]} : vector<8x2x96xf32> to vector<1x2x96xf32>
    %682 = vector.shape_cast %681 : vector<1x2x96xf32> to vector<2x96xf32>
    %cst_122 = arith.constant dense<0.000000e+00> : vector<2x96xf32>
    %683 = tpu.matmul %680, %547, %cst_122 {dimension_numbers = #tpu.dot_dimension_numbers<[1], [0], [0], [1], [0, 0, 1, 1], [], []>} : vector<2x32xf32>, vector<32x96xf32>, vector<2x96xf32> -> vector<2x96xf32>
    %684 = vector.extract_strided_slice %682 {offsets = [0, 0], sizes = [2, 32], strides = [1, 1]} : vector<2x96xf32> to vector<2x32xf32>
    %685 = vector.extract_strided_slice %683 {offsets = [0, 0], sizes = [2, 32], strides = [1, 1]} : vector<2x96xf32> to vector<2x32xf32>
    %686 = arith.addf %684, %685 : vector<2x32xf32>
    %687 = arith.negf %686 : vector<2x32xf32>
    %688 = math.exp %687 : vector<2x32xf32>
    %cst_123 = arith.constant 1.000000e+00 : f32
    %689 = vector.broadcast %cst_123 : f32 to vector<2x32xf32>
    %690 = arith.addf %689, %688 : vector<2x32xf32>
    %691 = arith.divf %689, %690 : vector<2x32xf32>
    %692 = vector.extract_strided_slice %682 {offsets = [0, 32], sizes = [2, 32], strides = [1, 1]} : vector<2x96xf32> to vector<2x32xf32>
    %693 = vector.extract_strided_slice %683 {offsets = [0, 32], sizes = [2, 32], strides = [1, 1]} : vector<2x96xf32> to vector<2x32xf32>
    %694 = arith.addf %692, %693 : vector<2x32xf32>
    %695 = arith.negf %694 : vector<2x32xf32>
    %696 = math.exp %695 : vector<2x32xf32>
    %cst_124 = arith.constant 1.000000e+00 : f32
    %697 = vector.broadcast %cst_124 : f32 to vector<2x32xf32>
    %698 = arith.addf %697, %696 : vector<2x32xf32>
    %699 = arith.divf %697, %698 : vector<2x32xf32>
    %700 = vector.extract_strided_slice %682 {offsets = [0, 64], sizes = [2, 32], strides = [1, 1]} : vector<2x96xf32> to vector<2x32xf32>
    %701 = vector.extract_strided_slice %683 {offsets = [0, 64], sizes = [2, 32], strides = [1, 1]} : vector<2x96xf32> to vector<2x32xf32>
    %702 = vector.broadcast %551 : vector<1x32xf32> to vector<2x32xf32>
    %703 = arith.addf %701, %702 : vector<2x32xf32>
    %704 = arith.mulf %691, %703 : vector<2x32xf32>
    %705 = arith.addf %700, %704 : vector<2x32xf32>
    %706 = math.tanh %705 : vector<2x32xf32>
    %cst_125 = arith.constant 1.000000e+00 : f32
    %707 = vector.broadcast %cst_125 : f32 to vector<2x32xf32>
    %708 = arith.subf %707, %699 : vector<2x32xf32>
    %709 = arith.mulf %708, %706 : vector<2x32xf32>
    %710 = arith.mulf %699, %680 : vector<2x32xf32>
    %711 = arith.addf %709, %710 : vector<2x32xf32>
    %712 = vector.extract_strided_slice %555 {offsets = [5, 0, 0], sizes = [1, 2, 96], strides = [1, 1, 1]} : vector<8x2x96xf32> to vector<1x2x96xf32>
    %713 = vector.shape_cast %712 : vector<1x2x96xf32> to vector<2x96xf32>
    %cst_126 = arith.constant dense<0.000000e+00> : vector<2x96xf32>
    %714 = tpu.matmul %711, %547, %cst_126 {dimension_numbers = #tpu.dot_dimension_numbers<[1], [0], [0], [1], [0, 0, 1, 1], [], []>} : vector<2x32xf32>, vector<32x96xf32>, vector<2x96xf32> -> vector<2x96xf32>
    %715 = vector.extract_strided_slice %713 {offsets = [0, 0], sizes = [2, 32], strides = [1, 1]} : vector<2x96xf32> to vector<2x32xf32>
    %716 = vector.extract_strided_slice %714 {offsets = [0, 0], sizes = [2, 32], strides = [1, 1]} : vector<2x96xf32> to vector<2x32xf32>
    %717 = arith.addf %715, %716 : vector<2x32xf32>
    %718 = arith.negf %717 : vector<2x32xf32>
    %719 = math.exp %718 : vector<2x32xf32>
    %cst_127 = arith.constant 1.000000e+00 : f32
    %720 = vector.broadcast %cst_127 : f32 to vector<2x32xf32>
    %721 = arith.addf %720, %719 : vector<2x32xf32>
    %722 = arith.divf %720, %721 : vector<2x32xf32>
    %723 = vector.extract_strided_slice %713 {offsets = [0, 32], sizes = [2, 32], strides = [1, 1]} : vector<2x96xf32> to vector<2x32xf32>
    %724 = vector.extract_strided_slice %714 {offsets = [0, 32], sizes = [2, 32], strides = [1, 1]} : vector<2x96xf32> to vector<2x32xf32>
    %725 = arith.addf %723, %724 : vector<2x32xf32>
    %726 = arith.negf %725 : vector<2x32xf32>
    %727 = math.exp %726 : vector<2x32xf32>
    %cst_128 = arith.constant 1.000000e+00 : f32
    %728 = vector.broadcast %cst_128 : f32 to vector<2x32xf32>
    %729 = arith.addf %728, %727 : vector<2x32xf32>
    %730 = arith.divf %728, %729 : vector<2x32xf32>
    %731 = vector.extract_strided_slice %713 {offsets = [0, 64], sizes = [2, 32], strides = [1, 1]} : vector<2x96xf32> to vector<2x32xf32>
    %732 = vector.extract_strided_slice %714 {offsets = [0, 64], sizes = [2, 32], strides = [1, 1]} : vector<2x96xf32> to vector<2x32xf32>
    %733 = vector.broadcast %551 : vector<1x32xf32> to vector<2x32xf32>
    %734 = arith.addf %732, %733 : vector<2x32xf32>
    %735 = arith.mulf %722, %734 : vector<2x32xf32>
    %736 = arith.addf %731, %735 : vector<2x32xf32>
    %737 = math.tanh %736 : vector<2x32xf32>
    %cst_129 = arith.constant 1.000000e+00 : f32
    %738 = vector.broadcast %cst_129 : f32 to vector<2x32xf32>
    %739 = arith.subf %738, %730 : vector<2x32xf32>
    %740 = arith.mulf %739, %737 : vector<2x32xf32>
    %741 = arith.mulf %730, %711 : vector<2x32xf32>
    %742 = arith.addf %740, %741 : vector<2x32xf32>
    %743 = vector.extract_strided_slice %555 {offsets = [6, 0, 0], sizes = [1, 2, 96], strides = [1, 1, 1]} : vector<8x2x96xf32> to vector<1x2x96xf32>
    %744 = vector.shape_cast %743 : vector<1x2x96xf32> to vector<2x96xf32>
    %cst_130 = arith.constant dense<0.000000e+00> : vector<2x96xf32>
    %745 = tpu.matmul %742, %547, %cst_130 {dimension_numbers = #tpu.dot_dimension_numbers<[1], [0], [0], [1], [0, 0, 1, 1], [], []>} : vector<2x32xf32>, vector<32x96xf32>, vector<2x96xf32> -> vector<2x96xf32>
    %746 = vector.extract_strided_slice %744 {offsets = [0, 0], sizes = [2, 32], strides = [1, 1]} : vector<2x96xf32> to vector<2x32xf32>
    %747 = vector.extract_strided_slice %745 {offsets = [0, 0], sizes = [2, 32], strides = [1, 1]} : vector<2x96xf32> to vector<2x32xf32>
    %748 = arith.addf %746, %747 : vector<2x32xf32>
    %749 = arith.negf %748 : vector<2x32xf32>
    %750 = math.exp %749 : vector<2x32xf32>
    %cst_131 = arith.constant 1.000000e+00 : f32
    %751 = vector.broadcast %cst_131 : f32 to vector<2x32xf32>
    %752 = arith.addf %751, %750 : vector<2x32xf32>
    %753 = arith.divf %751, %752 : vector<2x32xf32>
    %754 = vector.extract_strided_slice %744 {offsets = [0, 32], sizes = [2, 32], strides = [1, 1]} : vector<2x96xf32> to vector<2x32xf32>
    %755 = vector.extract_strided_slice %745 {offsets = [0, 32], sizes = [2, 32], strides = [1, 1]} : vector<2x96xf32> to vector<2x32xf32>
    %756 = arith.addf %754, %755 : vector<2x32xf32>
    %757 = arith.negf %756 : vector<2x32xf32>
    %758 = math.exp %757 : vector<2x32xf32>
    %cst_132 = arith.constant 1.000000e+00 : f32
    %759 = vector.broadcast %cst_132 : f32 to vector<2x32xf32>
    %760 = arith.addf %759, %758 : vector<2x32xf32>
    %761 = arith.divf %759, %760 : vector<2x32xf32>
    %762 = vector.extract_strided_slice %744 {offsets = [0, 64], sizes = [2, 32], strides = [1, 1]} : vector<2x96xf32> to vector<2x32xf32>
    %763 = vector.extract_strided_slice %745 {offsets = [0, 64], sizes = [2, 32], strides = [1, 1]} : vector<2x96xf32> to vector<2x32xf32>
    %764 = vector.broadcast %551 : vector<1x32xf32> to vector<2x32xf32>
    %765 = arith.addf %763, %764 : vector<2x32xf32>
    %766 = arith.mulf %753, %765 : vector<2x32xf32>
    %767 = arith.addf %762, %766 : vector<2x32xf32>
    %768 = math.tanh %767 : vector<2x32xf32>
    %cst_133 = arith.constant 1.000000e+00 : f32
    %769 = vector.broadcast %cst_133 : f32 to vector<2x32xf32>
    %770 = arith.subf %769, %761 : vector<2x32xf32>
    %771 = arith.mulf %770, %768 : vector<2x32xf32>
    %772 = arith.mulf %761, %742 : vector<2x32xf32>
    %773 = arith.addf %771, %772 : vector<2x32xf32>
    %774 = vector.extract_strided_slice %555 {offsets = [7, 0, 0], sizes = [1, 2, 96], strides = [1, 1, 1]} : vector<8x2x96xf32> to vector<1x2x96xf32>
    %775 = vector.shape_cast %774 : vector<1x2x96xf32> to vector<2x96xf32>
    %cst_134 = arith.constant dense<0.000000e+00> : vector<2x96xf32>
    %776 = tpu.matmul %773, %547, %cst_134 {dimension_numbers = #tpu.dot_dimension_numbers<[1], [0], [0], [1], [0, 0, 1, 1], [], []>} : vector<2x32xf32>, vector<32x96xf32>, vector<2x96xf32> -> vector<2x96xf32>
    %777 = vector.extract_strided_slice %775 {offsets = [0, 0], sizes = [2, 32], strides = [1, 1]} : vector<2x96xf32> to vector<2x32xf32>
    %778 = vector.extract_strided_slice %776 {offsets = [0, 0], sizes = [2, 32], strides = [1, 1]} : vector<2x96xf32> to vector<2x32xf32>
    %779 = arith.addf %777, %778 : vector<2x32xf32>
    %780 = arith.negf %779 : vector<2x32xf32>
    %781 = math.exp %780 : vector<2x32xf32>
    %cst_135 = arith.constant 1.000000e+00 : f32
    %782 = vector.broadcast %cst_135 : f32 to vector<2x32xf32>
    %783 = arith.addf %782, %781 : vector<2x32xf32>
    %784 = arith.divf %782, %783 : vector<2x32xf32>
    %785 = vector.extract_strided_slice %775 {offsets = [0, 32], sizes = [2, 32], strides = [1, 1]} : vector<2x96xf32> to vector<2x32xf32>
    %786 = vector.extract_strided_slice %776 {offsets = [0, 32], sizes = [2, 32], strides = [1, 1]} : vector<2x96xf32> to vector<2x32xf32>
    %787 = arith.addf %785, %786 : vector<2x32xf32>
    %788 = arith.negf %787 : vector<2x32xf32>
    %789 = math.exp %788 : vector<2x32xf32>
    %cst_136 = arith.constant 1.000000e+00 : f32
    %790 = vector.broadcast %cst_136 : f32 to vector<2x32xf32>
    %791 = arith.addf %790, %789 : vector<2x32xf32>
    %792 = arith.divf %790, %791 : vector<2x32xf32>
    %793 = vector.extract_strided_slice %775 {offsets = [0, 64], sizes = [2, 32], strides = [1, 1]} : vector<2x96xf32> to vector<2x32xf32>
    %794 = vector.extract_strided_slice %776 {offsets = [0, 64], sizes = [2, 32], strides = [1, 1]} : vector<2x96xf32> to vector<2x32xf32>
    %795 = vector.broadcast %551 : vector<1x32xf32> to vector<2x32xf32>
    %796 = arith.addf %794, %795 : vector<2x32xf32>
    %797 = arith.mulf %784, %796 : vector<2x32xf32>
    %798 = arith.addf %793, %797 : vector<2x32xf32>
    %799 = math.tanh %798 : vector<2x32xf32>
    %cst_137 = arith.constant 1.000000e+00 : f32
    %800 = vector.broadcast %cst_137 : f32 to vector<2x32xf32>
    %801 = arith.subf %800, %792 : vector<2x32xf32>
    %802 = arith.mulf %801, %799 : vector<2x32xf32>
    %803 = arith.mulf %792, %773 : vector<2x32xf32>
    %804 = arith.addf %802, %803 : vector<2x32xf32>
    %805 = vector.shape_cast %587 : vector<2x32xf32> to vector<1x2x32xf32>
    %806 = vector.shape_cast %618 : vector<2x32xf32> to vector<1x2x32xf32>
    %807 = vector.shape_cast %649 : vector<2x32xf32> to vector<1x2x32xf32>
    %808 = vector.shape_cast %680 : vector<2x32xf32> to vector<1x2x32xf32>
    %809 = vector.shape_cast %711 : vector<2x32xf32> to vector<1x2x32xf32>
    %810 = vector.shape_cast %742 : vector<2x32xf32> to vector<1x2x32xf32>
    %811 = vector.shape_cast %773 : vector<2x32xf32> to vector<1x2x32xf32>
    %812 = vector.shape_cast %804 : vector<2x32xf32> to vector<1x2x32xf32>
    %813 = tpu.concatenate %805, %806, %807, %808, %809, %810, %811, %812 in 0 : vector<1x2x32xf32>, vector<1x2x32xf32>, vector<1x2x32xf32>, vector<1x2x32xf32>, vector<1x2x32xf32>, vector<1x2x32xf32>, vector<1x2x32xf32>, vector<1x2x32xf32> -> vector<8x2x32xf32>
    %c1_138 = arith.constant 1 : index
    %c0_139 = arith.constant 0 : index
    %c0_140 = arith.constant 0 : index
    %814 = vector.load %arg5[%c1_138, %c0_139, %c0_140] : memref<2x64x96xf32, #tpu.memory_space<vmem>>, vector<1x64x96xf32>
    %815 = vector.shape_cast %814 : vector<1x64x96xf32> to vector<64x96xf32>
    %c1_141 = arith.constant 1 : index
    %c0_142 = arith.constant 0 : index
    %c0_143 = arith.constant 0 : index
    %816 = vector.load %arg6[%c1_141, %c0_142, %c0_143] : memref<2x32x96xf32, #tpu.memory_space<vmem>>, vector<1x32x96xf32>
    %817 = vector.shape_cast %816 : vector<1x32x96xf32> to vector<32x96xf32>
    %c1_144 = arith.constant 1 : index
    %c0_145 = arith.constant 0 : index
    %c0_146 = arith.constant 0 : index
    %818 = vector.load %arg7[%c1_144, %c0_145, %c0_146] : memref<2x1x96xf32, #tpu.memory_space<vmem>>, vector<1x1x96xf32>
    %819 = vector.shape_cast %818 : vector<1x1x96xf32> to vector<1x96xf32>
    %c1_147 = arith.constant 1 : index
    %c0_148 = arith.constant 0 : index
    %c0_149 = arith.constant 0 : index
    %820 = vector.load %arg8[%c1_147, %c0_148, %c0_149] : memref<2x1x32xf32, #tpu.memory_space<vmem>>, vector<1x1x32xf32>
    %821 = vector.shape_cast %820 : vector<1x1x32xf32> to vector<1x32xf32>
    %cst_150 = arith.constant dense<0.000000e+00> : vector<16x96xf32>
    %822 = tpu.matmul %543, %815, %cst_150 {dimension_numbers = #tpu.dot_dimension_numbers<[1], [0], [0], [1], [0, 0, 1, 1], [], []>} : vector<16x64xf32>, vector<64x96xf32>, vector<16x96xf32> -> vector<16x96xf32>
    %823 = vector.broadcast %819 : vector<1x96xf32> to vector<16x96xf32>
    %824 = arith.addf %822, %823 : vector<16x96xf32>
    %825 = vector.shape_cast %824 : vector<16x96xf32> to vector<8x2x96xf32>
    %cst_151 = arith.constant 0.000000e+00 : f32
    %826 = vector.broadcast %cst_151 : f32 to vector<2x32xf32>
    %827 = vector.extract_strided_slice %825 {offsets = [7, 0, 0], sizes = [1, 2, 96], strides = [1, 1, 1]} : vector<8x2x96xf32> to vector<1x2x96xf32>
    %828 = vector.shape_cast %827 : vector<1x2x96xf32> to vector<2x96xf32>
    %cst_152 = arith.constant dense<0.000000e+00> : vector<2x96xf32>
    %829 = tpu.matmul %826, %817, %cst_152 {dimension_numbers = #tpu.dot_dimension_numbers<[1], [0], [0], [1], [0, 0, 1, 1], [], []>} : vector<2x32xf32>, vector<32x96xf32>, vector<2x96xf32> -> vector<2x96xf32>
    %830 = vector.extract_strided_slice %828 {offsets = [0, 0], sizes = [2, 32], strides = [1, 1]} : vector<2x96xf32> to vector<2x32xf32>
    %831 = vector.extract_strided_slice %829 {offsets = [0, 0], sizes = [2, 32], strides = [1, 1]} : vector<2x96xf32> to vector<2x32xf32>
    %832 = arith.addf %830, %831 : vector<2x32xf32>
    %833 = arith.negf %832 : vector<2x32xf32>
    %834 = math.exp %833 : vector<2x32xf32>
    %cst_153 = arith.constant 1.000000e+00 : f32
    %835 = vector.broadcast %cst_153 : f32 to vector<2x32xf32>
    %836 = arith.addf %835, %834 : vector<2x32xf32>
    %837 = arith.divf %835, %836 : vector<2x32xf32>
    %838 = vector.extract_strided_slice %828 {offsets = [0, 32], sizes = [2, 32], strides = [1, 1]} : vector<2x96xf32> to vector<2x32xf32>
    %839 = vector.extract_strided_slice %829 {offsets = [0, 32], sizes = [2, 32], strides = [1, 1]} : vector<2x96xf32> to vector<2x32xf32>
    %840 = arith.addf %838, %839 : vector<2x32xf32>
    %841 = arith.negf %840 : vector<2x32xf32>
    %842 = math.exp %841 : vector<2x32xf32>
    %cst_154 = arith.constant 1.000000e+00 : f32
    %843 = vector.broadcast %cst_154 : f32 to vector<2x32xf32>
    %844 = arith.addf %843, %842 : vector<2x32xf32>
    %845 = arith.divf %843, %844 : vector<2x32xf32>
    %846 = vector.extract_strided_slice %828 {offsets = [0, 64], sizes = [2, 32], strides = [1, 1]} : vector<2x96xf32> to vector<2x32xf32>
    %847 = vector.extract_strided_slice %829 {offsets = [0, 64], sizes = [2, 32], strides = [1, 1]} : vector<2x96xf32> to vector<2x32xf32>
    %848 = vector.broadcast %821 : vector<1x32xf32> to vector<2x32xf32>
    %849 = arith.addf %847, %848 : vector<2x32xf32>
    %850 = arith.mulf %837, %849 : vector<2x32xf32>
    %851 = arith.addf %846, %850 : vector<2x32xf32>
    %852 = math.tanh %851 : vector<2x32xf32>
    %cst_155 = arith.constant 1.000000e+00 : f32
    %853 = vector.broadcast %cst_155 : f32 to vector<2x32xf32>
    %854 = arith.subf %853, %845 : vector<2x32xf32>
    %855 = arith.mulf %854, %852 : vector<2x32xf32>
    %856 = arith.mulf %845, %826 : vector<2x32xf32>
    %857 = arith.addf %855, %856 : vector<2x32xf32>
    %858 = vector.extract_strided_slice %825 {offsets = [6, 0, 0], sizes = [1, 2, 96], strides = [1, 1, 1]} : vector<8x2x96xf32> to vector<1x2x96xf32>
    %859 = vector.shape_cast %858 : vector<1x2x96xf32> to vector<2x96xf32>
    %cst_156 = arith.constant dense<0.000000e+00> : vector<2x96xf32>
    %860 = tpu.matmul %857, %817, %cst_156 {dimension_numbers = #tpu.dot_dimension_numbers<[1], [0], [0], [1], [0, 0, 1, 1], [], []>} : vector<2x32xf32>, vector<32x96xf32>, vector<2x96xf32> -> vector<2x96xf32>
    %861 = vector.extract_strided_slice %859 {offsets = [0, 0], sizes = [2, 32], strides = [1, 1]} : vector<2x96xf32> to vector<2x32xf32>
    %862 = vector.extract_strided_slice %860 {offsets = [0, 0], sizes = [2, 32], strides = [1, 1]} : vector<2x96xf32> to vector<2x32xf32>
    %863 = arith.addf %861, %862 : vector<2x32xf32>
    %864 = arith.negf %863 : vector<2x32xf32>
    %865 = math.exp %864 : vector<2x32xf32>
    %cst_157 = arith.constant 1.000000e+00 : f32
    %866 = vector.broadcast %cst_157 : f32 to vector<2x32xf32>
    %867 = arith.addf %866, %865 : vector<2x32xf32>
    %868 = arith.divf %866, %867 : vector<2x32xf32>
    %869 = vector.extract_strided_slice %859 {offsets = [0, 32], sizes = [2, 32], strides = [1, 1]} : vector<2x96xf32> to vector<2x32xf32>
    %870 = vector.extract_strided_slice %860 {offsets = [0, 32], sizes = [2, 32], strides = [1, 1]} : vector<2x96xf32> to vector<2x32xf32>
    %871 = arith.addf %869, %870 : vector<2x32xf32>
    %872 = arith.negf %871 : vector<2x32xf32>
    %873 = math.exp %872 : vector<2x32xf32>
    %cst_158 = arith.constant 1.000000e+00 : f32
    %874 = vector.broadcast %cst_158 : f32 to vector<2x32xf32>
    %875 = arith.addf %874, %873 : vector<2x32xf32>
    %876 = arith.divf %874, %875 : vector<2x32xf32>
    %877 = vector.extract_strided_slice %859 {offsets = [0, 64], sizes = [2, 32], strides = [1, 1]} : vector<2x96xf32> to vector<2x32xf32>
    %878 = vector.extract_strided_slice %860 {offsets = [0, 64], sizes = [2, 32], strides = [1, 1]} : vector<2x96xf32> to vector<2x32xf32>
    %879 = vector.broadcast %821 : vector<1x32xf32> to vector<2x32xf32>
    %880 = arith.addf %878, %879 : vector<2x32xf32>
    %881 = arith.mulf %868, %880 : vector<2x32xf32>
    %882 = arith.addf %877, %881 : vector<2x32xf32>
    %883 = math.tanh %882 : vector<2x32xf32>
    %cst_159 = arith.constant 1.000000e+00 : f32
    %884 = vector.broadcast %cst_159 : f32 to vector<2x32xf32>
    %885 = arith.subf %884, %876 : vector<2x32xf32>
    %886 = arith.mulf %885, %883 : vector<2x32xf32>
    %887 = arith.mulf %876, %857 : vector<2x32xf32>
    %888 = arith.addf %886, %887 : vector<2x32xf32>
    %889 = vector.extract_strided_slice %825 {offsets = [5, 0, 0], sizes = [1, 2, 96], strides = [1, 1, 1]} : vector<8x2x96xf32> to vector<1x2x96xf32>
    %890 = vector.shape_cast %889 : vector<1x2x96xf32> to vector<2x96xf32>
    %cst_160 = arith.constant dense<0.000000e+00> : vector<2x96xf32>
    %891 = tpu.matmul %888, %817, %cst_160 {dimension_numbers = #tpu.dot_dimension_numbers<[1], [0], [0], [1], [0, 0, 1, 1], [], []>} : vector<2x32xf32>, vector<32x96xf32>, vector<2x96xf32> -> vector<2x96xf32>
    %892 = vector.extract_strided_slice %890 {offsets = [0, 0], sizes = [2, 32], strides = [1, 1]} : vector<2x96xf32> to vector<2x32xf32>
    %893 = vector.extract_strided_slice %891 {offsets = [0, 0], sizes = [2, 32], strides = [1, 1]} : vector<2x96xf32> to vector<2x32xf32>
    %894 = arith.addf %892, %893 : vector<2x32xf32>
    %895 = arith.negf %894 : vector<2x32xf32>
    %896 = math.exp %895 : vector<2x32xf32>
    %cst_161 = arith.constant 1.000000e+00 : f32
    %897 = vector.broadcast %cst_161 : f32 to vector<2x32xf32>
    %898 = arith.addf %897, %896 : vector<2x32xf32>
    %899 = arith.divf %897, %898 : vector<2x32xf32>
    %900 = vector.extract_strided_slice %890 {offsets = [0, 32], sizes = [2, 32], strides = [1, 1]} : vector<2x96xf32> to vector<2x32xf32>
    %901 = vector.extract_strided_slice %891 {offsets = [0, 32], sizes = [2, 32], strides = [1, 1]} : vector<2x96xf32> to vector<2x32xf32>
    %902 = arith.addf %900, %901 : vector<2x32xf32>
    %903 = arith.negf %902 : vector<2x32xf32>
    %904 = math.exp %903 : vector<2x32xf32>
    %cst_162 = arith.constant 1.000000e+00 : f32
    %905 = vector.broadcast %cst_162 : f32 to vector<2x32xf32>
    %906 = arith.addf %905, %904 : vector<2x32xf32>
    %907 = arith.divf %905, %906 : vector<2x32xf32>
    %908 = vector.extract_strided_slice %890 {offsets = [0, 64], sizes = [2, 32], strides = [1, 1]} : vector<2x96xf32> to vector<2x32xf32>
    %909 = vector.extract_strided_slice %891 {offsets = [0, 64], sizes = [2, 32], strides = [1, 1]} : vector<2x96xf32> to vector<2x32xf32>
    %910 = vector.broadcast %821 : vector<1x32xf32> to vector<2x32xf32>
    %911 = arith.addf %909, %910 : vector<2x32xf32>
    %912 = arith.mulf %899, %911 : vector<2x32xf32>
    %913 = arith.addf %908, %912 : vector<2x32xf32>
    %914 = math.tanh %913 : vector<2x32xf32>
    %cst_163 = arith.constant 1.000000e+00 : f32
    %915 = vector.broadcast %cst_163 : f32 to vector<2x32xf32>
    %916 = arith.subf %915, %907 : vector<2x32xf32>
    %917 = arith.mulf %916, %914 : vector<2x32xf32>
    %918 = arith.mulf %907, %888 : vector<2x32xf32>
    %919 = arith.addf %917, %918 : vector<2x32xf32>
    %920 = vector.extract_strided_slice %825 {offsets = [4, 0, 0], sizes = [1, 2, 96], strides = [1, 1, 1]} : vector<8x2x96xf32> to vector<1x2x96xf32>
    %921 = vector.shape_cast %920 : vector<1x2x96xf32> to vector<2x96xf32>
    %cst_164 = arith.constant dense<0.000000e+00> : vector<2x96xf32>
    %922 = tpu.matmul %919, %817, %cst_164 {dimension_numbers = #tpu.dot_dimension_numbers<[1], [0], [0], [1], [0, 0, 1, 1], [], []>} : vector<2x32xf32>, vector<32x96xf32>, vector<2x96xf32> -> vector<2x96xf32>
    %923 = vector.extract_strided_slice %921 {offsets = [0, 0], sizes = [2, 32], strides = [1, 1]} : vector<2x96xf32> to vector<2x32xf32>
    %924 = vector.extract_strided_slice %922 {offsets = [0, 0], sizes = [2, 32], strides = [1, 1]} : vector<2x96xf32> to vector<2x32xf32>
    %925 = arith.addf %923, %924 : vector<2x32xf32>
    %926 = arith.negf %925 : vector<2x32xf32>
    %927 = math.exp %926 : vector<2x32xf32>
    %cst_165 = arith.constant 1.000000e+00 : f32
    %928 = vector.broadcast %cst_165 : f32 to vector<2x32xf32>
    %929 = arith.addf %928, %927 : vector<2x32xf32>
    %930 = arith.divf %928, %929 : vector<2x32xf32>
    %931 = vector.extract_strided_slice %921 {offsets = [0, 32], sizes = [2, 32], strides = [1, 1]} : vector<2x96xf32> to vector<2x32xf32>
    %932 = vector.extract_strided_slice %922 {offsets = [0, 32], sizes = [2, 32], strides = [1, 1]} : vector<2x96xf32> to vector<2x32xf32>
    %933 = arith.addf %931, %932 : vector<2x32xf32>
    %934 = arith.negf %933 : vector<2x32xf32>
    %935 = math.exp %934 : vector<2x32xf32>
    %cst_166 = arith.constant 1.000000e+00 : f32
    %936 = vector.broadcast %cst_166 : f32 to vector<2x32xf32>
    %937 = arith.addf %936, %935 : vector<2x32xf32>
    %938 = arith.divf %936, %937 : vector<2x32xf32>
    %939 = vector.extract_strided_slice %921 {offsets = [0, 64], sizes = [2, 32], strides = [1, 1]} : vector<2x96xf32> to vector<2x32xf32>
    %940 = vector.extract_strided_slice %922 {offsets = [0, 64], sizes = [2, 32], strides = [1, 1]} : vector<2x96xf32> to vector<2x32xf32>
    %941 = vector.broadcast %821 : vector<1x32xf32> to vector<2x32xf32>
    %942 = arith.addf %940, %941 : vector<2x32xf32>
    %943 = arith.mulf %930, %942 : vector<2x32xf32>
    %944 = arith.addf %939, %943 : vector<2x32xf32>
    %945 = math.tanh %944 : vector<2x32xf32>
    %cst_167 = arith.constant 1.000000e+00 : f32
    %946 = vector.broadcast %cst_167 : f32 to vector<2x32xf32>
    %947 = arith.subf %946, %938 : vector<2x32xf32>
    %948 = arith.mulf %947, %945 : vector<2x32xf32>
    %949 = arith.mulf %938, %919 : vector<2x32xf32>
    %950 = arith.addf %948, %949 : vector<2x32xf32>
    %951 = vector.extract_strided_slice %825 {offsets = [3, 0, 0], sizes = [1, 2, 96], strides = [1, 1, 1]} : vector<8x2x96xf32> to vector<1x2x96xf32>
    %952 = vector.shape_cast %951 : vector<1x2x96xf32> to vector<2x96xf32>
    %cst_168 = arith.constant dense<0.000000e+00> : vector<2x96xf32>
    %953 = tpu.matmul %950, %817, %cst_168 {dimension_numbers = #tpu.dot_dimension_numbers<[1], [0], [0], [1], [0, 0, 1, 1], [], []>} : vector<2x32xf32>, vector<32x96xf32>, vector<2x96xf32> -> vector<2x96xf32>
    %954 = vector.extract_strided_slice %952 {offsets = [0, 0], sizes = [2, 32], strides = [1, 1]} : vector<2x96xf32> to vector<2x32xf32>
    %955 = vector.extract_strided_slice %953 {offsets = [0, 0], sizes = [2, 32], strides = [1, 1]} : vector<2x96xf32> to vector<2x32xf32>
    %956 = arith.addf %954, %955 : vector<2x32xf32>
    %957 = arith.negf %956 : vector<2x32xf32>
    %958 = math.exp %957 : vector<2x32xf32>
    %cst_169 = arith.constant 1.000000e+00 : f32
    %959 = vector.broadcast %cst_169 : f32 to vector<2x32xf32>
    %960 = arith.addf %959, %958 : vector<2x32xf32>
    %961 = arith.divf %959, %960 : vector<2x32xf32>
    %962 = vector.extract_strided_slice %952 {offsets = [0, 32], sizes = [2, 32], strides = [1, 1]} : vector<2x96xf32> to vector<2x32xf32>
    %963 = vector.extract_strided_slice %953 {offsets = [0, 32], sizes = [2, 32], strides = [1, 1]} : vector<2x96xf32> to vector<2x32xf32>
    %964 = arith.addf %962, %963 : vector<2x32xf32>
    %965 = arith.negf %964 : vector<2x32xf32>
    %966 = math.exp %965 : vector<2x32xf32>
    %cst_170 = arith.constant 1.000000e+00 : f32
    %967 = vector.broadcast %cst_170 : f32 to vector<2x32xf32>
    %968 = arith.addf %967, %966 : vector<2x32xf32>
    %969 = arith.divf %967, %968 : vector<2x32xf32>
    %970 = vector.extract_strided_slice %952 {offsets = [0, 64], sizes = [2, 32], strides = [1, 1]} : vector<2x96xf32> to vector<2x32xf32>
    %971 = vector.extract_strided_slice %953 {offsets = [0, 64], sizes = [2, 32], strides = [1, 1]} : vector<2x96xf32> to vector<2x32xf32>
    %972 = vector.broadcast %821 : vector<1x32xf32> to vector<2x32xf32>
    %973 = arith.addf %971, %972 : vector<2x32xf32>
    %974 = arith.mulf %961, %973 : vector<2x32xf32>
    %975 = arith.addf %970, %974 : vector<2x32xf32>
    %976 = math.tanh %975 : vector<2x32xf32>
    %cst_171 = arith.constant 1.000000e+00 : f32
    %977 = vector.broadcast %cst_171 : f32 to vector<2x32xf32>
    %978 = arith.subf %977, %969 : vector<2x32xf32>
    %979 = arith.mulf %978, %976 : vector<2x32xf32>
    %980 = arith.mulf %969, %950 : vector<2x32xf32>
    %981 = arith.addf %979, %980 : vector<2x32xf32>
    %982 = vector.extract_strided_slice %825 {offsets = [2, 0, 0], sizes = [1, 2, 96], strides = [1, 1, 1]} : vector<8x2x96xf32> to vector<1x2x96xf32>
    %983 = vector.shape_cast %982 : vector<1x2x96xf32> to vector<2x96xf32>
    %cst_172 = arith.constant dense<0.000000e+00> : vector<2x96xf32>
    %984 = tpu.matmul %981, %817, %cst_172 {dimension_numbers = #tpu.dot_dimension_numbers<[1], [0], [0], [1], [0, 0, 1, 1], [], []>} : vector<2x32xf32>, vector<32x96xf32>, vector<2x96xf32> -> vector<2x96xf32>
    %985 = vector.extract_strided_slice %983 {offsets = [0, 0], sizes = [2, 32], strides = [1, 1]} : vector<2x96xf32> to vector<2x32xf32>
    %986 = vector.extract_strided_slice %984 {offsets = [0, 0], sizes = [2, 32], strides = [1, 1]} : vector<2x96xf32> to vector<2x32xf32>
    %987 = arith.addf %985, %986 : vector<2x32xf32>
    %988 = arith.negf %987 : vector<2x32xf32>
    %989 = math.exp %988 : vector<2x32xf32>
    %cst_173 = arith.constant 1.000000e+00 : f32
    %990 = vector.broadcast %cst_173 : f32 to vector<2x32xf32>
    %991 = arith.addf %990, %989 : vector<2x32xf32>
    %992 = arith.divf %990, %991 : vector<2x32xf32>
    %993 = vector.extract_strided_slice %983 {offsets = [0, 32], sizes = [2, 32], strides = [1, 1]} : vector<2x96xf32> to vector<2x32xf32>
    %994 = vector.extract_strided_slice %984 {offsets = [0, 32], sizes = [2, 32], strides = [1, 1]} : vector<2x96xf32> to vector<2x32xf32>
    %995 = arith.addf %993, %994 : vector<2x32xf32>
    %996 = arith.negf %995 : vector<2x32xf32>
    %997 = math.exp %996 : vector<2x32xf32>
    %cst_174 = arith.constant 1.000000e+00 : f32
    %998 = vector.broadcast %cst_174 : f32 to vector<2x32xf32>
    %999 = arith.addf %998, %997 : vector<2x32xf32>
    %1000 = arith.divf %998, %999 : vector<2x32xf32>
    %1001 = vector.extract_strided_slice %983 {offsets = [0, 64], sizes = [2, 32], strides = [1, 1]} : vector<2x96xf32> to vector<2x32xf32>
    %1002 = vector.extract_strided_slice %984 {offsets = [0, 64], sizes = [2, 32], strides = [1, 1]} : vector<2x96xf32> to vector<2x32xf32>
    %1003 = vector.broadcast %821 : vector<1x32xf32> to vector<2x32xf32>
    %1004 = arith.addf %1002, %1003 : vector<2x32xf32>
    %1005 = arith.mulf %992, %1004 : vector<2x32xf32>
    %1006 = arith.addf %1001, %1005 : vector<2x32xf32>
    %1007 = math.tanh %1006 : vector<2x32xf32>
    %cst_175 = arith.constant 1.000000e+00 : f32
    %1008 = vector.broadcast %cst_175 : f32 to vector<2x32xf32>
    %1009 = arith.subf %1008, %1000 : vector<2x32xf32>
    %1010 = arith.mulf %1009, %1007 : vector<2x32xf32>
    %1011 = arith.mulf %1000, %981 : vector<2x32xf32>
    %1012 = arith.addf %1010, %1011 : vector<2x32xf32>
    %1013 = vector.extract_strided_slice %825 {offsets = [1, 0, 0], sizes = [1, 2, 96], strides = [1, 1, 1]} : vector<8x2x96xf32> to vector<1x2x96xf32>
    %1014 = vector.shape_cast %1013 : vector<1x2x96xf32> to vector<2x96xf32>
    %cst_176 = arith.constant dense<0.000000e+00> : vector<2x96xf32>
    %1015 = tpu.matmul %1012, %817, %cst_176 {dimension_numbers = #tpu.dot_dimension_numbers<[1], [0], [0], [1], [0, 0, 1, 1], [], []>} : vector<2x32xf32>, vector<32x96xf32>, vector<2x96xf32> -> vector<2x96xf32>
    %1016 = vector.extract_strided_slice %1014 {offsets = [0, 0], sizes = [2, 32], strides = [1, 1]} : vector<2x96xf32> to vector<2x32xf32>
    %1017 = vector.extract_strided_slice %1015 {offsets = [0, 0], sizes = [2, 32], strides = [1, 1]} : vector<2x96xf32> to vector<2x32xf32>
    %1018 = arith.addf %1016, %1017 : vector<2x32xf32>
    %1019 = arith.negf %1018 : vector<2x32xf32>
    %1020 = math.exp %1019 : vector<2x32xf32>
    %cst_177 = arith.constant 1.000000e+00 : f32
    %1021 = vector.broadcast %cst_177 : f32 to vector<2x32xf32>
    %1022 = arith.addf %1021, %1020 : vector<2x32xf32>
    %1023 = arith.divf %1021, %1022 : vector<2x32xf32>
    %1024 = vector.extract_strided_slice %1014 {offsets = [0, 32], sizes = [2, 32], strides = [1, 1]} : vector<2x96xf32> to vector<2x32xf32>
    %1025 = vector.extract_strided_slice %1015 {offsets = [0, 32], sizes = [2, 32], strides = [1, 1]} : vector<2x96xf32> to vector<2x32xf32>
    %1026 = arith.addf %1024, %1025 : vector<2x32xf32>
    %1027 = arith.negf %1026 : vector<2x32xf32>
    %1028 = math.exp %1027 : vector<2x32xf32>
    %cst_178 = arith.constant 1.000000e+00 : f32
    %1029 = vector.broadcast %cst_178 : f32 to vector<2x32xf32>
    %1030 = arith.addf %1029, %1028 : vector<2x32xf32>
    %1031 = arith.divf %1029, %1030 : vector<2x32xf32>
    %1032 = vector.extract_strided_slice %1014 {offsets = [0, 64], sizes = [2, 32], strides = [1, 1]} : vector<2x96xf32> to vector<2x32xf32>
    %1033 = vector.extract_strided_slice %1015 {offsets = [0, 64], sizes = [2, 32], strides = [1, 1]} : vector<2x96xf32> to vector<2x32xf32>
    %1034 = vector.broadcast %821 : vector<1x32xf32> to vector<2x32xf32>
    %1035 = arith.addf %1033, %1034 : vector<2x32xf32>
    %1036 = arith.mulf %1023, %1035 : vector<2x32xf32>
    %1037 = arith.addf %1032, %1036 : vector<2x32xf32>
    %1038 = math.tanh %1037 : vector<2x32xf32>
    %cst_179 = arith.constant 1.000000e+00 : f32
    %1039 = vector.broadcast %cst_179 : f32 to vector<2x32xf32>
    %1040 = arith.subf %1039, %1031 : vector<2x32xf32>
    %1041 = arith.mulf %1040, %1038 : vector<2x32xf32>
    %1042 = arith.mulf %1031, %1012 : vector<2x32xf32>
    %1043 = arith.addf %1041, %1042 : vector<2x32xf32>
    %1044 = vector.extract_strided_slice %825 {offsets = [0, 0, 0], sizes = [1, 2, 96], strides = [1, 1, 1]} : vector<8x2x96xf32> to vector<1x2x96xf32>
    %1045 = vector.shape_cast %1044 : vector<1x2x96xf32> to vector<2x96xf32>
    %cst_180 = arith.constant dense<0.000000e+00> : vector<2x96xf32>
    %1046 = tpu.matmul %1043, %817, %cst_180 {dimension_numbers = #tpu.dot_dimension_numbers<[1], [0], [0], [1], [0, 0, 1, 1], [], []>} : vector<2x32xf32>, vector<32x96xf32>, vector<2x96xf32> -> vector<2x96xf32>
    %1047 = vector.extract_strided_slice %1045 {offsets = [0, 0], sizes = [2, 32], strides = [1, 1]} : vector<2x96xf32> to vector<2x32xf32>
    %1048 = vector.extract_strided_slice %1046 {offsets = [0, 0], sizes = [2, 32], strides = [1, 1]} : vector<2x96xf32> to vector<2x32xf32>
    %1049 = arith.addf %1047, %1048 : vector<2x32xf32>
    %1050 = arith.negf %1049 : vector<2x32xf32>
    %1051 = math.exp %1050 : vector<2x32xf32>
    %cst_181 = arith.constant 1.000000e+00 : f32
    %1052 = vector.broadcast %cst_181 : f32 to vector<2x32xf32>
    %1053 = arith.addf %1052, %1051 : vector<2x32xf32>
    %1054 = arith.divf %1052, %1053 : vector<2x32xf32>
    %1055 = vector.extract_strided_slice %1045 {offsets = [0, 32], sizes = [2, 32], strides = [1, 1]} : vector<2x96xf32> to vector<2x32xf32>
    %1056 = vector.extract_strided_slice %1046 {offsets = [0, 32], sizes = [2, 32], strides = [1, 1]} : vector<2x96xf32> to vector<2x32xf32>
    %1057 = arith.addf %1055, %1056 : vector<2x32xf32>
    %1058 = arith.negf %1057 : vector<2x32xf32>
    %1059 = math.exp %1058 : vector<2x32xf32>
    %cst_182 = arith.constant 1.000000e+00 : f32
    %1060 = vector.broadcast %cst_182 : f32 to vector<2x32xf32>
    %1061 = arith.addf %1060, %1059 : vector<2x32xf32>
    %1062 = arith.divf %1060, %1061 : vector<2x32xf32>
    %1063 = vector.extract_strided_slice %1045 {offsets = [0, 64], sizes = [2, 32], strides = [1, 1]} : vector<2x96xf32> to vector<2x32xf32>
    %1064 = vector.extract_strided_slice %1046 {offsets = [0, 64], sizes = [2, 32], strides = [1, 1]} : vector<2x96xf32> to vector<2x32xf32>
    %1065 = vector.broadcast %821 : vector<1x32xf32> to vector<2x32xf32>
    %1066 = arith.addf %1064, %1065 : vector<2x32xf32>
    %1067 = arith.mulf %1054, %1066 : vector<2x32xf32>
    %1068 = arith.addf %1063, %1067 : vector<2x32xf32>
    %1069 = math.tanh %1068 : vector<2x32xf32>
    %cst_183 = arith.constant 1.000000e+00 : f32
    %1070 = vector.broadcast %cst_183 : f32 to vector<2x32xf32>
    %1071 = arith.subf %1070, %1062 : vector<2x32xf32>
    %1072 = arith.mulf %1071, %1069 : vector<2x32xf32>
    %1073 = arith.mulf %1062, %1043 : vector<2x32xf32>
    %1074 = arith.addf %1072, %1073 : vector<2x32xf32>
    %1075 = vector.shape_cast %1074 : vector<2x32xf32> to vector<1x2x32xf32>
    %1076 = vector.shape_cast %1043 : vector<2x32xf32> to vector<1x2x32xf32>
    %1077 = vector.shape_cast %1012 : vector<2x32xf32> to vector<1x2x32xf32>
    %1078 = vector.shape_cast %981 : vector<2x32xf32> to vector<1x2x32xf32>
    %1079 = vector.shape_cast %950 : vector<2x32xf32> to vector<1x2x32xf32>
    %1080 = vector.shape_cast %919 : vector<2x32xf32> to vector<1x2x32xf32>
    %1081 = vector.shape_cast %888 : vector<2x32xf32> to vector<1x2x32xf32>
    %1082 = vector.shape_cast %857 : vector<2x32xf32> to vector<1x2x32xf32>
    %1083 = tpu.concatenate %1075, %1076, %1077, %1078, %1079, %1080, %1081, %1082 in 0 : vector<1x2x32xf32>, vector<1x2x32xf32>, vector<1x2x32xf32>, vector<1x2x32xf32>, vector<1x2x32xf32>, vector<1x2x32xf32>, vector<1x2x32xf32>, vector<1x2x32xf32> -> vector<8x2x32xf32>
    %1084 = tpu.concatenate %813, %1083 in 2 : vector<8x2x32xf32>, vector<8x2x32xf32> -> vector<8x2x64xf32>
    %1085 = vector.shape_cast %1084 : vector<8x2x64xf32> to vector<16x64xf32>
    %c0_184 = arith.constant 0 : index
    %c0_185 = arith.constant 0 : index
    %1086 = vector.load %arg9[%c0_184, %c0_185] : memref<64x16xf32, #tpu.memory_space<vmem>>, vector<64x16xf32>
    %cst_186 = arith.constant dense<0.000000e+00> : vector<16x16xf32>
    %1087 = tpu.matmul %1085, %1086, %cst_186 {dimension_numbers = #tpu.dot_dimension_numbers<[1], [0], [0], [1], [0, 0, 1, 1], [], []>} : vector<16x64xf32>, vector<64x16xf32>, vector<16x16xf32> -> vector<16x16xf32>
    %c0_187 = arith.constant 0 : index
    %c0_188 = arith.constant 0 : index
    %1088 = vector.load %arg10[%c0_187, %c0_188] : memref<1x16xf32, #tpu.memory_space<vmem>>, vector<1x16xf32>
    %1089 = vector.broadcast %1088 : vector<1x16xf32> to vector<16x16xf32>
    %1090 = arith.addf %1087, %1089 : vector<16x16xf32>
    %1091 = vector.shape_cast %1090 : vector<16x16xf32> to vector<8x2x16xf32>
    %c0_189 = arith.constant 0 : index
    %c0_190 = arith.constant 0 : index
    %1092 = vector.load %arg11[%c0_189, %c0_190] : memref<6x8xf32, #tpu.memory_space<vmem>>, vector<6x8xf32>
    %c0_191 = arith.constant 0 : index
    %c0_192 = arith.constant 0 : index
    %1093 = vector.load %arg12[%c0_191, %c0_192] : memref<6x1xf32, #tpu.memory_space<vmem>>, vector<6x1xf32>
    %c0_193 = arith.constant 0 : index
    %c0_194 = arith.constant 0 : index
    %1094 = vector.load %arg13[%c0_193, %c0_194] : memref<16x20xf32, #tpu.memory_space<vmem>>, vector<16x20xf32>
    %c0_195 = arith.constant 0 : index
    %c0_196 = arith.constant 0 : index
    %1095 = vector.load %arg14[%c0_195, %c0_196] : memref<1x20xf32, #tpu.memory_space<vmem>>, vector<1x20xf32>
    %c0_197 = arith.constant 0 : index
    %c0_198 = arith.constant 0 : index
    %1096 = vector.load %arg15[%c0_197, %c0_198] : memref<4x6xf32, #tpu.memory_space<vmem>>, vector<4x6xf32>
    %c0_199 = arith.constant 0 : index
    %c0_200 = arith.constant 0 : index
    %1097 = vector.load %arg16[%c0_199, %c0_200] : memref<4x1xf32, #tpu.memory_space<vmem>>, vector<4x1xf32>
    %1098 = vector.extract_strided_slice %1091 {offsets = [0, 0, 0], sizes = [8, 1, 16], strides = [1, 1, 1]} : vector<8x2x16xf32> to vector<8x1x16xf32>
    %1099 = vector.shape_cast %1098 : vector<8x1x16xf32> to vector<8x16xf32>
    %cst_201 = arith.constant dense<0.000000e+00> : vector<6x16xf32>
    %1100 = tpu.matmul %1092, %1099, %cst_201 {dimension_numbers = #tpu.dot_dimension_numbers<[1], [0], [0], [1], [0, 0, 1, 1], [], []>} : vector<6x8xf32>, vector<8x16xf32>, vector<6x16xf32> -> vector<6x16xf32>
    %1101 = vector.broadcast %1093 : vector<6x1xf32> to vector<6x16xf32>
    %1102 = arith.addf %1100, %1101 : vector<6x16xf32>
    %cst_202 = arith.constant dense<0.000000e+00> : vector<6x20xf32>
    %1103 = tpu.matmul %1102, %1094, %cst_202 {dimension_numbers = #tpu.dot_dimension_numbers<[1], [0], [0], [1], [0, 0, 1, 1], [], []>} : vector<6x16xf32>, vector<16x20xf32>, vector<6x20xf32> -> vector<6x20xf32>
    %1104 = vector.broadcast %1095 : vector<1x20xf32> to vector<6x20xf32>
    %1105 = arith.addf %1103, %1104 : vector<6x20xf32>
    %cst_203 = arith.constant dense<0.000000e+00> : vector<4x20xf32>
    %1106 = tpu.matmul %1096, %1105, %cst_203 {dimension_numbers = #tpu.dot_dimension_numbers<[1], [0], [0], [1], [0, 0, 1, 1], [], []>} : vector<4x6xf32>, vector<6x20xf32>, vector<4x20xf32> -> vector<4x20xf32>
    %1107 = vector.broadcast %1097 : vector<4x1xf32> to vector<4x20xf32>
    %1108 = arith.addf %1106, %1107 : vector<4x20xf32>
    %cst_204 = arith.constant dense<0xFF800000> : vector<20xf32>
    %1109 = vector.multi_reduction <maximumf>, %1108, %cst_204 [0] : vector<4x20xf32> to vector<20xf32>
    %1110 = vector.shape_cast %1109 : vector<20xf32> to vector<1x20xf32>
    %1111 = vector.broadcast %1110 : vector<1x20xf32> to vector<4x20xf32>
    %1112 = arith.subf %1108, %1111 : vector<4x20xf32>
    %1113 = math.exp %1112 : vector<4x20xf32>
    %cst_205 = arith.constant dense<0.000000e+00> : vector<20xf32>
    %1114 = vector.multi_reduction <add>, %1113, %cst_205 [0] : vector<4x20xf32> to vector<20xf32>
    %1115 = vector.shape_cast %1114 : vector<20xf32> to vector<1x20xf32>
    %1116 = vector.broadcast %1115 : vector<1x20xf32> to vector<4x20xf32>
    %1117 = arith.divf %1113, %1116 : vector<4x20xf32>
    %1118 = vector.extract_strided_slice %1091 {offsets = [0, 1, 0], sizes = [8, 1, 16], strides = [1, 1, 1]} : vector<8x2x16xf32> to vector<8x1x16xf32>
    %1119 = vector.shape_cast %1118 : vector<8x1x16xf32> to vector<8x16xf32>
    %cst_206 = arith.constant dense<0.000000e+00> : vector<6x16xf32>
    %1120 = tpu.matmul %1092, %1119, %cst_206 {dimension_numbers = #tpu.dot_dimension_numbers<[1], [0], [0], [1], [0, 0, 1, 1], [], []>} : vector<6x8xf32>, vector<8x16xf32>, vector<6x16xf32> -> vector<6x16xf32>
    %1121 = vector.broadcast %1093 : vector<6x1xf32> to vector<6x16xf32>
    %1122 = arith.addf %1120, %1121 : vector<6x16xf32>
    %cst_207 = arith.constant dense<0.000000e+00> : vector<6x20xf32>
    %1123 = tpu.matmul %1122, %1094, %cst_207 {dimension_numbers = #tpu.dot_dimension_numbers<[1], [0], [0], [1], [0, 0, 1, 1], [], []>} : vector<6x16xf32>, vector<16x20xf32>, vector<6x20xf32> -> vector<6x20xf32>
    %1124 = vector.broadcast %1095 : vector<1x20xf32> to vector<6x20xf32>
    %1125 = arith.addf %1123, %1124 : vector<6x20xf32>
    %cst_208 = arith.constant dense<0.000000e+00> : vector<4x20xf32>
    %1126 = tpu.matmul %1096, %1125, %cst_208 {dimension_numbers = #tpu.dot_dimension_numbers<[1], [0], [0], [1], [0, 0, 1, 1], [], []>} : vector<4x6xf32>, vector<6x20xf32>, vector<4x20xf32> -> vector<4x20xf32>
    %1127 = vector.broadcast %1097 : vector<4x1xf32> to vector<4x20xf32>
    %1128 = arith.addf %1126, %1127 : vector<4x20xf32>
    %cst_209 = arith.constant dense<0xFF800000> : vector<20xf32>
    %1129 = vector.multi_reduction <maximumf>, %1128, %cst_209 [0] : vector<4x20xf32> to vector<20xf32>
    %1130 = vector.shape_cast %1129 : vector<20xf32> to vector<1x20xf32>
    %1131 = vector.broadcast %1130 : vector<1x20xf32> to vector<4x20xf32>
    %1132 = arith.subf %1128, %1131 : vector<4x20xf32>
    %1133 = math.exp %1132 : vector<4x20xf32>
    %cst_210 = arith.constant dense<0.000000e+00> : vector<20xf32>
    %1134 = vector.multi_reduction <add>, %1133, %cst_210 [0] : vector<4x20xf32> to vector<20xf32>
    %1135 = vector.shape_cast %1134 : vector<20xf32> to vector<1x20xf32>
    %1136 = vector.broadcast %1135 : vector<1x20xf32> to vector<4x20xf32>
    %1137 = arith.divf %1133, %1136 : vector<4x20xf32>
    %1138 = vector.shape_cast %1117 : vector<4x20xf32> to vector<1x4x20xf32>
    %1139 = vector.shape_cast %1137 : vector<4x20xf32> to vector<1x4x20xf32>
    %1140 = tpu.concatenate %1138, %1139 in 0 : vector<1x4x20xf32>, vector<1x4x20xf32> -> vector<2x4x20xf32>
    %c0_211 = arith.constant 0 : index
    %c0_212 = arith.constant 0 : index
    %c0_213 = arith.constant 0 : index
    %1141 = vector.load %arg17[%c0_211, %c0_212, %c0_213] : memref<2x4x20xf32, #tpu.memory_space<vmem>>, vector<2x4x20xf32>
    tpu.vector_store %arg17[%c0_211, %c0_212, %c0_213], %1140 {strides = array<i32>} : memref<2x4x20xf32, #tpu.memory_space<vmem>>, vector<2x4x20xf32>,
    return
  }
}

</mosaic_0001>

<bundles_post_ra>
// kernel: forward.1
= control target key start
LH: loop header
LB: loop body
LE: loop exit
PB: predicated region body
PF: predicated region fallthrough
CT: control target
= control target key end

     0   :  { %s7644_s0 = inlined_call_operand.vmem [shape: f32[8,2,16], index: 0, kind: input, shape index: {}]   ;;  %s7645_s1 = inlined_call_operand.vmem [shape: f32[2,16,96], index: 1, kind: input, shape index: {}]   ;;  %s7646_s2 = inlined_call_operand.vmem [shape: f32[2,32,96], index: 2, kind: input, shape index: {}]   ;;  %s7647_s3 = inlined_call_operand.vmem [shape: f32[2,1,96], index: 3, kind: input, shape index: {}]   ;;  %s7648_s4 = inlined_call_operand.vmem [shape: f32[2,1,32], index: 4, kind: input, shape index: {}]   ;;  %s7649_s5 = inlined_call_operand.vmem [shape: f32[2,64,96], index: 5, kind: input, shape index: {}]   ;;  %s7650_s6 = inlined_call_operand.vmem [shape: f32[2,32,96], index: 6, kind: input, shape index: {}]   ;;  %s7651_s7 = inlined_call_operand.vmem [shape: f32[2,1,96], index: 7, kind: input, shape index: {}]   ;;  %s7652_s8 = inlined_call_operand.vmem [shape: f32[2,1,32], index: 8, kind: input, shape index: {}]   ;;  %s7653_s9 = inlined_call_operand.vmem [shape: f32[64,16], index: 9, kind: input, shape index: {}]   ;;  %s7654_s10 = inlined_call_operand.vmem [shape: f32[1,16], index: 10, kind: input, shape index: {}]   ;;  %s7655_s11 = inlined_call_operand.vmem [shape: f32[6,8], index: 11, kind: input, shape index: {}]   ;;  %s7656_s12 = inlined_call_operand.vmem [shape: f32[6,1], index: 12, kind: input, shape index: {}]   ;;  %s7657_s13 = inlined_call_operand.vmem [shape: f32[16,20], index: 13, kind: input, shape index: {}]   ;;  %s7658_s14 = inlined_call_operand.vmem [shape: f32[1,20], index: 14, kind: input, shape index: {}]   ;;  %s7659_s15 = inlined_call_operand.vmem [shape: f32[4,6], index: 15, kind: input, shape index: {}]   ;;  %s7660_s16 = inlined_call_operand.vmem [shape: f32[4,1], index: 16, kind: input, shape index: {}]   ;;  %s7661_s17 = inlined_call_operand.hbm [shape: f32[2,4,20], index: 17, kind: output, shape index: {}]  }
   0x1   :  { %7664 = sst [smem:[#allocation5_spill]] %s7644_s0 }
   0x2   :  { %7665 = sst [smem:[#allocation6_spill]] %s7645_s1 }
   0x3   :  { %v67_v0 = vld [vmem:[%s7646_s2] sm:$0xff]  ;;  %v68_v1 = vld [vmem:[%s7646_s2 + $0x8] sm:$0xff]  ;;  %v69_v2 = vld [vmem:[%s7646_s2 + $0x10] sm:$0xff]  ;;  %v92_v3 = vlaneseq  ;;  %v6511_v4 = vmov 0.0|0.0   ;;  %s7666_s1 = sld [smem:[#allocation6_spill]]  ;;  %vm6512_vm0 = vmmov 0  }
   0x4   :  { %6026 = vmatprep.subr.bf16.mxu1 %v6511_v4  ;;  %v6620_v5 = vpack.c.bf16 %v68_v1, %v67_v0  ;;  %v70_v6 = vld [vmem:[%s7646_s2 + $0x18] sm:$0xff]  ;;  %v6513_v9 = vmov 0.0   ;;  %s7667_s24 = sld [smem:[#allocation5_spill]]  ;;  %v6514_v14 = vmov 1983009808  }
   0x5   :  { %5580 = vmatprep.mubr.msk.f32.mxu1 %vm6512_vm0, %v6513_v9  ;;  %v90_v15 = vunpack.c.l.s4 %v6514_v14  ;;  %v6643_v16 = vpack.c.bf16 %v70_v6, %v69_v2  ;;  %v6648_v18 = vshrl.u32 %v92_v3, 7  ;;  %v5247_v28 = vld [vmem:[%s7648_s4] ss:$0 sm:$0xff] }
   0x6   :  { %6028 = vmatpush3.bf16.msra.mxu1 %v6620_v5 }
   0x7   :  { %6029 = vmatprep.subr.bf16.mxu1 %v6511_v4  ;;  %v91_v22 = vunpack.c.0.s8 %v90_v15 }
   0x9   :  { %v65_v7 = vld [vmem:[%s7666_s1] sm:$0xff]  ;;  %v66_v8 = vld [vmem:[%s7666_s1 + $0x8] sm:$0xff] }
   0xa   :  { %v6022_v10 = vpack.c.bf16 %v66_v8, %v65_v7  ;;  %v57_v11 = vld [vmem:[%s7667_s24] sm:$0x3]  ;;  %v58_v12 = vld [vmem:[%s7667_s24 + $0x2] sm:$0x3]  ;;  %v59_v13 = vld [vmem:[%s7667_s24 + $0x4] sm:$0x3] }
   0xb   :  { %v60_v17 = vld [vmem:[%s7667_s24 + $0x6] sm:$0x3]  ;;  %v61_v19 = vld [vmem:[%s7667_s24 + $0x8] sm:$0x3]  ;;  %v87_v20 = vcombine.low %v57_v11, %v58_v12  ;;  %v62_v23 = vld [vmem:[%s7667_s24 + $0xa] sm:$0x3] }
   0xc   :  { %6023 = vmatprep.subr.bf16.mxu0 %v6022_v10  ;;  %v88_v21 = vcombine.low %v59_v13, %v60_v17  ;;  %v63_v24 = vld [vmem:[%s7667_s24 + $0xc] sm:$0x3]  ;;  %v64_v25 = vld [vmem:[%s7667_s24 + $0xe] sm:$0x3]  ;;  %v104_v26 = vcombine.low %v61_v19, %v62_v23 }
   0xd   :  { %6025 = vmatpush3.bf16.msra.mxu0 %v6022_v10  ;;  %v105_v27 = vcombine.low %v63_v24, %v64_v25 }
   0xe   :  { %22 = vsyncpa [#allocation3], 0  ;;  %v6667_v29 = vsub.s32 %v91_v22, %v6648_v18  ;;  %s6515_s28 = smov 64   ;;  %6032 = vmatprep.subr.bf16.mxu0 %v6511_v4  ;;  %6031 = vmatpush3.bf16.msra.mxu1 %v6643_v16  ;;  %vm121_vm1 = vcmask 130048   ;;  %v5243_v42 = vld [vmem:[%s7647_s3] ss:$0 sm:$0xff] }
   0xf   :  { %331 = vrot.lane.b32.xlu0 %v5247_v28, %s6515_s28  ;;  %6038 = vmatprep.subr.bf16.mxu1 %v6511_v4  ;;  %s6516_s0 = smov 96   ;;  %vm245_vm2 = vcmask 261120   ;;  %vm2322_vm3 = vcmask 523264   ;;  %vm4679_vm4 = vcmask 1041409   ;;  %vm4681_vm5 = vcmask 1042434  }
  0x10   :  { %v95_v30 = vrot.slane %v87_v20, %v6667_v29  ;;  %v102_v31 = vrot.slane %v88_v21, %v6667_v29  ;;  %v112_v32 = vrot.slane %v104_v26, %v6667_v29  ;;  %v119_v33 = vrot.slane %v105_v27, %v6667_v29 }
  0x11   :  { %5581 = vmatmul.mubr.f32.vlgmr.msra.gmra.mrb[0].mxu1 %v6513_v9  ;;  %vm4683_vm6 = vcmask 1043459   ;;  %vm4685_vm7 = vcmask 1044484   ;;  %vm4687_vm8 = vcmask 1045509   ;;  %vm4689_vm9 = vcmask 1046534  }
  0x12   :  { %v6678_v34 = vcombine.low %v95_v30, %v102_v31  ;;  %v6680_v35 = vcombine.low %v112_v32, %v119_v33  ;;  %6040 = vmatpush3.bf16.msra.mxu1 %v6620_v5  ;;  %5602 = vmatprep.mubr.msk.f32.mxu1 %vm6512_vm0, %v6513_v9  ;;  %vm4691_vm10 = vcmask 1047559   ;;  %vm4694_vm11 = vcmask 64512  }
  0x13   :  { %6041 = vmatprep.subr.bf16.mxu1 %v6511_v4  ;;  %vm4856_vm12 = vcmask 1045504   ;;  %vm4852_vm13 = vcmask 48128   ;;  %vm4930_vm14 = vcmask 158720  }
  0x14   :  { %5569 = vmatprep.mubr.msk.f32.mxu0 %vm121_vm1, %v6678_v34 }
  0x15   :  { %5570 = vmatmul.mubr.msk.f32.vlgmr.msra.gmra.mrb[0].mxu0 %vm121_vm1, %v6680_v35 }
  0x16   :  { %6034 = vmatpush3.bf16.msra.mxu0 %v6620_v5  ;;  %5591 = vmatprep.mubr.msk.f32.mxu0 %vm6512_vm0, %v6513_v9 }
  0x17   :  { %6035 = vmatprep.subr.bf16.mxu0 %v6511_v4  ;;  %6043 = vmatpush3.bf16.msra.mxu1 %v6643_v16 }
  0x18   :  { %6050 = vmatprep.subr.bf16.mxu1 %v6511_v4 }
  0x1a   :  { %6037 = vmatpush3.bf16.msra.mxu0 %v6643_v16 }
  0x1b   :  { %6044 = vmatprep.subr.bf16.mxu0 %v6511_v4 }
  0x81   :  { %v6698_v36 = vpop.permute.xlu0 %331 }
  0xe4   :  { %v315_v37 = vpop.f32.mrb[0].mxu1 }
  0xe5   :  { %v334_v38 = vadd.f32 %v6698_v36, %v315_v37  ;;  %v5582_v39 = vpop.f32.mrb[1].mxu1 }
  0xe7   :  { %v342_v40 = vrot.slane %v334_v38, %v6667_v29 }
  0xe8   :  { %v5571_v41 = vpop.f32.mrb[0].mxu0 }
  0xe9   :  { %v6705_v43 = vadd.f32 %v5571_v41, %v5243_v42  ;;  %v192_v44 = vpop.f32.mrb[1].mxu0  ;;  %343 = vrot.lane.b32.xlu0 %v342_v40, %s6515_s28 }
  0xea   :  { %v6708_v45 = vadd.f32 %v5243_v42, %v192_v44 }
  0xec   :  { %v210_v46 = vrot.slane %v6708_v45, %v6667_v29  ;;  %v203_v32 = vcombine.high %v6708_v45, %v6708_v45 }
  0xee   :  { %v319_v47 = vadd.f32 %v315_v37, %v210_v46  ;;  %v218_v6 = vcombine.high %v210_v46, %v210_v46  ;;  %v217_v33 = vrot.slane %v203_v32, %v6667_v29 }
  0xf0   :  { %v5246_v48 = vmul.f32 -1.442695, %v319_v47 }
  0xf2   :  { %6287 = vpow2.f32 %v5246_v48 }
  0xfc   :  { %v6288_v49 = vpop.eup %6287 }
  0xfd   :  { %v323_v50 = vadd.f32 1.0, %v6288_v49 }
  0xff   :  { %6289 = vrcp.f32 %v323_v50 }
 0x109   :  { %v6290_v51 = vpop.eup %6289 }
 0x10a   :  { %v353_v57 = vsub.f32 1.0, %v6290_v51  ;;  %v359_v59 = vmul.f32 0.0, %v6290_v51 }
 0x15b   :  { %v344_v52 = vpop.permute.xlu0 %343 }
 0x15c   :  { %v346_v53 = vmul.f32 %v6290_v51, %v344_v52 }
 0x15e   :  { %348 = vrot.lane.b32.xlu1 %v346_v53, %s6515_s28 }
 0x1d0   :  { %v349_v54 = vpop.permute.xlu1 %348 }
 0x1d1   :  { %v351_v55 = vadd.f32 %v349_v54, %v210_v46 }
 0x1d3   :  { %6291 = vtanh.f32 %v351_v55 }
 0x1dd   :  { %v6292_v56 = vpop.eup %6291 }
 0x1de   :  { %355 = vrot.lane.b32.xlu1 %v6292_v56, %s6516_s0 }
 0x250   :  { %v356_v58 = vpop.permute.xlu1 %355 }
 0x251   :  { %v358_v60 = vmul.f32 %v356_v58, %v353_v57 }
 0x253   :  { %v360_v61 = vadd.f32 %v359_v59, %v358_v60  ;;  %v219_v59 = vcombine.high %v217_v33, %v217_v33 }
 0x255   :  { %v368_v62 = vrot.slane %v360_v61, %v6667_v29 }
 0x257   :  { %369 = vrot.lane.b32.xlu0 %v368_v62, %s6516_s0 }
 0x2c9   :  { %v6716_v63 = vpop.permute.xlu0 %369 }
 0x2ca   :  { %5592 = vmatmul.mubr.msk.f32.vlgmr.msra.gmra.mrb[2].mxu0 %vm245_vm2, %v6716_v63 }
 0x2cb   :  { %6046 = vmatpush3.bf16.msra.mxu0 %v6620_v5  ;;  %5613 = vmatprep.mubr.msk.f32.mxu0 %vm6512_vm0, %v6513_v9 }
 0x2cc   :  { %6047 = vmatprep.subr.bf16.mxu0 %v6511_v4 }
 0x2cf   :  { %6049 = vmatpush3.bf16.msra.mxu0 %v6643_v16 }
 0x2d0   :  { %6056 = vmatprep.subr.bf16.mxu0 %v6511_v4 }
 0x39d   :  { %v439_v0 = vpop.f32.mrb[2].mxu0 }
 0x39e   :  { %v450_v1 = vadd.f32 %v439_v0, %v6698_v36  ;;  %v5593_v2 = vpop.f32.mrb[3].mxu0  ;;  %v443_v7 = vadd.f32 %v439_v0, %v218_v6 }
 0x3a0   :  { %v458_v3 = vrot.slane %v450_v1, %v6667_v29  ;;  %v5249_v8 = vmul.f32 -1.442695, %v443_v7 }
 0x3a2   :  { %459 = vrot.lane.b32.xlu1 %v458_v3, %s6515_s28  ;;  %6293 = vpow2.f32 %v5249_v8 }
 0x3ac   :  { %v6294_v10 = vpop.eup %6293 }
 0x3ad   :  { %v447_v11 = vadd.f32 1.0, %v6294_v10 }
 0x3af   :  { %6295 = vrcp.f32 %v447_v11 }
 0x3b9   :  { %v6296_v12 = vpop.eup %6295 }
 0x3ba   :  { %v469_v20 = vsub.f32 1.0, %v6296_v12  ;;  %v475_v22 = vmul.f32 %v6296_v12, %v360_v61 }
 0x414   :  { %v460_v13 = vpop.permute.xlu1 %459 }
 0x415   :  { %v462_v14 = vmul.f32 %v6296_v12, %v460_v13 }
 0x417   :  { %464 = vrot.lane.b32.xlu0 %v462_v14, %s6515_s28 }
 0x489   :  { %v465_v15 = vpop.permute.xlu0 %464 }
 0x48a   :  { %v467_v17 = vadd.f32 %v465_v15, %v218_v6 }
 0x48c   :  { %6297 = vtanh.f32 %v467_v17 }
 0x496   :  { %v6298_v19 = vpop.eup %6297 }
 0x497   :  { %471 = vrot.lane.b32.xlu1 %v6298_v19, %s6516_s0 }
 0x509   :  { %v472_v21 = vpop.permute.xlu1 %471 }
 0x50a   :  { %v474_v23 = vmul.f32 %v472_v21, %v469_v20 }
 0x50c   :  { %v476_v24 = vadd.f32 %v475_v22, %v474_v23  ;;  %v227_v23 = vrot.slane %v6705_v43, %v6667_v29 }
 0x50e   :  { %v484_v25 = vrot.slane %v476_v24, %v6667_v29 }
 0x510   :  { %485 = vrot.lane.b32.xlu0 %v484_v25, %s6516_s0 }
 0x582   :  { %v6733_v26 = vpop.permute.xlu0 %485 }
 0x583   :  { %5603 = vmatmul.mubr.msk.f32.vlgmr.msra.gmra.mrb[2].mxu1 %vm245_vm2, %v6733_v26 }
 0x584   :  { %6052 = vmatpush3.bf16.msra.mxu1 %v6620_v5  ;;  %5624 = vmatprep.mubr.msk.f32.mxu1 %vm6512_vm0, %v6513_v9 }
 0x585   :  { %6053 = vmatprep.subr.bf16.mxu1 %v6511_v4 }
 0x588   :  { %6055 = vmatpush3.bf16.msra.mxu1 %v6643_v16 }
 0x589   :  { %6062 = vmatprep.subr.bf16.mxu1 %v6511_v4 }
 0x656   :  { %v555_v27 = vpop.f32.mrb[2].mxu1 }
 0x657   :  { %v566_v28 = vadd.f32 %v555_v27, %v6698_v36  ;;  %v5604_v30 = vpop.f32.mrb[3].mxu1  ;;  %v559_v37 = vadd.f32 %v555_v27, %v217_v33 }
 0x659   :  { %v574_v31 = vrot.slane %v566_v28, %v6667_v29  ;;  %v5251_v38 = vmul.f32 -1.442695, %v559_v37 }
 0x65b   :  { %575 = vrot.lane.b32.xlu1 %v574_v31, %s6515_s28  ;;  %6299 = vpow2.f32 %v5251_v38 }
 0x665   :  { %v6300_v39 = vpop.eup %6299 }
 0x666   :  { %v563_v40 = vadd.f32 1.0, %v6300_v39 }
 0x668   :  { %6301 = vrcp.f32 %v563_v40 }
 0x672   :  { %v6302_v41 = vpop.eup %6301 }
 0x673   :  { %v585_v45 = vsub.f32 1.0, %v6302_v41  ;;  %v591_v50 = vmul.f32 %v6302_v41, %v476_v24 }
 0x6cd   :  { %v576_v42 = vpop.permute.xlu1 %575 }
 0x6ce   :  { %v578_v44 = vmul.f32 %v6302_v41, %v576_v42 }
 0x6d0   :  { %580 = vrot.lane.b32.xlu0 %v578_v44, %s6515_s28 }
 0x742   :  { %v581_v46 = vpop.permute.xlu0 %580 }
 0x743   :  { %v583_v47 = vadd.f32 %v581_v46, %v217_v33 }
 0x745   :  { %6303 = vtanh.f32 %v583_v47 }
 0x74f   :  { %v6304_v48 = vpop.eup %6303 }
 0x750   :  { %587 = vrot.lane.b32.xlu1 %v6304_v48, %s6516_s0 }
 0x7c2   :  { %v588_v49 = vpop.permute.xlu1 %587 }
 0x7c3   :  { %v590_v51 = vmul.f32 %v588_v49, %v585_v45 }
 0x7c5   :  { %v592_v52 = vadd.f32 %v591_v50, %v590_v51  ;;  %v235_v51 = vcombine.high %v227_v23, %v227_v23 }
 0x7c7   :  { %v600_v53 = vrot.slane %v592_v52, %v6667_v29 }
 0x7c9   :  { %601 = vrot.lane.b32.xlu0 %v600_v53, %s6516_s0 }
 0x83b   :  { %v6753_v54 = vpop.permute.xlu0 %601 }
 0x83c   :  { %5614 = vmatmul.mubr.msk.f32.vlgmr.msra.gmra.mrb[4].mxu0 %vm245_vm2, %v6753_v54 }
 0x83d   :  { %6058 = vmatpush3.bf16.msra.mxu0 %v6620_v5  ;;  %5635 = vmatprep.mubr.msk.f32.mxu0 %vm6512_vm0, %v6513_v9 }
 0x83e   :  { %6059 = vmatprep.subr.bf16.mxu0 %v6511_v4 }
 0x841   :  { %6061 = vmatpush3.bf16.msra.mxu0 %v6643_v16 }
 0x842   :  { %6068 = vmatprep.subr.bf16.mxu0 %v6511_v4 }
 0x90f   :  { %v671_v55 = vpop.f32.mrb[4].mxu0 }
 0x910   :  { %v682_v56 = vadd.f32 %v671_v55, %v6698_v36  ;;  %v5615_v57 = vpop.f32.mrb[5].mxu0  ;;  %v675_v60 = vadd.f32 %v671_v55, %v219_v59 }
 0x912   :  { %v690_v58 = vrot.slane %v682_v56, %v6667_v29  ;;  %v5253_v61 = vmul.f32 -1.442695, %v675_v60 }
 0x914   :  { %691 = vrot.lane.b32.xlu1 %v690_v58, %s6515_s28  ;;  %6305 = vpow2.f32 %v5253_v61 }
 0x91e   :  { %v6306_v62 = vpop.eup %6305 }
 0x91f   :  { %v679_v0 = vadd.f32 1.0, %v6306_v62 }
 0x921   :  { %6307 = vrcp.f32 %v679_v0 }
 0x92b   :  { %v6308_v1 = vpop.eup %6307 }
 0x92c   :  { %v701_v10 = vsub.f32 1.0, %v6308_v1  ;;  %v707_v12 = vmul.f32 %v6308_v1, %v592_v52 }
 0x986   :  { %v692_v2 = vpop.permute.xlu1 %691 }
 0x987   :  { %v694_v3 = vmul.f32 %v6308_v1, %v692_v2 }
 0x989   :  { %696 = vrot.lane.b32.xlu0 %v694_v3, %s6515_s28 }
 0x9fb   :  { %v697_v6 = vpop.permute.xlu0 %696 }
 0x9fc   :  { %v699_v7 = vadd.f32 %v697_v6, %v219_v59 }
 0x9fe   :  { %6309 = vtanh.f32 %v699_v7 }
 0xa08   :  { %v6310_v8 = vpop.eup %6309 }
 0xa09   :  { %703 = vrot.lane.b32.xlu1 %v6310_v8, %s6516_s0 }
 0xa7b   :  { %v704_v11 = vpop.permute.xlu1 %703 }
 0xa7c   :  { %v706_v13 = vmul.f32 %v704_v11, %v701_v10 }
 0xa7e   :  { %v708_v14 = vadd.f32 %v707_v12, %v706_v13  ;;  %v220_v12 = vcombine.high %v6705_v43, %v6705_v43  ;;  %v5262_v43 = vld [vmem:[%s7666_s1 + $0x10] sm:$0xff] }
 0xa80   :  { %v716_v15 = vrot.slane %v708_v14, %v6667_v29  ;;  %v6817_v13 = vrot.slane %v220_v12, %v6667_v29 }
 0xa82   :  { %717 = vrot.lane.b32.xlu0 %v716_v15, %s6516_s0 }
 0xaf4   :  { %v6770_v17 = vpop.permute.xlu0 %717 }
 0xaf5   :  { %5625 = vmatmul.mubr.msk.f32.vlgmr.msra.gmra.mrb[4].mxu1 %vm245_vm2, %v6770_v17 }
 0xaf6   :  { %6064 = vmatpush3.bf16.msra.mxu1 %v6620_v5  ;;  %5646 = vmatprep.mubr.msk.f32.mxu1 %vm6512_vm0, %v6513_v9 }
 0xaf7   :  { %6065 = vmatprep.subr.bf16.mxu1 %v6511_v4 }
 0xafa   :  { %6067 = vmatpush3.bf16.msra.mxu1 %v6643_v16 }
 0xbc8   :  { %v787_v19 = vpop.f32.mrb[4].mxu1 }
 0xbc9   :  { %v798_v20 = vadd.f32 %v787_v19, %v6698_v36  ;;  %v5626_v21 = vpop.f32.mrb[5].mxu1  ;;  %v791_v24 = vadd.f32 %v787_v19, %v227_v23 }
 0xbcb   :  { %v806_v22 = vrot.slane %v798_v20, %v6667_v29  ;;  %v5255_v25 = vmul.f32 -1.442695, %v791_v24 }
 0xbcd   :  { %807 = vrot.lane.b32.xlu1 %v806_v22, %s6515_s28  ;;  %6311 = vpow2.f32 %v5255_v25  ;;  %v5263_v25 = vld [vmem:[%s7666_s1 + $0x18] sm:$0xff] }
 0xbd7   :  { %v6312_v27 = vpop.eup %6311 }
 0xbd8   :  { %v795_v28 = vadd.f32 1.0, %v6312_v27  ;;  %v6074_v27 = vpack.c.bf16 %v5263_v25, %v5262_v43 }
 0xbda   :  { %6313 = vrcp.f32 %v795_v28  ;;  %6075 = vmatprep.subr.bf16.mxu1 %v6074_v27 }
 0xbe4   :  { %v6314_v30 = vpop.eup %6313 }
 0xbe5   :  { %v817_v39 = vsub.f32 1.0, %v6314_v30  ;;  %v823_v41 = vmul.f32 %v6314_v30, %v708_v14 }
 0xc3f   :  { %v808_v31 = vpop.permute.xlu1 %807 }
 0xc40   :  { %v810_v32 = vmul.f32 %v6314_v30, %v808_v31  ;;  %v5264_v30 = vld [vmem:[%s7646_s2 + $0x20] sm:$0xff]  ;;  %v5265_v31 = vld [vmem:[%s7646_s2 + $0x28] sm:$0xff] }
 0xc42   :  { %812 = vrot.lane.b32.xlu0 %v810_v32, %s6515_s28  ;;  %v6840_v32 = vpack.c.bf16 %v5265_v31, %v5264_v30 }
 0xcb4   :  { %v813_v33 = vpop.permute.xlu0 %812 }
 0xcb5   :  { %v815_v37 = vadd.f32 %v813_v33, %v227_v23  ;;  %v5266_v33 = vld [vmem:[%s7646_s2 + $0x30] sm:$0xff] }
 0xcb7   :  { %6315 = vtanh.f32 %v815_v37 }
 0xcc1   :  { %v6316_v38 = vpop.eup %6315 }
 0xcc2   :  { %819 = vrot.lane.b32.xlu1 %v6316_v38, %s6516_s0 }
 0xd34   :  { %v820_v40 = vpop.permute.xlu1 %819 }
 0xd35   :  { %v822_v42 = vmul.f32 %v820_v40, %v817_v39 }
 0xd37   :  { %v824_v44 = vadd.f32 %v823_v41, %v822_v42  ;;  %v5274_v42 = vld [vmem:[%s7648_s4 + $0x1] ss:$0 sm:$0xff] }
 0xd39   :  { %v832_v46 = vrot.slane %v824_v44, %v6667_v29 }
 0xd3b   :  { %833 = vrot.lane.b32.xlu0 %v832_v46, %s6516_s0 }
 0xdad   :  { %v6788_v47 = vpop.permute.xlu0 %833 }
 0xdae   :  { %5636 = vmatmul.mubr.msk.f32.vlgmr.msra.gmra.mrb[6].mxu0 %vm245_vm2, %v6788_v47 }
 0xdaf   :  { %6070 = vmatpush3.bf16.msra.mxu0 %v6620_v5  ;;  %5657 = vmatprep.mubr.msk.f32.mxu0 %vm6512_vm0, %v6513_v9 }
 0xdb0   :  { %6071 = vmatprep.subr.bf16.mxu0 %v6511_v4 }
 0xdb3   :  { %6073 = vmatpush3.bf16.msra.mxu0 %v6643_v16 }
 0xdb4   :  { %6078 = vmatprep.subr.bf16.mxu0 %v6511_v4 }
 0xe81   :  { %v903_v48 = vpop.f32.mrb[6].mxu0 }
 0xe82   :  { %v914_v45 = vadd.f32 %v903_v48, %v6698_v36  ;;  %v5637_v49 = vpop.f32.mrb[7].mxu0  ;;  %v907_v52 = vadd.f32 %v903_v48, %v235_v51 }
 0xe84   :  { %v922_v50 = vrot.slane %v914_v45, %v6667_v29  ;;  %v5257_v5 = vmul.f32 -1.442695, %v907_v52 }
 0xe86   :  { %923 = vrot.lane.b32.xlu1 %v922_v50, %s6515_s28  ;;  %6317 = vpow2.f32 %v5257_v5 }
 0xe90   :  { %v6318_v53 = vpop.eup %6317 }
 0xe91   :  { %v911_v55 = vadd.f32 1.0, %v6318_v53 }
 0xe93   :  { %6319 = vrcp.f32 %v911_v55 }
 0xe9d   :  { %v6320_v56 = vpop.eup %6319 }
 0xe9e   :  { %v933_v61 = vsub.f32 1.0, %v6320_v56  ;;  %v939_v0 = vmul.f32 %v6320_v56, %v824_v44 }
 0xef8   :  { %v924_v57 = vpop.permute.xlu1 %923 }
 0xef9   :  { %v926_v16 = vmul.f32 %v6320_v56, %v924_v57  ;;  %v6892_v57 = vld [vmem:[%s7647_s3 + $0x1] ss:$0 sm:$0xff] }
 0xefb   :  { %928 = vrot.lane.b32.xlu0 %v926_v16, %s6515_s28 }
 0xf6d   :  { %v929_v58 = vpop.permute.xlu0 %928 }
 0xf6e   :  { %v931_v59 = vadd.f32 %v929_v58, %v235_v51 }
 0xf70   :  { %6321 = vtanh.f32 %v931_v59 }
 0xf7a   :  { %v6322_v60 = vpop.eup %6321 }
 0xf7b   :  { %935 = vrot.lane.b32.xlu1 %v6322_v60, %s6516_s0 }
 0xfed   :  { %v936_v62 = vpop.permute.xlu1 %935 }
 0xfee   :  { %v938_v1 = vmul.f32 %v936_v62, %v933_v61 }
 0xff0   :  { %v940_v2 = vadd.f32 %v939_v0, %v938_v1 }
 0xff2   :  { %v948_v3 = vrot.slane %v940_v2, %v6667_v29 }
 0xff4   :  { %949 = vrot.lane.b32.xlu0 %v948_v3, %s6516_s0 }
0x1066   :  { %v6805_v6 = vpop.permute.xlu0 %949 }
0x1067   :  { %5647 = vmatmul.mubr.msk.f32.vlgmr.msra.gmra.mrb[6].mxu1 %vm245_vm2, %v6805_v6 }
0x1068   :  { %5664 = vmatprep.mubr.msk.f32.mxu1 %vm121_vm1, %v6678_v34  ;;  %6077 = vmatpush3.bf16.msra.mxu1 %v6074_v27 }
0x1069   :  { %6084 = vmatprep.subr.bf16.mxu1 %v6511_v4 }
0x106b   :  { %5665 = vmatmul.mubr.msk.f32.vlgmr.msra.gmra.mrb[8].mxu1 %vm121_vm1, %v6680_v35  ;;  %v5267_v35 = vld [vmem:[%s7646_s2 + $0x38] sm:$0xff] }
0x106c   :  { %5686 = vmatprep.mubr.msk.f32.mxu1 %vm6512_vm0, %v6513_v9  ;;  %6086 = vmatpush3.bf16.msra.mxu1 %v6840_v32  ;;  %v6850_v37 = vpack.c.bf16 %v5267_v35, %v5266_v33 }
0x106d   :  { %6087 = vmatprep.subr.bf16.mxu1 %v6511_v4 }
0x1070   :  { %6089 = vmatpush3.bf16.msra.mxu1 %v6850_v37 }
0x1071   :  { %6096 = vmatprep.subr.bf16.mxu1 %v6511_v4 }
0x113a   :  { %v1019_v7 = vpop.f32.mrb[6].mxu1 }
0x113b   :  { %v1030_v8 = vadd.f32 %v1019_v7, %v6698_v36  ;;  %v5648_v10 = vpop.f32.mrb[7].mxu1  ;;  %v1023_v14 = vadd.f32 %v1019_v7, %v6817_v13 }
0x113d   :  { %v1038_v11 = vrot.slane %v1030_v8, %v6667_v29  ;;  %v5259_v15 = vmul.f32 -1.442695, %v1023_v14 }
0x113e   :  { %v5666_v48 = vpop.f32.mrb[8].mxu1 }
0x113f   :  { %1039 = vrot.lane.b32.xlu1 %v1038_v11, %s6515_s28  ;;  %6323 = vpow2.f32 %v5259_v15  ;;  %v6880_v49 = vpop.f32.mrb[9].mxu1  ;;  %v6895_v16 = vadd.f32 %v5666_v48, %v6892_v57 }
0x1141   :  { %v1285_v58 = vcombine.high %v6895_v16, %v6895_v16 }
0x1143   :  { %v1299_v59 = vrot.slane %v1285_v58, %v6667_v29 }
0x1145   :  { %v1301_v60 = vcombine.high %v1299_v59, %v1299_v59 }
0x1149   :  { %v6324_v19 = vpop.eup %6323 }
0x114a   :  { %v1027_v34 = vadd.f32 1.0, %v6324_v19 }
0x114c   :  { %6325 = vrcp.f32 %v1027_v34 }
0x1156   :  { %v6326_v20 = vpop.eup %6325 }
0x1157   :  { %v1049_v38 = vsub.f32 1.0, %v6326_v20  ;;  %v1055_v40 = vmul.f32 %v6326_v20, %v940_v2 }
0x11b1   :  { %v1040_v21 = vpop.permute.xlu1 %1039 }
0x11b2   :  { %v1042_v22 = vmul.f32 %v6326_v20, %v1040_v21 }
0x11b4   :  { %1044 = vrot.lane.b32.xlu0 %v1042_v22, %s6515_s28 }
0x1226   :  { %v1045_v23 = vpop.permute.xlu0 %1044 }
0x1227   :  { %v1047_v24 = vadd.f32 %v1045_v23, %v6817_v13 }
0x1229   :  { %6327 = vtanh.f32 %v1047_v24 }
0x1233   :  { %v6328_v28 = vpop.eup %6327 }
0x1234   :  { %1051 = vrot.lane.b32.xlu1 %v6328_v28, %s6516_s0 }
0x1238   :  { %1392 = vrot.lane.b32.xlu1 %v5274_v42, %s6515_s28 }
0x12a6   :  { %v1052_v39 = vpop.permute.xlu1 %1051 }
0x12a7   :  { %v1054_v41 = vmul.f32 %v1052_v39, %v1049_v38 }
0x12a9   :  { %v6857_v44 = vadd.f32 %v1055_v40, %v1054_v41 }
0x12aa   :  { %v6884_v52 = vpop.permute.xlu1 %1392 }
0x12ab   :  { %v1064_v46 = vrot.slane %v6857_v44, %v6667_v29 }
0x12ad   :  { %1065 = vrot.lane.b32.xlu0 %v1064_v46, %s6516_s0 }
0x131f   :  { %v6863_v45 = vpop.permute.xlu0 %1065 }
0x1320   :  { %5658 = vmatmul.mubr.msk.f32.vlgmr.msra.gmra.mrb[8].mxu0 %vm245_vm2, %v6863_v45 }
0x1321   :  { %6080 = vmatpush3.bf16.msra.mxu0 %v6840_v32  ;;  %5675 = vmatprep.mubr.msk.f32.mxu0 %vm6512_vm0, %v6513_v9 }
0x1322   :  { %6081 = vmatprep.subr.bf16.mxu0 %v6511_v4 }
0x1325   :  { %6083 = vmatpush3.bf16.msra.mxu0 %v6850_v37 }
0x1326   :  { %6090 = vmatprep.subr.bf16.mxu0 %v6511_v4 }
0x1328   :  { %5676 = vmatmul.mubr.f32.vlgmr.msra.gmra.mrb[10].mxu0 %v6513_v9 }
0x1329   :  { %6092 = vmatpush3.bf16.msra.mxu0 %v6840_v32  ;;  %5697 = vmatprep.mubr.msk.f32.mxu0 %vm6512_vm0, %v6513_v9 }
0x132a   :  { %6093 = vmatprep.subr.bf16.mxu0 %v6511_v4 }
0x132d   :  { %6095 = vmatpush3.bf16.msra.mxu0 %v6850_v37 }
0x132e   :  { %6102 = vmatprep.subr.bf16.mxu0 %v6511_v4 }
0x13f3   :  { %v6882_v50 = vpop.f32.mrb[8].mxu0 }
0x13f4   :  { %v5659_v51 = vpop.f32.mrb[9].mxu0 }
0x13fb   :  { %v1376_v5 = vpop.f32.mrb[10].mxu0 }
0x13fc   :  { %v5677_v53 = vpop.f32.mrb[11].mxu0  ;;  %v1395_v55 = vadd.f32 %v6884_v52, %v1376_v5  ;;  %v1380_v61 = vadd.f32 %v1376_v5, %v1301_v60 }
0x13fe   :  { %v1403_v56 = vrot.slane %v1395_v55, %v6667_v29  ;;  %v5273_v62 = vmul.f32 -1.442695, %v1380_v61 }
0x1400   :  { %1404 = vrot.lane.b32.xlu0 %v1403_v56, %s6515_s28  ;;  %6329 = vpow2.f32 %v5273_v62 }
0x140a   :  { %v6330_v0 = vpop.eup %6329 }
0x140b   :  { %v1384_v1 = vadd.f32 1.0, %v6330_v0 }
0x140d   :  { %6331 = vrcp.f32 %v1384_v1 }
0x1417   :  { %v6332_v2 = vpop.eup %6331 }
0x1418   :  { %v1414_v12 = vsub.f32 1.0, %v6332_v2  ;;  %v1420_v15 = vmul.f32 0.0, %v6332_v2 }
0x1472   :  { %v1405_v3 = vpop.permute.xlu0 %1404 }
0x1473   :  { %v1407_v7 = vmul.f32 %v6332_v2, %v1405_v3 }
0x1475   :  { %1409 = vrot.lane.b32.xlu1 %v1407_v7, %s6515_s28 }
0x14e7   :  { %v1410_v8 = vpop.permute.xlu1 %1409 }
0x14e8   :  { %v1412_v10 = vadd.f32 %v1410_v8, %v1301_v60  ;;  %v1292_v60 = vrot.slane %v6895_v16, %v6667_v29 }
0x14ea   :  { %6333 = vtanh.f32 %v1412_v10  ;;  %v1300_v61 = vcombine.high %v1292_v60, %v1292_v60 }
0x14f4   :  { %v6334_v11 = vpop.eup %6333 }
0x14f5   :  { %1416 = vrot.lane.b32.xlu0 %v6334_v11, %s6516_s0 }
0x1567   :  { %v1417_v14 = vpop.permute.xlu0 %1416 }
0x1568   :  { %v1419_v19 = vmul.f32 %v1417_v14, %v1414_v12 }
0x156a   :  { %v6902_v34 = vadd.f32 %v1420_v15, %v1419_v19 }
0x156c   :  { %v1429_v20 = vrot.slane %v6902_v34, %v6667_v29 }
0x156e   :  { %1430 = vrot.lane.b32.xlu1 %v1429_v20, %s6516_s0 }
0x15e0   :  { %v1431_v21 = vpop.permute.xlu1 %1430 }
0x15e1   :  { %5687 = vmatmul.mubr.msk.f32.vlgmr.msra.gmra.mrb[10].mxu1 %vm245_vm2, %v1431_v21 }
0x15e2   :  { %6098 = vmatpush3.bf16.msra.mxu1 %v6840_v32  ;;  %5708 = vmatprep.mubr.msk.f32.mxu1 %vm6512_vm0, %v6513_v9 }
0x15e3   :  { %6099 = vmatprep.subr.bf16.mxu1 %v6511_v4 }
0x15e6   :  { %6101 = vmatpush3.bf16.msra.mxu1 %v6850_v37 }
0x15e7   :  { %6108 = vmatprep.subr.bf16.mxu1 %v6511_v4 }
0x16b4   :  { %v1500_v22 = vpop.f32.mrb[10].mxu1 }
0x16b5   :  { %v1511_v23 = vadd.f32 %v1500_v22, %v6884_v52  ;;  %v5688_v24 = vpop.f32.mrb[11].mxu1  ;;  %v1504_v25 = vadd.f32 %v1500_v22, %v1299_v59 }
0x16b7   :  { %v1519_v43 = vrot.slane %v1511_v23, %v6667_v29  ;;  %v5276_v27 = vmul.f32 -1.442695, %v1504_v25 }
0x16b9   :  { %1520 = vrot.lane.b32.xlu0 %v1519_v43, %s6515_s28  ;;  %6335 = vpow2.f32 %v5276_v27 }
0x16c3   :  { %v6336_v28 = vpop.eup %6335 }
0x16c4   :  { %v1508_v30 = vadd.f32 1.0, %v6336_v28 }
0x16c6   :  { %6337 = vrcp.f32 %v1508_v30 }
0x16d0   :  { %v6338_v31 = vpop.eup %6337 }
0x16d1   :  { %v1530_v41 = vsub.f32 1.0, %v6338_v31  ;;  %v1536_v46 = vmul.f32 %v6338_v31, %v6902_v34 }
0x172b   :  { %v1521_v33 = vpop.permute.xlu0 %1520 }
0x172c   :  { %v1523_v35 = vmul.f32 %v6338_v31, %v1521_v33 }
0x172e   :  { %1525 = vrot.lane.b32.xlu1 %v1523_v35, %s6515_s28 }
0x17a0   :  { %v1526_v38 = vpop.permute.xlu1 %1525 }
0x17a1   :  { %v1528_v39 = vadd.f32 %v1526_v38, %v1299_v59 }
0x17a3   :  { %6339 = vtanh.f32 %v1528_v39 }
0x17ad   :  { %v6340_v40 = vpop.eup %6339 }
0x17ae   :  { %1532 = vrot.lane.b32.xlu0 %v6340_v40, %s6516_s0 }
0x1820   :  { %v1533_v42 = vpop.permute.xlu0 %1532 }
0x1821   :  { %v1535_v48 = vmul.f32 %v1533_v42, %v1530_v41 }
0x1823   :  { %v6920_v51 = vadd.f32 %v1536_v46, %v1535_v48 }
0x1825   :  { %v1545_v5 = vrot.slane %v6920_v51, %v6667_v29 }
0x1827   :  { %1546 = vrot.lane.b32.xlu1 %v1545_v5, %s6516_s0 }
0x1899   :  { %v1547_v53 = vpop.permute.xlu1 %1546 }
0x189a   :  { %5698 = vmatmul.mubr.msk.f32.vlgmr.msra.gmra.mrb[12].mxu0 %vm245_vm2, %v1547_v53 }
0x189b   :  { %6104 = vmatpush3.bf16.msra.mxu0 %v6840_v32  ;;  %5719 = vmatprep.mubr.msk.f32.mxu0 %vm6512_vm0, %v6513_v9 }
0x189c   :  { %6105 = vmatprep.subr.bf16.mxu0 %v6511_v4 }
0x189f   :  { %6107 = vmatpush3.bf16.msra.mxu0 %v6850_v37 }
0x18a0   :  { %6114 = vmatprep.subr.bf16.mxu0 %v6511_v4 }
0x196d   :  { %v1616_v55 = vpop.f32.mrb[12].mxu0 }
0x196e   :  { %v1627_v56 = vadd.f32 %v1616_v55, %v6884_v52  ;;  %v5699_v58 = vpop.f32.mrb[13].mxu0  ;;  %v1620_v62 = vadd.f32 %v1616_v55, %v1300_v61 }
0x1970   :  { %v1635_v59 = vrot.slane %v1627_v56, %v6667_v29  ;;  %v5278_v0 = vmul.f32 -1.442695, %v1620_v62  ;;  %v6974_v62 = vadd.f32 %v6892_v57, %v6880_v49 }
0x1972   :  { %1636 = vrot.lane.b32.xlu0 %v1635_v59, %s6515_s28  ;;  %6341 = vpow2.f32 %v5278_v0  ;;  %v1268_v0 = vcombine.high %v6974_v62, %v6974_v62 }
0x197c   :  { %v6342_v1 = vpop.eup %6341 }
0x197d   :  { %v1624_v2 = vadd.f32 1.0, %v6342_v1  ;;  %v1282_v1 = vrot.slane %v1268_v0, %v6667_v29 }
0x197f   :  { %6343 = vrcp.f32 %v1624_v2  ;;  %v1284_v2 = vcombine.high %v1282_v1, %v1282_v1 }
0x1989   :  { %v6344_v3 = vpop.eup %6343 }
0x198a   :  { %v1646_v14 = vsub.f32 1.0, %v6344_v3  ;;  %v1652_v15 = vmul.f32 %v6344_v3, %v6920_v51 }
0x19e4   :  { %v1637_v7 = vpop.permute.xlu0 %1636 }
0x19e5   :  { %v1639_v8 = vmul.f32 %v6344_v3, %v1637_v7 }
0x19e7   :  { %1641 = vrot.lane.b32.xlu1 %v1639_v8, %s6515_s28 }
0x1a59   :  { %v1642_v10 = vpop.permute.xlu1 %1641 }
0x1a5a   :  { %v1644_v11 = vadd.f32 %v1642_v10, %v1300_v61 }
0x1a5c   :  { %6345 = vtanh.f32 %v1644_v11 }
0x1a66   :  { %v6346_v12 = vpop.eup %6345 }
0x1a67   :  { %1648 = vrot.lane.b32.xlu0 %v6346_v12, %s6516_s0 }
0x1ad9   :  { %v1649_v16 = vpop.permute.xlu0 %1648 }
0x1ada   :  { %v1651_v19 = vmul.f32 %v1649_v16, %v1646_v14 }
0x1adc   :  { %v6940_v20 = vadd.f32 %v1652_v15, %v1651_v19 }
0x1ade   :  { %v1661_v21 = vrot.slane %v6940_v20, %v6667_v29 }
0x1ae0   :  { %1662 = vrot.lane.b32.xlu1 %v1661_v21, %s6516_s0 }
0x1b52   :  { %v1663_v22 = vpop.permute.xlu1 %1662 }
0x1b53   :  { %5709 = vmatmul.mubr.msk.f32.vlgmr.msra.gmra.mrb[12].mxu1 %vm245_vm2, %v1663_v22 }
0x1b54   :  { %6110 = vmatpush3.bf16.msra.mxu1 %v6840_v32  ;;  %5730 = vmatprep.mubr.msk.f32.mxu1 %vm6512_vm0, %v6513_v9 }
0x1b55   :  { %6111 = vmatprep.subr.bf16.mxu1 %v6511_v4 }
0x1b58   :  { %6113 = vmatpush3.bf16.msra.mxu1 %v6850_v37 }
0x1b59   :  { %6120 = vmatprep.subr.bf16.mxu1 %v6511_v4 }
0x1c26   :  { %v1732_v23 = vpop.f32.mrb[12].mxu1 }
0x1c27   :  { %v1743_v24 = vadd.f32 %v1732_v23, %v6884_v52  ;;  %v5710_v43 = vpop.f32.mrb[13].mxu1  ;;  %v1736_v27 = vadd.f32 %v1732_v23, %v1292_v60 }
0x1c29   :  { %v1751_v25 = vrot.slane %v1743_v24, %v6667_v29  ;;  %v5280_v28 = vmul.f32 -1.442695, %v1736_v27 }
0x1c2b   :  { %1752 = vrot.lane.b32.xlu0 %v1751_v25, %s6515_s28  ;;  %6347 = vpow2.f32 %v5280_v28 }
0x1c35   :  { %v6348_v30 = vpop.eup %6347 }
0x1c36   :  { %v1740_v31 = vadd.f32 1.0, %v6348_v30 }
0x1c38   :  { %6349 = vrcp.f32 %v1740_v31 }
0x1c42   :  { %v6350_v33 = vpop.eup %6349 }
0x1c43   :  { %v1762_v42 = vsub.f32 1.0, %v6350_v33  ;;  %v1768_v48 = vmul.f32 %v6350_v33, %v6940_v20 }
0x1c9d   :  { %v1753_v35 = vpop.permute.xlu0 %1752 }
0x1c9e   :  { %v1755_v38 = vmul.f32 %v6350_v33, %v1753_v35 }
0x1ca0   :  { %1757 = vrot.lane.b32.xlu1 %v1755_v38, %s6515_s28 }
0x1d12   :  { %v1758_v39 = vpop.permute.xlu1 %1757 }
0x1d13   :  { %v1760_v40 = vadd.f32 %v1758_v39, %v1292_v60 }
0x1d15   :  { %6351 = vtanh.f32 %v1760_v40 }
0x1d1f   :  { %v6352_v41 = vpop.eup %6351 }
0x1d20   :  { %1764 = vrot.lane.b32.xlu0 %v6352_v41, %s6516_s0 }
0x1d92   :  { %v1765_v46 = vpop.permute.xlu0 %1764 }
0x1d93   :  { %v1767_v5 = vmul.f32 %v1765_v46, %v1762_v42 }
0x1d95   :  { %v6958_v53 = vadd.f32 %v1768_v48, %v1767_v5 }
0x1d97   :  { %v1777_v55 = vrot.slane %v6958_v53, %v6667_v29 }
0x1d99   :  { %1778 = vrot.lane.b32.xlu1 %v1777_v55, %s6516_s0 }
0x1e0b   :  { %v1779_v56 = vpop.permute.xlu1 %1778 }
0x1e0c   :  { %5720 = vmatmul.mubr.msk.f32.vlgmr.msra.gmra.mrb[14].mxu0 %vm245_vm2, %v1779_v56 }
0x1e0d   :  { %6116 = vmatpush3.bf16.msra.mxu0 %v6840_v32  ;;  %5741 = vmatprep.mubr.msk.f32.mxu0 %vm6512_vm0, %v6513_v9 }
0x1e0e   :  { %6117 = vmatprep.subr.bf16.mxu0 %v6511_v4 }
0x1e11   :  { %6119 = vmatpush3.bf16.msra.mxu0 %v6850_v37 }
0x1edf   :  { %v1848_v58 = vpop.f32.mrb[14].mxu0 }
0x1ee0   :  { %v1859_v59 = vadd.f32 %v1848_v58, %v6884_v52  ;;  %v5721_v60 = vpop.f32.mrb[15].mxu0  ;;  %v1852_v3 = vadd.f32 %v1848_v58, %v1284_v2 }
0x1ee2   :  { %v1867_v61 = vrot.slane %v1859_v59, %v6667_v29  ;;  %v5282_v7 = vmul.f32 -1.442695, %v1852_v3 }
0x1ee4   :  { %1868 = vrot.lane.b32.xlu0 %v1867_v61, %s6515_s28  ;;  %6353 = vpow2.f32 %v5282_v7 }
0x1eee   :  { %v6354_v8 = vpop.eup %6353 }
0x1eef   :  { %v1856_v10 = vadd.f32 1.0, %v6354_v8 }
0x1ef1   :  { %6355 = vrcp.f32 %v1856_v10 }
0x1efb   :  { %v6356_v11 = vpop.eup %6355 }
0x1efc   :  { %v1878_v15 = vsub.f32 1.0, %v6356_v11  ;;  %v1884_v21 = vmul.f32 %v6356_v11, %v6958_v53 }
0x1f56   :  { %v1869_v12 = vpop.permute.xlu0 %1868 }
0x1f57   :  { %v1871_v14 = vmul.f32 %v6356_v11, %v1869_v12 }
0x1f59   :  { %1873 = vrot.lane.b32.xlu1 %v1871_v14, %s6515_s28 }
0x1fcb   :  { %v1874_v16 = vpop.permute.xlu1 %1873 }
0x1fcc   :  { %v1876_v49 = vadd.f32 %v1874_v16, %v1284_v2  ;;  %v7011_v2 = vrot.slane %v6974_v62, %v6667_v29  ;;  %v1146_v62 = vadd.f32 %v6882_v50, %v6698_v36 }
0x1fce   :  { %6357 = vtanh.f32 %v1876_v49  ;;  %v1283_v3 = vcombine.high %v7011_v2, %v7011_v2 }
0x1fd8   :  { %v6358_v57 = vpop.eup %6357 }
0x1fd9   :  { %1880 = vrot.lane.b32.xlu0 %v6358_v57, %s6516_s0 }
0x204b   :  { %v1881_v19 = vpop.permute.xlu0 %1880 }
0x204c   :  { %v1883_v22 = vmul.f32 %v1881_v19, %v1878_v15  ;;  %v1154_v19 = vrot.slane %v1146_v62, %v6667_v29 }
0x204e   :  { %v6982_v23 = vadd.f32 %v1884_v21, %v1883_v22  ;;  %v236_v21 = vcombine.high %v6817_v13, %v6817_v13 }
0x2050   :  { %v1893_v24 = vrot.slane %v6982_v23, %v6667_v29  ;;  %v1139_v22 = vadd.f32 %v6882_v50, %v236_v21 }
0x2052   :  { %1894 = vrot.lane.b32.xlu1 %v1893_v24, %s6516_s0  ;;  %v5261_v24 = vmul.f32 -1.442695, %v1139_v22 }
0x20c4   :  { %v1895_v43 = vpop.permute.xlu1 %1894 }
0x20c5   :  { %5731 = vmatmul.mubr.msk.f32.vlgmr.msra.gmra.mrb[14].mxu1 %vm245_vm2, %v1895_v43 }
0x20c6   :  { %6122 = vmatpush3.bf16.msra.mxu1 %v6840_v32  ;;  %5752 = vmatprep.mubr.msk.f32.mxu1 %vm6512_vm0, %v6513_v9 }
0x20c7   :  { %6123 = vmatprep.subr.bf16.mxu1 %v6511_v4 }
0x20ca   :  { %6125 = vmatpush3.bf16.msra.mxu1 %v6850_v37 }
0x20cb   :  { %6142 = vmatprep.subr.bf16.mxu1 %v6511_v4 }
0x2198   :  { %v1964_v25 = vpop.f32.mrb[14].mxu1 }
0x2199   :  { %v1975_v27 = vadd.f32 %v1964_v25, %v6884_v52  ;;  %v5732_v28 = vpop.f32.mrb[15].mxu1  ;;  %v1968_v31 = vadd.f32 %v1964_v25, %v1282_v1 }
0x219b   :  { %v1983_v30 = vrot.slane %v1975_v27, %v6667_v29  ;;  %v5284_v33 = vmul.f32 -1.442695, %v1968_v31 }
0x219d   :  { %1984 = vrot.lane.b32.xlu0 %v1983_v30, %s6515_s28  ;;  %6359 = vpow2.f32 %v5284_v33 }
0x21a7   :  { %v6360_v32 = vpop.eup %6359 }
0x21a8   :  { %v1972_v35 = vadd.f32 1.0, %v6360_v32 }
0x21aa   :  { %6361 = vrcp.f32 %v1972_v35 }
0x21b4   :  { %v6362_v38 = vpop.eup %6361 }
0x21b5   :  { %v1994_v46 = vsub.f32 1.0, %v6362_v38  ;;  %v2000_v5 = vmul.f32 %v6362_v38, %v6982_v23 }
0x220f   :  { %v1985_v39 = vpop.permute.xlu0 %1984 }
0x2210   :  { %v1987_v40 = vmul.f32 %v6362_v38, %v1985_v39 }
0x2212   :  { %1989 = vrot.lane.b32.xlu1 %v1987_v40, %s6515_s28 }
0x2284   :  { %v1990_v37 = vpop.permute.xlu1 %1989 }
0x2285   :  { %v1992_v41 = vadd.f32 %v1990_v37, %v1282_v1 }
0x2287   :  { %6363 = vtanh.f32 %v1992_v41 }
0x2291   :  { %v6364_v42 = vpop.eup %6363 }
0x2292   :  { %1996 = vrot.lane.b32.xlu0 %v6364_v42, %s6516_s0 }
0x2304   :  { %v1997_v48 = vpop.permute.xlu0 %1996 }
0x2305   :  { %v1999_v55 = vmul.f32 %v1997_v48, %v1994_v46 }
0x2307   :  { %v7000_v56 = vadd.f32 %v2000_v5, %v1999_v55 }
0x2309   :  { %v2009_v58 = vrot.slane %v7000_v56, %v6667_v29 }
0x230b   :  { %2010 = vrot.lane.b32.xlu1 %v2009_v58, %s6516_s0 }
0x237d   :  { %v2011_v59 = vpop.permute.xlu1 %2010 }
0x237e   :  { %5742 = vmatmul.mubr.msk.f32.vlgmr.msra.gmra.mrb[16].mxu0 %vm245_vm2, %v2011_v59 }
0x2451   :  { %v2080_v60 = vpop.f32.mrb[16].mxu0 }
0x2452   :  { %v2091_v61 = vadd.f32 %v2080_v60, %v6884_v52  ;;  %v5743_v0 = vpop.f32.mrb[17].mxu0  ;;  %v2084_v7 = vadd.f32 %v2080_v60, %v1283_v3 }
0x2454   :  { %v2099_v1 = vrot.slane %v2091_v61, %v6667_v29  ;;  %v5286_v8 = vmul.f32 -1.442695, %v2084_v7 }
0x2456   :  { %2100 = vrot.lane.b32.xlu0 %v2099_v1, %s6515_s28  ;;  %6365 = vpow2.f32 %v5286_v8 }
0x2460   :  { %v6366_v10 = vpop.eup %6365 }
0x2461   :  { %v2088_v11 = vadd.f32 1.0, %v6366_v10  ;;  %v2269_v10 = vld [vmem:[%s7650_s6 + $0x8] sm:$0xff] }
0x2463   :  { %6367 = vrcp.f32 %v2088_v11  ;;  %v2270_v11 = vld [vmem:[%s7650_s6 + $0x10] sm:$0xff] }
0x246d   :  { %v6368_v12 = vpop.eup %6367 }
0x246e   :  { %v2110_v27 = vsub.f32 1.0, %v6368_v12  ;;  %v2116_v36 = vmul.f32 %v6368_v12, %v7000_v56 }
0x24c8   :  { %v2101_v14 = vpop.permute.xlu0 %2100 }
0x24c9   :  { %v2103_v16 = vmul.f32 %v6368_v12, %v2101_v14  ;;  %v2271_v14 = vld [vmem:[%s7650_s6 + $0x18] sm:$0xff] }
0x24ca   :  { %v7064_v62 = vpack.c.bf16 %v2271_v14, %v2270_v11 }
0x24cb   :  { %2105 = vrot.lane.b32.xlu1 %v2103_v16, %s6515_s28  ;;  %v2260_v16 = vld [vmem:[%s7649_s5] sm:$0xff] }
0x253d   :  { %v2106_v49 = vpop.permute.xlu1 %2105 }
0x253e   :  { %v2108_v57 = vadd.f32 %v2106_v49, %v1283_v3  ;;  %v2261_v49 = vld [vmem:[%s7649_s5 + $0x8] sm:$0xff] }
0x2540   :  { %6369 = vtanh.f32 %v2108_v57  ;;  %v6126_v57 = vpack.c.bf16 %v2261_v49, %v2260_v16 }
0x2541   :  { %6371 = vpow2.f32 %v5261_v24 }
0x2542   :  { %6127 = vmatprep.subr.bf16.mxu0 %v6126_v57 }
0x2543   :  { %6129 = vmatpush3.bf16.msra.mxu0 %v6126_v57 }
0x254a   :  { %v6370_v15 = vpop.eup %6369 }
0x254b   :  { %2112 = vrot.lane.b32.xlu0 %v6370_v15, %s6516_s0  ;;  %v6372_v43 = vpop.eup %6371  ;;  %v2262_v15 = vld [vmem:[%s7649_s5 + $0x10] sm:$0xff] }
0x254c   :  { %v1143_v25 = vadd.f32 1.0, %v6372_v43  ;;  %v2264_v43 = vld [vmem:[%s7649_s5 + $0x20] sm:$0xff] }
0x254e   :  { %6373 = vrcp.f32 %v1143_v25  ;;  %v2265_v25 = vld [vmem:[%s7649_s5 + $0x28] sm:$0xff] }
0x254f   :  { %1155 = vrot.lane.b32.xlu0 %v1154_v19, %s6515_s28  ;;  %v2263_v19 = vld [vmem:[%s7649_s5 + $0x18] sm:$0xff] }
0x2558   :  { %v6374_v33 = vpop.eup %6373 }
0x2559   :  { %v1165_v37 = vsub.f32 1.0, %v6374_v33  ;;  %v1171_v42 = vmul.f32 %v6374_v33, %v6857_v44 }
0x25bd   :  { %v2113_v28 = vpop.permute.xlu0 %2112 }
0x25be   :  { %v2115_v30 = vmul.f32 %v2113_v28, %v2110_v27  ;;  %v6134_v27 = vpack.c.bf16 %v2265_v25, %v2264_v43  ;;  %v2266_v28 = vld [vmem:[%s7649_s5 + $0x30] sm:$0xff] }
0x25c0   :  { %v7025_v31 = vadd.f32 %v2116_v36, %v2115_v30 }
0x25c1   :  { %v1156_v32 = vpop.permute.xlu0 %1155 }
0x25c2   :  { %v1158_v35 = vmul.f32 %v6374_v33, %v1156_v32  ;;  %v2125_v13 = vrot.slane %v7025_v31, %v6667_v29  ;;  %v5293_v33 = vld [vmem:[%s7652_s8] ss:$0 sm:$0xff] }
0x25c4   :  { %2126 = vrot.lane.b32.xlu1 %v2125_v13, %s6516_s0  ;;  %1160 = vrot.lane.b32.xlu0 %v1158_v35, %s6515_s28 }
0x2636   :  { %v2127_v50 = vpop.permute.xlu1 %2126  ;;  %v1161_v38 = vpop.permute.xlu0 %1160 }
0x2637   :  { %v1163_v39 = vadd.f32 %v1161_v38, %v236_v21  ;;  %5753 = vmatmul.mubr.msk.f32.vlgmr.msra.gmra.mrb[16].mxu1 %vm245_vm2, %v2127_v50  ;;  %v6130_v21 = vpack.c.bf16 %v2263_v19, %v2262_v15 }
0x2638   :  { %5782 = vmatprep.mubr.msk.f32.mxu1 %vm6512_vm0, %v6513_v9 }
0x2639   :  { %6375 = vtanh.f32 %v1163_v39  ;;  %6131 = vmatprep.subr.bf16.mxu0 %v6130_v21 }
0x263a   :  { %6133 = vmatpush3.bf16.msra.mxu0 %v6130_v21 }
0x263b   :  { %6135 = vmatprep.subr.bf16.mxu0 %v6134_v27 }
0x263e   :  { %6137 = vmatpush3.bf16.msra.mxu0 %v6134_v27 }
0x2643   :  { %v6376_v40 = vpop.eup %6375 }
0x2644   :  { %1167 = vrot.lane.b32.xlu0 %v6376_v40, %s6516_s0  ;;  %v2254_v40 = vsel %vm245_vm2, %v6753_v54, %v7000_v56  ;;  %v2257_v54 = vsel %vm245_vm2, %v6805_v6, %v6940_v20 }
0x26b6   :  { %v1168_v41 = vpop.permute.xlu0 %1167 }
0x26b7   :  { %v1170_v46 = vmul.f32 %v1168_v41, %v1165_v37 }
0x26b9   :  { %v1172_v48 = vadd.f32 %v1171_v42, %v1170_v46  ;;  %v2256_v42 = vsel %vm245_vm2, %v6788_v47, %v6958_v53  ;;  %v2258_v46 = vsel %vm245_vm2, %v6863_v45, %v6920_v51  ;;  %v2253_v47 = vsel %vm245_vm2, %v6733_v26, %v7025_v31 }
0x26bb   :  { %v2241_v5 = vrot.slane %v1172_v48, %v6667_v29 }
0x26bd   :  { %2242 = vrot.lane.b32.xlu0 %v2241_v5, %s6516_s0 }
0x270a   :  { %v2196_v55 = vpop.f32.mrb[16].mxu1 }
0x270b   :  { %v2207_v58 = vadd.f32 %v2196_v55, %v6884_v52  ;;  %v5754_v59 = vpop.f32.mrb[17].mxu1  ;;  %v2200_v61 = vadd.f32 %v2196_v55, %v7011_v2  ;;  %v2268_v52 = vld [vmem:[%s7650_s6] sm:$0xff] }
0x270c   :  { %v7052_v12 = vpack.c.bf16 %v2269_v10, %v2268_v52 }
0x270d   :  { %v2215_v60 = vrot.slane %v2207_v58, %v6667_v29  ;;  %v5288_v0 = vmul.f32 -1.442695, %v2200_v61  ;;  %v2305_v58 = vcombine.low %v2256_v42, %v2257_v54 }
0x270e   :  { %6144 = vmatpush3.bf16.msra.mxu1 %v7052_v12 }
0x270f   :  { %2216 = vrot.lane.b32.xlu1 %v2215_v60, %s6515_s28  ;;  %6377 = vpow2.f32 %v5288_v0  ;;  %6145 = vmatprep.subr.bf16.mxu1 %v6511_v4  ;;  %v2313_v59 = vrot.slane %v2305_v58, %v6667_v29 }
0x2712   :  { %6147 = vmatpush3.bf16.msra.mxu1 %v7064_v62 }
0x2713   :  { %6148 = vmatprep.subr.bf16.mxu1 %v6511_v4 }
0x2715   :  { %5783 = vmatmul.mubr.f32.vlgmr.msra.gmra.mrb[18].mxu1 %v6513_v9 }
0x2716   :  { %6150 = vmatpush3.bf16.msra.mxu1 %v7052_v12  ;;  %5793 = vmatprep.mubr.msk.f32.mxu1 %vm6512_vm0, %v6513_v9 }
0x2717   :  { %6151 = vmatprep.subr.bf16.mxu1 %v6511_v4 }
0x2719   :  { %v6378_v1 = vpop.eup %6377 }
0x271a   :  { %v2204_v44 = vadd.f32 1.0, %v6378_v1  ;;  %6153 = vmatpush3.bf16.msra.mxu1 %v7064_v62 }
0x271b   :  { %6160 = vmatprep.subr.bf16.mxu1 %v6511_v4 }
0x271c   :  { %6379 = vrcp.f32 %v2204_v44 }
0x2726   :  { %v6380_v3 = vpop.eup %6379 }
0x2727   :  { %v2226_v50 = vsub.f32 1.0, %v6380_v3  ;;  %v2232_v37 = vmul.f32 %v6380_v3, %v7025_v31 }
0x272f   :  { %v2243_v13 = vpop.permute.xlu0 %2242 }
0x2730   :  { %v2259_v38 = vsel %vm245_vm2, %v2243_v13, %v6902_v34  ;;  %v2255_v34 = vsel %vm245_vm2, %v6770_v17, %v6982_v23 }
0x2731   :  { %v2306_v48 = vcombine.low %v2258_v46, %v2259_v38  ;;  %v2289_v56 = vcombine.low %v2254_v40, %v2255_v34 }
0x2733   :  { %v2320_v53 = vrot.slane %v2306_v48, %v6667_v29  ;;  %v2303_v20 = vrot.slane %v2289_v56, %v6667_v29 }
0x2735   :  { %v7135_v31 = vcombine.low %v2313_v59, %v2320_v53 }
0x2781   :  { %v2217_v7 = vpop.permute.xlu1 %2216 }
0x2782   :  { %v2219_v8 = vmul.f32 %v6380_v3, %v2217_v7 }
0x2784   :  { %2221 = vrot.lane.b32.xlu1 %v2219_v8, %s6515_s28 }
0x27e8   :  { %v2512_v32 = vpop.f32.mrb[18].mxu1 }
0x27e9   :  { %v5784_v35 = vpop.f32.mrb[19].mxu1 }
0x27f6   :  { %v2222_v22 = vpop.permute.xlu1 %2221 }
0x27f7   :  { %v2224_v24 = vadd.f32 %v2222_v22, %v7011_v2  ;;  %v2267_v2 = vld [vmem:[%s7649_s5 + $0x38] sm:$0xff] }
0x27f8   :  { %v6138_v36 = vpack.c.bf16 %v2267_v2, %v2266_v28 }
0x27f9   :  { %6381 = vtanh.f32 %v2224_v24 }
0x27fa   :  { %6139 = vmatprep.subr.bf16.mxu0 %v6138_v36 }
0x27fb   :  { %6141 = vmatpush3.bf16.msra.mxu0 %v6138_v36 }
0x27fc   :  { %6154 = vmatprep.subr.bf16.mxu0 %v6511_v4 }
0x2803   :  { %v6382_v30 = vpop.eup %6381 }
0x2804   :  { %2228 = vrot.lane.b32.xlu1 %v6382_v30, %s6516_s0 }
0x2808   :  { %2528 = vrot.lane.b32.xlu1 %v5293_v33, %s6515_s28 }
0x2876   :  { %v2229_v39 = vpop.permute.xlu1 %2228 }
0x2877   :  { %v2231_v41 = vmul.f32 %v2229_v39, %v2226_v50 }
0x2879   :  { %v2233_v5 = vadd.f32 %v2232_v37, %v2231_v41 }
0x287a   :  { %v7119_v55 = vpop.permute.xlu1 %2528 }
0x287b   :  { %v2252_v45 = vsel %vm245_vm2, %v6716_v63, %v2233_v5  ;;  %v2531_v51 = vadd.f32 %v7119_v55, %v2512_v32  ;;  %v5289_v63 = vld [vmem:[%s7651_s7] ss:$0 sm:$0xff] }
0x287c   :  { %v2288_v17 = vcombine.low %v2252_v45, %v2253_v47 }
0x287d   :  { %v2539_v23 = vrot.slane %v2531_v51, %v6667_v29 }
0x287e   :  { %v2296_v6 = vrot.slane %v2288_v17, %v6667_v29 }
0x287f   :  { %2540 = vrot.lane.b32.xlu0 %v2539_v23, %s6515_s28 }
0x2880   :  { %v7133_v26 = vcombine.low %v2296_v6, %v2303_v20 }
0x2882   :  { %5771 = vmatprep.mubr.msk.f32.mxu0 %vm2322_vm3, %v7133_v26 }
0x2883   :  { %5772 = vmatmul.mubr.msk.f32.vlgmr.msra.gmra.mrb[18].mxu0 %vm2322_vm3, %v7135_v31 }
0x2884   :  { %6156 = vmatpush3.bf16.msra.mxu0 %v7052_v12  ;;  %5804 = vmatprep.mubr.msk.f32.mxu0 %vm6512_vm0, %v6513_v9 }
0x2885   :  { %6157 = vmatprep.subr.bf16.mxu0 %v6511_v4 }
0x2888   :  { %6159 = vmatpush3.bf16.msra.mxu0 %v7064_v62 }
0x2889   :  { %6166 = vmatprep.subr.bf16.mxu0 %v6511_v4 }
0x28f1   :  { %v2541_v10 = vpop.permute.xlu0 %2540 }
0x2956   :  { %v5773_v60 = vpop.f32.mrb[18].mxu0 }
0x2957   :  { %v7150_v61 = vadd.f32 %v5773_v60, %v5289_v63  ;;  %v2393_v0 = vpop.f32.mrb[19].mxu0 }
0x2958   :  { %v7152_v1 = vadd.f32 %v5289_v63, %v2393_v0 }
0x295a   :  { %v2411_v44 = vrot.slane %v7152_v1, %v6667_v29  ;;  %v2404_v17 = vcombine.high %v7152_v1, %v7152_v1 }
0x295c   :  { %v2516_v3 = vadd.f32 %v2512_v32, %v2411_v44  ;;  %v2419_v30 = vcombine.high %v2411_v44, %v2411_v44  ;;  %v2418_v53 = vrot.slane %v2404_v17, %v6667_v29 }
0x295e   :  { %v5292_v7 = vmul.f32 -1.442695, %v2516_v3 }
0x2960   :  { %6383 = vpow2.f32 %v5292_v7 }
0x296a   :  { %v6384_v8 = vpop.eup %6383 }
0x296b   :  { %v2520_v52 = vadd.f32 1.0, %v6384_v8 }
0x296d   :  { %6385 = vrcp.f32 %v2520_v52 }
0x2977   :  { %v6386_v11 = vpop.eup %6385 }
0x2978   :  { %v2543_v14 = vmul.f32 %v6386_v11, %v2541_v10  ;;  %v2550_v15 = vsub.f32 1.0, %v6386_v11  ;;  %v2556_v21 = vmul.f32 0.0, %v6386_v11 }
0x297a   :  { %2545 = vrot.lane.b32.xlu1 %v2543_v14, %s6515_s28 }
0x29ec   :  { %v2546_v16 = vpop.permute.xlu1 %2545 }
0x29ed   :  { %v2548_v49 = vadd.f32 %v2546_v16, %v2411_v44 }
0x29ef   :  { %6387 = vtanh.f32 %v2548_v49 }
0x29f9   :  { %v6388_v57 = vpop.eup %6387 }
0x29fa   :  { %2552 = vrot.lane.b32.xlu0 %v6388_v57, %s6516_s0 }
0x2a6c   :  { %v2553_v19 = vpop.permute.xlu0 %2552 }
0x2a6d   :  { %v2555_v22 = vmul.f32 %v2553_v19, %v2550_v15 }
0x2a6f   :  { %v2557_v24 = vadd.f32 %v2556_v21, %v2555_v22  ;;  %v2420_v21 = vcombine.high %v2418_v53, %v2418_v53 }
0x2a71   :  { %v2565_v43 = vrot.slane %v2557_v24, %v6667_v29 }
0x2a73   :  { %2566 = vrot.lane.b32.xlu1 %v2565_v43, %s6516_s0 }
0x2ae5   :  { %v7160_v25 = vpop.permute.xlu1 %2566 }
0x2ae6   :  { %5794 = vmatmul.mubr.msk.f32.vlgmr.msra.gmra.mrb[20].mxu1 %vm245_vm2, %v7160_v25 }
0x2ae7   :  { %6162 = vmatpush3.bf16.msra.mxu1 %v7052_v12  ;;  %5815 = vmatprep.mubr.msk.f32.mxu1 %vm6512_vm0, %v6513_v9 }
0x2ae8   :  { %6163 = vmatprep.subr.bf16.mxu1 %v6511_v4 }
0x2aeb   :  { %6165 = vmatpush3.bf16.msra.mxu1 %v7064_v62 }
0x2aec   :  { %6172 = vmatprep.subr.bf16.mxu1 %v6511_v4 }
0x2bb9   :  { %v2636_v27 = vpop.f32.mrb[20].mxu1 }
0x2bba   :  { %v2647_v28 = vadd.f32 %v2636_v27, %v7119_v55  ;;  %v5795_v2 = vpop.f32.mrb[21].mxu1  ;;  %v2640_v33 = vadd.f32 %v2636_v27, %v2419_v30 }
0x2bbc   :  { %v2655_v36 = vrot.slane %v2647_v28, %v6667_v29  ;;  %v5295_v32 = vmul.f32 -1.442695, %v2640_v33 }
0x2bbe   :  { %2656 = vrot.lane.b32.xlu0 %v2655_v36, %s6515_s28  ;;  %6389 = vpow2.f32 %v5295_v32 }
0x2bc8   :  { %v6390_v35 = vpop.eup %6389 }
0x2bc9   :  { %v2644_v13 = vadd.f32 1.0, %v6390_v35 }
0x2bcb   :  { %6391 = vrcp.f32 %v2644_v13 }
0x2bd5   :  { %v6392_v50 = vpop.eup %6391 }
0x2bd6   :  { %v2666_v42 = vsub.f32 1.0, %v6392_v50  ;;  %v2672_v34 = vmul.f32 %v6392_v50, %v2557_v24 }
0x2c30   :  { %v2657_v38 = vpop.permute.xlu0 %2656 }
0x2c31   :  { %v2659_v39 = vmul.f32 %v6392_v50, %v2657_v38 }
0x2c33   :  { %2661 = vrot.lane.b32.xlu1 %v2659_v39, %s6515_s28 }
0x2ca5   :  { %v2662_v40 = vpop.permute.xlu1 %2661 }
0x2ca6   :  { %v2664_v37 = vadd.f32 %v2662_v40, %v2419_v30 }
0x2ca8   :  { %6393 = vtanh.f32 %v2664_v37 }
0x2cb2   :  { %v6394_v41 = vpop.eup %6393 }
0x2cb3   :  { %2668 = vrot.lane.b32.xlu0 %v6394_v41, %s6516_s0 }
0x2d25   :  { %v2669_v46 = vpop.permute.xlu0 %2668 }
0x2d26   :  { %v2671_v48 = vmul.f32 %v2669_v46, %v2666_v42 }
0x2d28   :  { %v2673_v5 = vadd.f32 %v2672_v34, %v2671_v48  ;;  %v2428_v48 = vrot.slane %v7150_v61, %v6667_v29 }
0x2d2a   :  { %v2681_v54 = vrot.slane %v2673_v5, %v6667_v29 }
0x2d2c   :  { %2682 = vrot.lane.b32.xlu1 %v2681_v54, %s6516_s0 }
0x2d9e   :  { %v7177_v56 = vpop.permute.xlu1 %2682 }
0x2d9f   :  { %5805 = vmatmul.mubr.msk.f32.vlgmr.msra.gmra.mrb[20].mxu0 %vm245_vm2, %v7177_v56 }
0x2da0   :  { %6168 = vmatpush3.bf16.msra.mxu0 %v7052_v12  ;;  %5826 = vmatprep.mubr.msk.f32.mxu0 %vm6512_vm0, %v6513_v9 }
0x2da1   :  { %6169 = vmatprep.subr.bf16.mxu0 %v6511_v4 }
0x2da4   :  { %6171 = vmatpush3.bf16.msra.mxu0 %v7064_v62 }
0x2da5   :  { %6178 = vmatprep.subr.bf16.mxu0 %v6511_v4 }
0x2e72   :  { %v2752_v58 = vpop.f32.mrb[20].mxu0 }
0x2e73   :  { %v2763_v47 = vadd.f32 %v2752_v58, %v7119_v55  ;;  %v5806_v45 = vpop.f32.mrb[21].mxu0  ;;  %v2756_v23 = vadd.f32 %v2752_v58, %v2418_v53 }
0x2e75   :  { %v2771_v51 = vrot.slane %v2763_v47, %v6667_v29  ;;  %v5297_v6 = vmul.f32 -1.442695, %v2756_v23 }
0x2e77   :  { %2772 = vrot.lane.b32.xlu0 %v2771_v51, %s6515_s28  ;;  %6395 = vpow2.f32 %v5297_v6 }
0x2e81   :  { %v6396_v20 = vpop.eup %6395 }
0x2e82   :  { %v2760_v59 = vadd.f32 1.0, %v6396_v20 }
0x2e84   :  { %6397 = vrcp.f32 %v2760_v59 }
0x2e8e   :  { %v6398_v63 = vpop.eup %6397 }
0x2e8f   :  { %v2782_v1 = vsub.f32 1.0, %v6398_v63  ;;  %v2788_v52 = vmul.f32 %v6398_v63, %v2673_v5 }
0x2ee9   :  { %v2773_v60 = vpop.permute.xlu0 %2772 }
0x2eea   :  { %v2775_v0 = vmul.f32 %v6398_v63, %v2773_v60 }
0x2eec   :  { %2777 = vrot.lane.b32.xlu1 %v2775_v0, %s6515_s28 }
0x2f5e   :  { %v2778_v44 = vpop.permute.xlu1 %2777 }
0x2f5f   :  { %v2780_v3 = vadd.f32 %v2778_v44, %v2418_v53 }
0x2f61   :  { %6399 = vtanh.f32 %v2780_v3 }
0x2f6b   :  { %v6400_v7 = vpop.eup %6399 }
0x2f6c   :  { %2784 = vrot.lane.b32.xlu0 %v6400_v7, %s6516_s0 }
0x2fde   :  { %v2785_v8 = vpop.permute.xlu0 %2784 }
0x2fdf   :  { %v2787_v10 = vmul.f32 %v2785_v8, %v2782_v1 }
0x2fe1   :  { %v2789_v11 = vadd.f32 %v2788_v52, %v2787_v10  ;;  %v2436_v10 = vcombine.high %v2428_v48, %v2428_v48 }
0x2fe3   :  { %v2797_v14 = vrot.slane %v2789_v11, %v6667_v29 }
0x2fe5   :  { %2798 = vrot.lane.b32.xlu1 %v2797_v14, %s6516_s0 }
0x3057   :  { %v7197_v16 = vpop.permute.xlu1 %2798 }
0x3058   :  { %5816 = vmatmul.mubr.msk.f32.vlgmr.msra.gmra.mrb[22].mxu1 %vm245_vm2, %v7197_v16 }
0x3059   :  { %6174 = vmatpush3.bf16.msra.mxu1 %v7052_v12  ;;  %5837 = vmatprep.mubr.msk.f32.mxu1 %vm6512_vm0, %v6513_v9 }
0x305a   :  { %6175 = vmatprep.subr.bf16.mxu1 %v6511_v4 }
0x305d   :  { %6177 = vmatpush3.bf16.msra.mxu1 %v7064_v62 }
0x305e   :  { %6184 = vmatprep.subr.bf16.mxu1 %v6511_v4 }
0x312b   :  { %v2868_v49 = vpop.f32.mrb[22].mxu1 }
0x312c   :  { %v2879_v57 = vadd.f32 %v2868_v49, %v7119_v55  ;;  %v5817_v15 = vpop.f32.mrb[23].mxu1  ;;  %v2872_v22 = vadd.f32 %v2868_v49, %v2420_v21 }
0x312e   :  { %v2887_v19 = vrot.slane %v2879_v57, %v6667_v29  ;;  %v5299_v24 = vmul.f32 -1.442695, %v2872_v22  ;;  %v5308_v22 = vld [vmem:[%s7649_s5 + $0x40] sm:$0xff] }
0x3130   :  { %2888 = vrot.lane.b32.xlu0 %v2887_v19, %s6515_s28  ;;  %6401 = vpow2.f32 %v5299_v24  ;;  %v5309_v24 = vld [vmem:[%s7649_s5 + $0x48] sm:$0xff] }
0x313a   :  { %v6402_v43 = vpop.eup %6401 }
0x313b   :  { %v2876_v27 = vadd.f32 1.0, %v6402_v43  ;;  %v6190_v43 = vpack.c.bf16 %v5309_v24, %v5308_v22 }
0x313d   :  { %6403 = vrcp.f32 %v2876_v27 }
0x3147   :  { %v6404_v28 = vpop.eup %6403 }
0x3148   :  { %v2898_v35 = vsub.f32 1.0, %v6404_v28  ;;  %v2904_v50 = vmul.f32 %v6404_v28, %v2789_v11 }
0x31a2   :  { %v2889_v2 = vpop.permute.xlu0 %2888 }
0x31a3   :  { %v2891_v36 = vmul.f32 %v6404_v28, %v2889_v2 }
0x31a5   :  { %2893 = vrot.lane.b32.xlu1 %v2891_v36, %s6515_s28 }
0x3217   :  { %v2894_v30 = vpop.permute.xlu1 %2893 }
0x3218   :  { %v2896_v33 = vadd.f32 %v2894_v30, %v2420_v21 }
0x321a   :  { %6405 = vtanh.f32 %v2896_v33 }
0x3224   :  { %v6406_v32 = vpop.eup %6405 }
0x3225   :  { %2900 = vrot.lane.b32.xlu0 %v6406_v32, %s6516_s0 }
0x3297   :  { %v2901_v13 = vpop.permute.xlu0 %2900 }
0x3298   :  { %v2903_v38 = vmul.f32 %v2901_v13, %v2898_v35  ;;  %v5310_v35 = vld [vmem:[%s7649_s5 + $0x50] sm:$0xff]  ;;  %v5311_v13 = vld [vmem:[%s7649_s5 + $0x58] sm:$0xff] }
0x329a   :  { %v2905_v39 = vadd.f32 %v2904_v50, %v2903_v38  ;;  %v6194_v50 = vpack.c.bf16 %v5311_v13, %v5310_v35 }
0x329c   :  { %v2913_v40 = vrot.slane %v2905_v39, %v6667_v29 }
0x329e   :  { %2914 = vrot.lane.b32.xlu1 %v2913_v40, %s6516_s0  ;;  %v5313_v40 = vld [vmem:[%s7649_s5 + $0x68] sm:$0xff] }
0x3310   :  { %v7214_v37 = vpop.permute.xlu1 %2914 }
0x3311   :  { %5827 = vmatmul.mubr.msk.f32.vlgmr.msra.gmra.mrb[22].mxu0 %vm245_vm2, %v7214_v37 }
0x3312   :  { %6180 = vmatpush3.bf16.msra.mxu0 %v7052_v12  ;;  %5848 = vmatprep.mubr.msk.f32.mxu0 %vm6512_vm0, %v6513_v9 }
0x3313   :  { %6181 = vmatprep.subr.bf16.mxu0 %v6511_v4 }
0x3316   :  { %6183 = vmatpush3.bf16.msra.mxu0 %v7064_v62 }
0x3317   :  { %6191 = vmatprep.subr.bf16.mxu0 %v6190_v43 }
0x33e4   :  { %v2984_v41 = vpop.f32.mrb[22].mxu0 }
0x33e5   :  { %v2995_v42 = vadd.f32 %v2984_v41, %v7119_v55  ;;  %v5828_v46 = vpop.f32.mrb[23].mxu0  ;;  %v2988_v5 = vadd.f32 %v2984_v41, %v2428_v48 }
0x33e6   :  { %v5315_v46 = vld [vmem:[%s7649_s5 + $0x78] sm:$0xff] }
0x33e7   :  { %v3003_v34 = vrot.slane %v2995_v42, %v6667_v29  ;;  %v5301_v54 = vmul.f32 -1.442695, %v2988_v5  ;;  %v5314_v42 = vld [vmem:[%s7649_s5 + $0x70] sm:$0xff] }
0x33e9   :  { %3004 = vrot.lane.b32.xlu0 %v3003_v34, %s6515_s28  ;;  %6407 = vpow2.f32 %v5301_v54  ;;  %v6202_v34 = vpack.c.bf16 %v5315_v46, %v5314_v42 }
0x33f3   :  { %v6408_v58 = vpop.eup %6407 }
0x33f4   :  { %v2992_v47 = vadd.f32 1.0, %v6408_v58  ;;  %v5322_v58 = vld [vmem:[%s7651_s7 + $0x1] ss:$0 sm:$0xff] }
0x33f6   :  { %6409 = vrcp.f32 %v2992_v47 }
0x3400   :  { %v6410_v45 = vpop.eup %6409 }
0x3401   :  { %v3014_v20 = vsub.f32 1.0, %v6410_v45  ;;  %v3020_v63 = vmul.f32 %v6410_v45, %v2905_v39  ;;  %v5312_v39 = vld [vmem:[%s7649_s5 + $0x60] sm:$0xff] }
0x3402   :  { %v6198_v41 = vpack.c.bf16 %v5313_v40, %v5312_v39 }
0x345b   :  { %v3005_v51 = vpop.permute.xlu0 %3004 }
0x345c   :  { %v3007_v17 = vmul.f32 %v6410_v45, %v3005_v51 }
0x345e   :  { %3009 = vrot.lane.b32.xlu1 %v3007_v17, %s6515_s28 }
0x34d0   :  { %v3010_v53 = vpop.permute.xlu1 %3009 }
0x34d1   :  { %v3012_v23 = vadd.f32 %v3010_v53, %v2428_v48 }
0x34d3   :  { %6411 = vtanh.f32 %v3012_v23 }
0x34dd   :  { %v6412_v6 = vpop.eup %6411 }
0x34de   :  { %3016 = vrot.lane.b32.xlu0 %v6412_v6, %s6516_s0 }
0x3550   :  { %v3017_v59 = vpop.permute.xlu0 %3016 }
0x3551   :  { %v3019_v60 = vmul.f32 %v3017_v59, %v3014_v20 }
0x3553   :  { %v3021_v0 = vadd.f32 %v3020_v63, %v3019_v60 }
0x3555   :  { %v3029_v44 = vrot.slane %v3021_v0, %v6667_v29 }
0x3557   :  { %3030 = vrot.lane.b32.xlu1 %v3029_v44, %s6516_s0 }
0x35c9   :  { %v7232_v3 = vpop.permute.xlu1 %3030 }
0x35ca   :  { %5838 = vmatmul.mubr.msk.f32.vlgmr.msra.gmra.mrb[24].mxu1 %vm245_vm2, %v7232_v3 }
0x35cb   :  { %6186 = vmatpush3.bf16.msra.mxu1 %v7052_v12  ;;  %5859 = vmatprep.mubr.msk.f32.mxu1 %vm6512_vm0, %v6513_v9 }
0x35cc   :  { %6187 = vmatprep.subr.bf16.mxu1 %v6511_v4 }
0x35cf   :  { %6189 = vmatpush3.bf16.msra.mxu1 %v7064_v62 }
0x35d0   :  { %6206 = vmatprep.subr.bf16.mxu1 %v6511_v4 }
0x369d   :  { %v3100_v7 = vpop.f32.mrb[24].mxu1 }
0x369e   :  { %v3111_v1 = vadd.f32 %v3100_v7, %v7119_v55  ;;  %v5839_v8 = vpop.f32.mrb[25].mxu1  ;;  %v3104_v11 = vadd.f32 %v3100_v7, %v2436_v10  ;;  %v5316_v7 = vld [vmem:[%s7650_s6 + $0x20] sm:$0xff] }
0x36a0   :  { %v3119_v52 = vrot.slane %v3111_v1, %v6667_v29  ;;  %v5303_v12 = vmul.f32 -1.442695, %v3104_v11  ;;  %v5317_v1 = vld [vmem:[%s7650_s6 + $0x28] sm:$0xff] }
0x36a1   :  { %v7310_v8 = vpack.c.bf16 %v5317_v1, %v5316_v7 }
0x36a2   :  { %3120 = vrot.lane.b32.xlu0 %v3119_v52, %s6515_s28  ;;  %6413 = vpow2.f32 %v5303_v12  ;;  %v5318_v52 = vld [vmem:[%s7650_s6 + $0x30] sm:$0xff] }
0x36ac   :  { %v6414_v14 = vpop.eup %6413 }
0x36ad   :  { %v3108_v49 = vadd.f32 1.0, %v6414_v14 }
0x36af   :  { %6415 = vrcp.f32 %v3108_v49 }
0x36b9   :  { %v6416_v57 = vpop.eup %6415 }
0x36ba   :  { %v3130_v28 = vsub.f32 1.0, %v6416_v57  ;;  %v3136_v36 = vmul.f32 %v6416_v57, %v3021_v0 }
0x3714   :  { %v3121_v15 = vpop.permute.xlu0 %3120 }
0x3715   :  { %v3123_v62 = vmul.f32 %v6416_v57, %v3121_v15  ;;  %v5326_v15 = vld [vmem:[%s7652_s8 + $0x1] ss:$0 sm:$0xff] }
0x3717   :  { %3125 = vrot.lane.b32.xlu1 %v3123_v62, %s6515_s28 }
0x3789   :  { %v3126_v19 = vpop.permute.xlu1 %3125 }
0x378a   :  { %v3128_v21 = vadd.f32 %v3126_v19, %v2436_v10  ;;  %v5319_v10 = vld [vmem:[%s7650_s6 + $0x38] sm:$0xff] }
0x378b   :  { %v7320_v11 = vpack.c.bf16 %v5319_v10, %v5318_v52 }
0x378c   :  { %6417 = vtanh.f32 %v3128_v21 }
0x3796   :  { %v6418_v27 = vpop.eup %6417 }
0x3797   :  { %3132 = vrot.lane.b32.xlu0 %v6418_v27, %s6516_s0 }
0x3809   :  { %v3133_v2 = vpop.permute.xlu0 %3132 }
0x380a   :  { %v3135_v30 = vmul.f32 %v3133_v2, %v3130_v28 }
0x380c   :  { %v7253_v33 = vadd.f32 %v3136_v36, %v3135_v30 }
0x380e   :  { %v3145_v32 = vrot.slane %v7253_v33, %v6667_v29 }
0x3810   :  { %3146 = vrot.lane.b32.xlu1 %v3145_v32, %s6516_s0 }
0x3882   :  { %v7264_v38 = vpop.permute.xlu1 %3146 }
0x3883   :  { %5849 = vmatmul.mubr.msk.f32.vlgmr.msra.gmra.mrb[24].mxu0 %vm245_vm2, %v7264_v38 }
0x3884   :  { %6193 = vmatpush3.bf16.msra.mxu0 %v6190_v43  ;;  %5878 = vmatprep.mubr.msk.f32.mxu0 %vm2322_vm3, %v7133_v26 }
0x3885   :  { %6195 = vmatprep.subr.bf16.mxu0 %v6194_v50 }
0x3888   :  { %6197 = vmatpush3.bf16.msra.mxu0 %v6194_v50 }
0x3889   :  { %6199 = vmatprep.subr.bf16.mxu0 %v6198_v41 }
0x388c   :  { %6201 = vmatpush3.bf16.msra.mxu0 %v6198_v41 }
0x388d   :  { %6203 = vmatprep.subr.bf16.mxu0 %v6202_v34 }
0x3890   :  { %6205 = vmatpush3.bf16.msra.mxu0 %v6202_v34 }
0x3891   :  { %6218 = vmatprep.subr.bf16.mxu0 %v6511_v4 }
0x3893   :  { %5879 = vmatmul.mubr.msk.f32.vlgmr.msra.gmra.mrb[26].mxu0 %vm2322_vm3, %v7135_v31  ;;  %v2421_v31 = vcombine.high %v7150_v61, %v7150_v61 }
0x3894   :  { %5911 = vmatprep.mubr.msk.f32.mxu0 %vm6512_vm0, %v6513_v9  ;;  %6220 = vmatpush3.bf16.msra.mxu0 %v7310_v8 }
0x3895   :  { %v7298_v17 = vrot.slane %v2421_v31, %v6667_v29  ;;  %6221 = vmatprep.subr.bf16.mxu0 %v6511_v4 }
0x3898   :  { %6223 = vmatpush3.bf16.msra.mxu0 %v7320_v11 }
0x3899   :  { %6230 = vmatprep.subr.bf16.mxu0 %v6511_v4 }
0x3956   :  { %v3216_v26 = vpop.f32.mrb[24].mxu0 }
0x3957   :  { %v3227_v48 = vadd.f32 %v3216_v26, %v7119_v55  ;;  %v5850_v5 = vpop.f32.mrb[25].mxu0  ;;  %v3220_v53 = vadd.f32 %v3216_v26, %v7298_v17 }
0x3959   :  { %v3235_v54 = vrot.slane %v3227_v48, %v6667_v29  ;;  %v5305_v23 = vmul.f32 -1.442695, %v3220_v53 }
0x395b   :  { %3236 = vrot.lane.b32.xlu0 %v3235_v54, %s6515_s28  ;;  %6419 = vpow2.f32 %v5305_v23 }
0x3965   :  { %v6420_v6 = vpop.eup %6419 }
0x3966   :  { %v5880_v47 = vpop.f32.mrb[26].mxu0  ;;  %v3224_v20 = vadd.f32 1.0, %v6420_v6 }
0x3967   :  { %v3460_v45 = vpop.f32.mrb[27].mxu0  ;;  %v7358_v30 = vadd.f32 %v5880_v47, %v5322_v58 }
0x3968   :  { %v7293_v51 = vadd.f32 %v5322_v58, %v3460_v45  ;;  %6421 = vrcp.f32 %v3224_v20 }
0x3972   :  { %v6422_v59 = vpop.eup %6421 }
0x3973   :  { %v3246_v12 = vsub.f32 1.0, %v6422_v59  ;;  %v3252_v49 = vmul.f32 %v6422_v59, %v7253_v33  ;;  %v3488_v33 = vcombine.high %v7358_v30, %v7358_v30 }
0x3975   :  { %v3502_v32 = vrot.slane %v3488_v33, %v6667_v29 }
0x3977   :  { %v3504_v35 = vcombine.high %v3502_v32, %v3502_v32 }
0x39cd   :  { %v3237_v63 = vpop.permute.xlu0 %3236 }
0x39ce   :  { %v3239_v60 = vmul.f32 %v6422_v59, %v3237_v63 }
0x39d0   :  { %3241 = vrot.lane.b32.xlu1 %v3239_v60, %s6515_s28 }
0x3a42   :  { %v3242_v0 = vpop.permute.xlu1 %3241 }
0x3a43   :  { %v3244_v44 = vadd.f32 %v3242_v0, %v7298_v17 }
0x3a45   :  { %6423 = vtanh.f32 %v3244_v44 }
0x3a4f   :  { %v6424_v61 = vpop.eup %6423 }
0x3a50   :  { %3248 = vrot.lane.b32.xlu0 %v6424_v61, %s6516_s0 }
0x3a54   :  { %3595 = vrot.lane.b32.xlu0 %v5326_v15, %s6515_s28 }
0x3ac2   :  { %v3249_v14 = vpop.permute.xlu0 %3248 }
0x3ac3   :  { %v3251_v57 = vmul.f32 %v3249_v14, %v3246_v12 }
0x3ac5   :  { %v7328_v62 = vadd.f32 %v3252_v49, %v3251_v57 }
0x3ac6   :  { %v7353_v43 = vpop.permute.xlu0 %3595 }
0x3ac7   :  { %v3261_v19 = vrot.slane %v7328_v62, %v6667_v29 }
0x3ac9   :  { %3262 = vrot.lane.b32.xlu1 %v3261_v19, %s6516_s0 }
0x3b3b   :  { %v7334_v21 = vpop.permute.xlu1 %3262 }
0x3b3c   :  { %5860 = vmatmul.mubr.msk.f32.vlgmr.msra.gmra.mrb[26].mxu1 %vm245_vm2, %v7334_v21 }
0x3b3d   :  { %6208 = vmatpush3.bf16.msra.mxu1 %v7310_v8  ;;  %5889 = vmatprep.mubr.msk.f32.mxu1 %vm6512_vm0, %v6513_v9 }
0x3b3e   :  { %6209 = vmatprep.subr.bf16.mxu1 %v6511_v4 }
0x3b41   :  { %6211 = vmatpush3.bf16.msra.mxu1 %v7320_v11 }
0x3b42   :  { %6212 = vmatprep.subr.bf16.mxu1 %v6511_v4 }
0x3b44   :  { %5890 = vmatmul.mubr.f32.vlgmr.msra.gmra.mrb[28].mxu1 %v6513_v9 }
0x3b45   :  { %6214 = vmatpush3.bf16.msra.mxu1 %v7310_v8  ;;  %5900 = vmatprep.mubr.msk.f32.mxu1 %vm6512_vm0, %v6513_v9 }
0x3b46   :  { %6215 = vmatprep.subr.bf16.mxu1 %v6511_v4 }
0x3b49   :  { %6217 = vmatpush3.bf16.msra.mxu1 %v7320_v11 }
0x3b4a   :  { %6224 = vmatprep.subr.bf16.mxu1 %v6511_v4 }
0x3c0f   :  { %v7351_v22 = vpop.f32.mrb[26].mxu1 }
0x3c10   :  { %v5861_v24 = vpop.f32.mrb[27].mxu1 }
0x3c17   :  { %v3579_v27 = vpop.f32.mrb[28].mxu1 }
0x3c18   :  { %v3598_v28 = vadd.f32 %v7353_v43, %v3579_v27  ;;  %v5891_v2 = vpop.f32.mrb[29].mxu1  ;;  %v3583_v13 = vadd.f32 %v3579_v27, %v3504_v35 }
0x3c1a   :  { %v3606_v36 = vrot.slane %v3598_v28, %v6667_v29  ;;  %v5325_v50 = vmul.f32 -1.442695, %v3583_v13 }
0x3c1c   :  { %3607 = vrot.lane.b32.xlu1 %v3606_v36, %s6515_s28  ;;  %6425 = vpow2.f32 %v5325_v50 }
0x3c26   :  { %v6426_v39 = vpop.eup %6425 }
0x3c27   :  { %v3587_v40 = vadd.f32 1.0, %v6426_v39 }
0x3c29   :  { %6427 = vrcp.f32 %v3587_v40 }
0x3c33   :  { %v6428_v41 = vpop.eup %6427 }
0x3c34   :  { %v3617_v5 = vsub.f32 1.0, %v6428_v41  ;;  %v3623_v58 = vmul.f32 0.0, %v6428_v41 }
0x3c8e   :  { %v3608_v42 = vpop.permute.xlu1 %3607 }
0x3c8f   :  { %v3610_v46 = vmul.f32 %v6428_v41, %v3608_v42 }
0x3c91   :  { %3612 = vrot.lane.b32.xlu0 %v3610_v46, %s6515_s28 }
0x3d03   :  { %v3613_v34 = vpop.permute.xlu0 %3612 }
0x3d04   :  { %v3615_v26 = vadd.f32 %v3613_v34, %v3504_v35 }
0x3d06   :  { %6429 = vtanh.f32 %v3615_v26 }
0x3d10   :  { %v6430_v48 = vpop.eup %6429 }
0x3d11   :  { %3619 = vrot.lane.b32.xlu1 %v6430_v48, %s6516_s0 }
0x3d83   :  { %v3620_v54 = vpop.permute.xlu1 %3619 }
0x3d84   :  { %v3622_v47 = vmul.f32 %v3620_v54, %v3617_v5 }
0x3d86   :  { %v7365_v45 = vadd.f32 %v3623_v58, %v3622_v47 }
0x3d88   :  { %v3632_v31 = vrot.slane %v7365_v45, %v6667_v29 }
0x3d8a   :  { %3633 = vrot.lane.b32.xlu0 %v3632_v31, %s6516_s0 }
0x3dfc   :  { %v3634_v53 = vpop.permute.xlu0 %3633 }
0x3dfd   :  { %5901 = vmatmul.mubr.msk.f32.vlgmr.msra.gmra.mrb[30].mxu1 %vm245_vm2, %v3634_v53 }
0x3dfe   :  { %6226 = vmatpush3.bf16.msra.mxu1 %v7310_v8  ;;  %5922 = vmatprep.mubr.msk.f32.mxu1 %vm6512_vm0, %v6513_v9 }
0x3dff   :  { %6227 = vmatprep.subr.bf16.mxu1 %v6511_v4 }
0x3e02   :  { %6229 = vmatpush3.bf16.msra.mxu1 %v7320_v11 }
0x3e03   :  { %6236 = vmatprep.subr.bf16.mxu1 %v6511_v4 }
0x3ed0   :  { %v3703_v23 = vpop.f32.mrb[30].mxu1 }
0x3ed1   :  { %v3714_v6 = vadd.f32 %v3703_v23, %v7353_v43  ;;  %v5902_v20 = vpop.f32.mrb[31].mxu1  ;;  %v3707_v63 = vadd.f32 %v3703_v23, %v3502_v32 }
0x3ed3   :  { %v3722_v59 = vrot.slane %v3714_v6, %v6667_v29  ;;  %v5328_v60 = vmul.f32 -1.442695, %v3707_v63 }
0x3ed5   :  { %3723 = vrot.lane.b32.xlu1 %v3722_v59, %s6515_s28  ;;  %6431 = vpow2.f32 %v5328_v60 }
0x3edf   :  { %v6432_v0 = vpop.eup %6431 }
0x3ee0   :  { %v3711_v44 = vadd.f32 1.0, %v6432_v0 }
0x3ee2   :  { %6433 = vrcp.f32 %v3711_v44 }
0x3eec   :  { %v6434_v61 = vpop.eup %6433 }
0x3eed   :  { %v3733_v14 = vsub.f32 1.0, %v6434_v61  ;;  %v3739_v57 = vmul.f32 %v6434_v61, %v7365_v45 }
0x3f47   :  { %v3724_v7 = vpop.permute.xlu1 %3723 }
0x3f48   :  { %v3726_v1 = vmul.f32 %v6434_v61, %v3724_v7 }
0x3f4a   :  { %3728 = vrot.lane.b32.xlu0 %v3726_v1, %s6515_s28 }
0x3fbc   :  { %v3729_v52 = vpop.permute.xlu0 %3728 }
0x3fbd   :  { %v3731_v10 = vadd.f32 %v3729_v52, %v3502_v32  ;;  %v3495_v32 = vrot.slane %v7358_v30, %v6667_v29 }
0x3fbf   :  { %6435 = vtanh.f32 %v3731_v10  ;;  %v3503_v35 = vcombine.high %v3495_v32, %v3495_v32 }
0x3fc9   :  { %v6436_v12 = vpop.eup %6435 }
0x3fca   :  { %3735 = vrot.lane.b32.xlu1 %v6436_v12, %s6516_s0 }
0x403c   :  { %v3736_v49 = vpop.permute.xlu1 %3735 }
0x403d   :  { %v3738_v15 = vmul.f32 %v3736_v49, %v3733_v14 }
0x403f   :  { %v7383_v19 = vadd.f32 %v3739_v57, %v3738_v15 }
0x4041   :  { %v3748_v24 = vrot.slane %v7383_v19, %v6667_v29 }
0x4043   :  { %3749 = vrot.lane.b32.xlu0 %v3748_v24, %s6516_s0 }
0x40b5   :  { %v3750_v27 = vpop.permute.xlu0 %3749 }
0x40b6   :  { %5912 = vmatmul.mubr.msk.f32.vlgmr.msra.gmra.mrb[28].mxu0 %vm245_vm2, %v3750_v27 }
0x40b7   :  { %6232 = vmatpush3.bf16.msra.mxu0 %v7310_v8  ;;  %5933 = vmatprep.mubr.msk.f32.mxu0 %vm6512_vm0, %v6513_v9 }
0x40b8   :  { %6233 = vmatprep.subr.bf16.mxu0 %v6511_v4 }
0x40bb   :  { %6235 = vmatpush3.bf16.msra.mxu0 %v7320_v11 }
0x40bc   :  { %6242 = vmatprep.subr.bf16.mxu0 %v6511_v4 }
0x4189   :  { %v3819_v28 = vpop.f32.mrb[28].mxu0 }
0x418a   :  { %v3830_v2 = vadd.f32 %v3819_v28, %v7353_v43  ;;  %v5913_v36 = vpop.f32.mrb[29].mxu0  ;;  %v3823_v13 = vadd.f32 %v3819_v28, %v3503_v35 }
0x418c   :  { %v3838_v33 = vrot.slane %v3830_v2, %v6667_v29  ;;  %v5330_v50 = vmul.f32 -1.442695, %v3823_v13 }
0x418e   :  { %3839 = vrot.lane.b32.xlu1 %v3838_v33, %s6515_s28  ;;  %6437 = vpow2.f32 %v5330_v50 }
0x4198   :  { %v6438_v39 = vpop.eup %6437 }
0x4199   :  { %v3827_v40 = vadd.f32 1.0, %v6438_v39 }
0x419b   :  { %6439 = vrcp.f32 %v3827_v40 }
0x41a5   :  { %v6440_v41 = vpop.eup %6439 }
0x41a6   :  { %v3849_v5 = vsub.f32 1.0, %v6440_v41  ;;  %v3855_v54 = vmul.f32 %v6440_v41, %v7383_v19 }
0x4200   :  { %v3840_v42 = vpop.permute.xlu1 %3839 }
0x4201   :  { %v3842_v46 = vmul.f32 %v6440_v41, %v3840_v42 }
0x4203   :  { %3844 = vrot.lane.b32.xlu0 %v3842_v46, %s6515_s28 }
0x4275   :  { %v3845_v34 = vpop.permute.xlu0 %3844 }
0x4276   :  { %v3847_v26 = vadd.f32 %v3845_v34, %v3503_v35  ;;  %v3471_v35 = vcombine.high %v7293_v51, %v7293_v51 }
0x4278   :  { %6441 = vtanh.f32 %v3847_v26  ;;  %v3485_v13 = vrot.slane %v3471_v35, %v6667_v29 }
0x427a   :  { %v3487_v50 = vcombine.high %v3485_v13, %v3485_v13 }
0x4282   :  { %v6442_v48 = vpop.eup %6441 }
0x4283   :  { %3851 = vrot.lane.b32.xlu1 %v6442_v48, %s6516_s0 }
0x42f5   :  { %v3852_v30 = vpop.permute.xlu1 %3851 }
0x42f6   :  { %v3854_v58 = vmul.f32 %v3852_v30, %v3849_v5 }
0x42f8   :  { %v7403_v47 = vadd.f32 %v3855_v54, %v3854_v58 }
0x42fa   :  { %v3864_v31 = vrot.slane %v7403_v47, %v6667_v29 }
0x42fc   :  { %3865 = vrot.lane.b32.xlu0 %v3864_v31, %s6516_s0 }
0x436e   :  { %v3866_v53 = vpop.permute.xlu0 %3865 }
0x436f   :  { %5923 = vmatmul.mubr.msk.f32.vlgmr.msra.gmra.mrb[32].mxu1 %vm245_vm2, %v3866_v53 }
0x4370   :  { %6238 = vmatpush3.bf16.msra.mxu1 %v7310_v8  ;;  %5944 = vmatprep.mubr.msk.f32.mxu1 %vm6512_vm0, %v6513_v9 }
0x4371   :  { %6239 = vmatprep.subr.bf16.mxu1 %v6511_v4 }
0x4374   :  { %6241 = vmatpush3.bf16.msra.mxu1 %v7320_v11 }
0x4375   :  { %6248 = vmatprep.subr.bf16.mxu1 %v6511_v4 }
0x4442   :  { %v3935_v23 = vpop.f32.mrb[32].mxu1 }
0x4443   :  { %v3946_v6 = vadd.f32 %v3935_v23, %v7353_v43  ;;  %v5924_v20 = vpop.f32.mrb[33].mxu1  ;;  %v3939_v63 = vadd.f32 %v3935_v23, %v3495_v32 }
0x4445   :  { %v3954_v59 = vrot.slane %v3946_v6, %v6667_v29  ;;  %v5332_v60 = vmul.f32 -1.442695, %v3939_v63 }
0x4447   :  { %3955 = vrot.lane.b32.xlu1 %v3954_v59, %s6515_s28  ;;  %6443 = vpow2.f32 %v5332_v60 }
0x4451   :  { %v6444_v0 = vpop.eup %6443 }
0x4452   :  { %v3943_v44 = vadd.f32 1.0, %v6444_v0 }
0x4454   :  { %6445 = vrcp.f32 %v3943_v44 }
0x445e   :  { %v6446_v61 = vpop.eup %6445 }
0x445f   :  { %v3965_v14 = vsub.f32 1.0, %v6446_v61  ;;  %v3971_v57 = vmul.f32 %v6446_v61, %v7403_v47 }
0x44b9   :  { %v3956_v7 = vpop.permute.xlu1 %3955 }
0x44ba   :  { %v3958_v1 = vmul.f32 %v6446_v61, %v3956_v7 }
0x44bc   :  { %3960 = vrot.lane.b32.xlu0 %v3958_v1, %s6515_s28 }
0x452e   :  { %v3961_v52 = vpop.permute.xlu0 %3960 }
0x452f   :  { %v3963_v10 = vadd.f32 %v3961_v52, %v3495_v32 }
0x4531   :  { %6447 = vtanh.f32 %v3963_v10 }
0x453b   :  { %v6448_v12 = vpop.eup %6447 }
0x453c   :  { %3967 = vrot.lane.b32.xlu1 %v6448_v12, %s6516_s0 }
0x45ae   :  { %v3968_v49 = vpop.permute.xlu1 %3967 }
0x45af   :  { %v3970_v15 = vmul.f32 %v3968_v49, %v3965_v14 }
0x45b1   :  { %v7421_v24 = vadd.f32 %v3971_v57, %v3970_v15 }
0x45b3   :  { %v3980_v27 = vrot.slane %v7421_v24, %v6667_v29 }
0x45b5   :  { %3981 = vrot.lane.b32.xlu0 %v3980_v27, %s6516_s0 }
0x4627   :  { %v3982_v28 = vpop.permute.xlu0 %3981 }
0x4628   :  { %5934 = vmatmul.mubr.msk.f32.vlgmr.msra.gmra.mrb[30].mxu0 %vm245_vm2, %v3982_v28 }
0x4629   :  { %6244 = vmatpush3.bf16.msra.mxu0 %v7310_v8  ;;  %5955 = vmatprep.mubr.msk.f32.mxu0 %vm6512_vm0, %v6513_v9 }
0x462a   :  { %6245 = vmatprep.subr.bf16.mxu0 %v6511_v4 }
0x462d   :  { %6247 = vmatpush3.bf16.msra.mxu0 %v7320_v11 }
0x46fb   :  { %v4051_v2 = vpop.f32.mrb[30].mxu0 }
0x46fc   :  { %v4062_v36 = vadd.f32 %v4051_v2, %v7353_v43  ;;  %v5935_v33 = vpop.f32.mrb[31].mxu0  ;;  %v4055_v39 = vadd.f32 %v4051_v2, %v3487_v50 }
0x46fe   :  { %v4070_v32 = vrot.slane %v4062_v36, %v6667_v29  ;;  %v5334_v40 = vmul.f32 -1.442695, %v4055_v39 }
0x4700   :  { %4071 = vrot.lane.b32.xlu1 %v4070_v32, %s6515_s28  ;;  %6449 = vpow2.f32 %v5334_v40 }
0x470a   :  { %v6450_v41 = vpop.eup %6449 }
0x470b   :  { %v4059_v42 = vadd.f32 1.0, %v6450_v41 }
0x470d   :  { %6451 = vrcp.f32 %v4059_v42 }
0x4717   :  { %v6452_v46 = vpop.eup %6451 }
0x4718   :  { %v4081_v54 = vsub.f32 1.0, %v6452_v46  ;;  %v4087_v31 = vmul.f32 %v6452_v46, %v7421_v24 }
0x4772   :  { %v4072_v34 = vpop.permute.xlu1 %4071 }
0x4773   :  { %v4074_v26 = vmul.f32 %v6452_v46, %v4072_v34 }
0x4775   :  { %4076 = vrot.lane.b32.xlu0 %v4074_v26, %s6515_s28 }
0x47e7   :  { %v4077_v48 = vpop.permute.xlu0 %4076 }
0x47e8   :  { %v4079_v5 = vadd.f32 %v4077_v48, %v3487_v50  ;;  %v7470_v50 = vrot.slane %v7293_v51, %v6667_v29  ;;  %v3343_v51 = vadd.f32 %v7351_v22, %v7119_v55 }
0x47ea   :  { %6453 = vtanh.f32 %v4079_v5  ;;  %v3486_v39 = vcombine.high %v7470_v50, %v7470_v50 }
0x47f4   :  { %v6454_v30 = vpop.eup %6453 }
0x47f5   :  { %4083 = vrot.lane.b32.xlu1 %v6454_v30, %s6516_s0 }
0x4867   :  { %v4084_v58 = vpop.permute.xlu1 %4083 }
0x4868   :  { %v4086_v53 = vmul.f32 %v4084_v58, %v4081_v54  ;;  %v3351_v58 = vrot.slane %v3343_v51, %v6667_v29  ;;  %v4467_v51 = vld [vmem:[%s7653_s9 + $0x20] sm:$0xff] }
0x486a   :  { %v7441_v23 = vadd.f32 %v4087_v31, %v4086_v53  ;;  %v2437_v31 = vcombine.high %v7298_v17, %v7298_v17 }
0x486c   :  { %v4096_v6 = vrot.slane %v7441_v23, %v6667_v29  ;;  %v3336_v53 = vadd.f32 %v7351_v22, %v2437_v31 }
0x486e   :  { %4097 = vrot.lane.b32.xlu0 %v4096_v6, %s6516_s0  ;;  %v5307_v6 = vmul.f32 -1.442695, %v3336_v53 }
0x48e0   :  { %v4098_v20 = vpop.permute.xlu0 %4097 }
0x48e1   :  { %5945 = vmatmul.mubr.msk.f32.vlgmr.msra.gmra.mrb[34].mxu1 %vm245_vm2, %v4098_v20 }
0x48e2   :  { %6250 = vmatpush3.bf16.msra.mxu1 %v7310_v8  ;;  %5966 = vmatprep.mubr.msk.f32.mxu1 %vm6512_vm0, %v6513_v9 }
0x48e3   :  { %6251 = vmatprep.subr.bf16.mxu1 %v6511_v4 }
0x48e6   :  { %6253 = vmatpush3.bf16.msra.mxu1 %v7320_v11 }
0x48e7   :  { %5988 = vmatprep.subr.mxu1 %v6513_v9 }
0x49b4   :  { %v4167_v59 = vpop.f32.mrb[34].mxu1 }
0x49b5   :  { %v4178_v63 = vadd.f32 %v4167_v59, %v7353_v43  ;;  %v5946_v60 = vpop.f32.mrb[35].mxu1  ;;  %v4171_v44 = vadd.f32 %v4167_v59, %v3485_v13 }
0x49b7   :  { %v4186_v0 = vrot.slane %v4178_v63, %v6667_v29  ;;  %v5336_v61 = vmul.f32 -1.442695, %v4171_v44 }
0x49b9   :  { %4187 = vrot.lane.b32.xlu1 %v4186_v0, %s6515_s28  ;;  %6455 = vpow2.f32 %v5336_v61 }
0x49c3   :  { %v6456_v8 = vpop.eup %6455 }
0x49c4   :  { %v4175_v7 = vadd.f32 1.0, %v6456_v8 }
0x49c6   :  { %6457 = vrcp.f32 %v4175_v7 }
0x49d0   :  { %v6458_v1 = vpop.eup %6457 }
0x49d1   :  { %v4197_v49 = vsub.f32 1.0, %v6458_v1  ;;  %v4203_v15 = vmul.f32 %v6458_v1, %v7441_v23 }
0x4a2b   :  { %v4188_v52 = vpop.permute.xlu1 %4187 }
0x4a2c   :  { %v4190_v10 = vmul.f32 %v6458_v1, %v4188_v52 }
0x4a2e   :  { %4192 = vrot.lane.b32.xlu0 %v4190_v10, %s6515_s28 }
0x4aa0   :  { %v4193_v11 = vpop.permute.xlu0 %4192 }
0x4aa1   :  { %v4195_v12 = vadd.f32 %v4193_v11, %v3485_v13 }
0x4aa3   :  { %6459 = vtanh.f32 %v4195_v12 }
0x4aad   :  { %v6460_v14 = vpop.eup %6459 }
0x4aae   :  { %4199 = vrot.lane.b32.xlu1 %v6460_v14, %s6516_s0 }
0x4b20   :  { %v4200_v57 = vpop.permute.xlu1 %4199 }
0x4b21   :  { %v4202_v27 = vmul.f32 %v4200_v57, %v4197_v49 }
0x4b23   :  { %v7459_v28 = vadd.f32 %v4203_v15, %v4202_v27 }
0x4b25   :  { %v4212_v2 = vrot.slane %v7459_v28, %v6667_v29 }
0x4b27   :  { %4213 = vrot.lane.b32.xlu0 %v4212_v2, %s6516_s0 }
0x4b99   :  { %v4214_v36 = vpop.permute.xlu0 %4213 }
0x4b9a   :  { %5956 = vmatmul.mubr.msk.f32.vlgmr.msra.gmra.mrb[32].mxu0 %vm245_vm2, %v4214_v36 }
0x4c6d   :  { %v4283_v33 = vpop.f32.mrb[32].mxu0 }
0x4c6e   :  { %v4294_v32 = vadd.f32 %v4283_v33, %v7353_v43  ;;  %v5957_v35 = vpop.f32.mrb[33].mxu0  ;;  %v4287_v40 = vadd.f32 %v4283_v33, %v3486_v39 }
0x4c70   :  { %v4302_v13 = vrot.slane %v4294_v32, %v6667_v29  ;;  %v5338_v41 = vmul.f32 -1.442695, %v4287_v40 }
0x4c72   :  { %4303 = vrot.lane.b32.xlu1 %v4302_v13, %s6515_s28  ;;  %6461 = vpow2.f32 %v5338_v41 }
0x4c7c   :  { %v6462_v42 = vpop.eup %6461 }
0x4c7d   :  { %v4291_v46 = vadd.f32 1.0, %v6462_v42  ;;  %v4464_v42 = vld [vmem:[%s7653_s9 + $0x8] sm:$0xff] }
0x4c7f   :  { %6463 = vrcp.f32 %v4291_v46 }
0x4c89   :  { %v6464_v34 = vpop.eup %6463 }
0x4c8a   :  { %v4313_v63 = vsub.f32 1.0, %v6464_v34  ;;  %v4319_v55 = vmul.f32 %v6464_v34, %v7459_v28 }
0x4ce4   :  { %v4304_v26 = vpop.permute.xlu1 %4303 }
0x4ce5   :  { %v4306_v48 = vmul.f32 %v6464_v34, %v4304_v26  ;;  %v4465_v34 = vld [vmem:[%s7653_s9 + $0x10] sm:$0xff]  ;;  %v4466_v26 = vld [vmem:[%s7653_s9 + $0x18] sm:$0xff] }
0x4ce7   :  { %4308 = vrot.lane.b32.xlu0 %v4306_v48, %s6515_s28  ;;  %v6258_v48 = vpack.c.bf16 %v4466_v26, %v4465_v34 }
0x4d59   :  { %v4309_v5 = vpop.permute.xlu0 %4308 }
0x4d5a   :  { %v4311_v30 = vadd.f32 %v4309_v5, %v3486_v39 }
0x4d5c   :  { %6465 = vtanh.f32 %v4311_v30 }
0x4d5d   :  { %6467 = vpow2.f32 %v5307_v6 }
0x4d66   :  { %v6466_v54 = vpop.eup %6465 }
0x4d67   :  { %4315 = vrot.lane.b32.xlu1 %v6466_v54, %s6516_s0  ;;  %v6468_v20 = vpop.eup %6467  ;;  %v4468_v54 = vld [vmem:[%s7653_s9 + $0x28] sm:$0xff] }
0x4d68   :  { %v3340_v59 = vadd.f32 1.0, %v6468_v20 }
0x4d6a   :  { %6469 = vrcp.f32 %v3340_v59 }
0x4d6b   :  { %3352 = vrot.lane.b32.xlu1 %v3351_v58, %s6515_s28  ;;  %v6262_v58 = vpack.c.bf16 %v4468_v54, %v4467_v51 }
0x4d74   :  { %v6470_v61 = vpop.eup %6469 }
0x4d75   :  { %v3362_v11 = vsub.f32 1.0, %v6470_v61  ;;  %v3368_v14 = vmul.f32 %v6470_v61, %v7328_v62 }
0x4dd9   :  { %v4316_v60 = vpop.permute.xlu1 %4315 }
0x4dda   :  { %v4318_v0 = vmul.f32 %v4316_v60, %v4313_v63 }
0x4ddc   :  { %v7484_v44 = vadd.f32 %v4319_v55, %v4318_v0  ;;  %v4457_v55 = vsel %vm245_vm2, %v7197_v16, %v7459_v28  ;;  %v4460_v16 = vsel %vm245_vm2, %v7264_v38, %v7403_v47  ;;  %v4638_v47 = vld [vmem:[%s7657_s13 + $0x8] sm:$0xff] }
0x4ddd   :  { %v3353_v8 = vpop.permute.xlu1 %3352 }
0x4dde   :  { %v4328_v7 = vrot.slane %v7484_v44, %v6667_v29  ;;  %v3355_v17 = vmul.f32 %v6470_v61, %v3353_v8  ;;  %v4459_v8 = vsel %vm245_vm2, %v7232_v3, %v7421_v24  ;;  %v4456_v3 = vsel %vm245_vm2, %v7177_v56, %v7484_v44  ;;  %v4637_v56 = vld [vmem:[%s7657_s13] sm:$0xff] }
0x4de0   :  { %4329 = vrot.lane.b32.xlu0 %v4328_v7, %s6516_s0  ;;  %3357 = vrot.lane.b32.xlu1 %v3355_v17, %s6515_s28  ;;  %v4461_v7 = vsel %vm245_vm2, %v7334_v21, %v7383_v19 }
0x4e52   :  { %v4330_v22 = vpop.permute.xlu0 %4329  ;;  %v3358_v1 = vpop.permute.xlu1 %3357 }
0x4e53   :  { %v3360_v52 = vadd.f32 %v3358_v1, %v2437_v31  ;;  %5967 = vmatmul.mubr.msk.f32.vlgmr.msra.gmra.mrb[36].mxu1 %vm245_vm2, %v4330_v22  ;;  %v4469_v31 = vld [vmem:[%s7653_s9 + $0x30] sm:$0xff]  ;;  %v4503_v1 = vcombine.low %v4459_v8, %v4460_v16 }
0x4e54   :  { %5990 = vmatprep.mubr.msk.f32.mxu1 %vm6512_vm0, %v6513_v9 }
0x4e55   :  { %6471 = vtanh.f32 %v3360_v52  ;;  %v4511_v52 = vrot.slane %v4503_v1, %v6667_v29 }
0x4e5f   :  { %v6472_v10 = vpop.eup %6471 }
0x4e60   :  { %3364 = vrot.lane.b32.xlu1 %v6472_v10, %s6516_s0 }
0x4ed2   :  { %v3365_v12 = vpop.permute.xlu1 %3364 }
0x4ed3   :  { %v3367_v49 = vmul.f32 %v3365_v12, %v3362_v11  ;;  %v6271_v11 = vpack.c.bf16 %v4638_v47, %v4637_v56  ;;  %v5341_v12 = vld [vmem:[%s7654_s10] ss:$0 sm:$0xff] }
0x4ed5   :  { %v3369_v57 = vadd.f32 %v3368_v14, %v3367_v49 }
0x4ed7   :  { %v4444_v15 = vrot.slane %v3369_v57, %v6667_v29 }
0x4ed9   :  { %4445 = vrot.lane.b32.xlu1 %v4444_v15, %s6516_s0 }
0x4f26   :  { %v4399_v27 = vpop.f32.mrb[36].mxu1 }
0x4f27   :  { %v4410_v2 = vadd.f32 %v4399_v27, %v7353_v43  ;;  %v5968_v36 = vpop.f32.mrb[37].mxu1  ;;  %v4403_v32 = vadd.f32 %v4399_v27, %v7470_v50  ;;  %v4463_v43 = vld [vmem:[%s7653_s9] sm:$0xff] }
0x4f28   :  { %v6254_v46 = vpack.c.bf16 %v4464_v42, %v4463_v43  ;;  %v4649_v36 = vsub.s32 0, %v6648_v18 }
0x4f29   :  { %v4418_v33 = vrot.slane %v4410_v2, %v6667_v29  ;;  %v5340_v35 = vmul.f32 -1.442695, %v4403_v32 }
0x4f2a   :  { %6255 = vmatprep.subr.bf16.mxu0 %v6254_v46 }
0x4f2b   :  { %4419 = vrot.lane.b32.xlu0 %v4418_v33, %s6515_s28  ;;  %6473 = vpow2.f32 %v5340_v35  ;;  %6257 = vmatpush3.bf16.msra.mxu0 %v6254_v46  ;;  %v4952_v35 = vsub.s32 1, %v6648_v18 }
0x4f2c   :  { %6259 = vmatprep.subr.bf16.mxu0 %v6258_v48 }
0x4f2f   :  { %6261 = vmatpush3.bf16.msra.mxu0 %v6258_v48 }
0x4f30   :  { %6263 = vmatprep.subr.bf16.mxu0 %v6262_v58 }
0x4f33   :  { %6265 = vmatpush3.bf16.msra.mxu0 %v6262_v58 }
0x4f35   :  { %v6474_v13 = vpop.eup %6473 }
0x4f36   :  { %v4407_v62 = vadd.f32 1.0, %v6474_v13 }
0x4f38   :  { %6475 = vrcp.f32 %v4407_v62 }
0x4f42   :  { %v6476_v39 = vpop.eup %6475 }
0x4f43   :  { %v4429_v59 = vsub.f32 1.0, %v6476_v39  ;;  %v4435_v0 = vmul.f32 %v6476_v39, %v7484_v44  ;;  %v6517_v44 = vmov 0  }
0x4f44   :  { %6285 = vset.pattern.permute.xlu0 %v6517_v44  ;;  %6286 = vset.pattern.permute.xlu1 %v6517_v44 }
0x4f4b   :  { %v4446_v20 = vpop.permute.xlu1 %4445 }
0x4f4c   :  { %v4462_v63 = vsel %vm245_vm2, %v4446_v20, %v7365_v45  ;;  %v4458_v45 = vsel %vm245_vm2, %v7214_v37, %v7441_v23 }
0x4f4d   :  { %v4504_v17 = vcombine.low %v4461_v7, %v4462_v63  ;;  %v4487_v28 = vcombine.low %v4457_v55, %v4458_v45  ;;  %v4635_v45 = vld [vmem:[%s7655_s11] sm:$0x3f] }
0x4f4f   :  { %v4518_v19 = vrot.slane %v4504_v17, %v6667_v29  ;;  %v4501_v23 = vrot.slane %v4487_v28, %v6667_v29 }
0x4f51   :  { %v4519_v38 = vcombine.low %v4511_v52, %v4518_v19 }
0x4f9d   :  { %v4420_v40 = vpop.permute.xlu0 %4419 }
0x4f9e   :  { %v4422_v41 = vmul.f32 %v6476_v39, %v4420_v40 }
0x4fa0   :  { %4424 = vrot.lane.b32.xlu0 %v4422_v41, %s6515_s28 }
0x5012   :  { %v4425_v5 = vpop.permute.xlu0 %4424 }
0x5013   :  { %v4427_v30 = vadd.f32 %v4425_v5, %v7470_v50  ;;  %v4470_v50 = vld [vmem:[%s7653_s9 + $0x38] sm:$0xff] }
0x5014   :  { %v6266_v53 = vpack.c.bf16 %v4470_v50, %v4469_v31 }
0x5015   :  { %6477 = vtanh.f32 %v4427_v30 }
0x5016   :  { %6267 = vmatprep.subr.bf16.mxu0 %v6266_v53 }
0x5017   :  { %6269 = vmatpush3.bf16.msra.mxu0 %v6266_v53 }
0x5018   :  { %6273 = vmatprep.subr.bf16.mxu0 %v6511_v4 }
0x501f   :  { %v6478_v6 = vpop.eup %6477 }
0x5020   :  { %4431 = vrot.lane.b32.xlu0 %v6478_v6, %s6516_s0 }
0x5092   :  { %v4432_v60 = vpop.permute.xlu0 %4431 }
0x5093   :  { %v4434_v61 = vmul.f32 %v4432_v60, %v4429_v59 }
0x5095   :  { %v4436_v22 = vadd.f32 %v4435_v0, %v4434_v61 }
0x5097   :  { %v4455_v24 = vsel %vm245_vm2, %v7160_v25, %v4436_v22  ;;  %v4636_v25 = vld [vmem:[%s7656_s12] sm:$0x3f] }
0x5098   :  { %v4486_v21 = vcombine.low %v4455_v24, %v4456_v3  ;;  %4644 = vperm.xlu0 %6285, %v4636_v25  }
0x509a   :  { %v4494_v37 = vrot.slane %v4486_v21, %v6667_v29 }
0x509c   :  { %v4502_v10 = vcombine.low %v4494_v37, %v4501_v23  ;;  %v4641_v37 = vld [vmem:[%s7660_s16] sm:$0xf] }
0x509d   :  { %4849 = vperm.xlu1 %6286, %v4641_v37  }
0x509e   :  { %5985 = vmatprep.mubr.msk.f32.mxu0 %vm2322_vm3, %v4502_v10 }
0x509f   :  { %5986 = vmatmul.mubr.msk.f32.vlgmr.msra.gmra.mrb[34].mxu0 %vm2322_vm3, %v4519_v38  ;;  %v4640_v38 = vld [vmem:[%s7659_s15] sm:$0xf] }
0x50a0   :  { %6014 = vmatprep.mubr.msk.f32.mxu0 %vm6512_vm0, %v6513_v9  ;;  %6275 = vmatpush3.bf16.msra.mxu0 %v6271_v11 }
0x5117   :  { %v4645_v3 = vpop.permute.xlu0 %4644 }
0x511c   :  { %v4850_v25 = vpop.permute.xlu1 %4849 }
0x5172   :  { %v5987_v14 = vpop.f32.mrb[34].mxu0 }
0x5173   :  { %v4596_v49 = vadd.f32 %v5987_v14, %v5341_v12  ;;  %v4590_v57 = vpop.f32.mrb[35].mxu0 }
0x5174   :  { %v4591_v15 = vadd.f32 %v5341_v12, %v4590_v57 }
0x5175   :  { %v4618_v27 = vcombine.high %v4596_v49, %v4596_v49  ;;  %v4625_v2 = vrot.slane %v4596_v49, %v6667_v29 }
0x5176   :  { %v4601_v33 = vcombine.high %v4591_v15, %v4591_v15  ;;  %v4608_v32 = vrot.slane %v4591_v15, %v6667_v29 }
0x5177   :  { %v4632_v13 = vrot.slane %v4618_v27, %v6667_v29  ;;  %v4633_v40 = vcombine.high %v4625_v2, %v4625_v2  ;;  %v4969_v50 = vrot.slane %v4625_v2, %v4952_v35 }
0x5178   :  { %v4615_v62 = vrot.slane %v4601_v33, %v6667_v29  ;;  %v4616_v39 = vcombine.high %v4608_v32, %v4608_v32  ;;  %v4650_v43 = vrot.slane %v4608_v32, %v4649_v36  ;;  %v4953_v34 = vrot.slane %v4608_v32, %v4952_v35 }
0x5179   :  { %v4634_v18 = vcombine.high %v4632_v13, %v4632_v13  ;;  %v4666_v29 = vrot.slane %v4625_v2, %v4649_v36  ;;  %v4670_v31 = vrot.slane %v4633_v40, %v4649_v36  ;;  %v4674_v20 = vrot.slane %v4632_v13, %v4649_v36 }
0x517a   :  { %v4617_v41 = vcombine.high %v4615_v62, %v4615_v62  ;;  %v4654_v42 = vrot.slane %v4616_v39, %v4649_v36  ;;  %v4658_v46 = vrot.slane %v4615_v62, %v4649_v36  ;;  %v4957_v26 = vrot.slane %v4616_v39, %v4952_v35 }
0x517b   :  { %v4961_v48 = vrot.slane %v4615_v62, %v4952_v35  ;;  %v4973_v59 = vrot.slane %v4633_v40, %v4952_v35  ;;  %v4977_v55 = vrot.slane %v4632_v13, %v4952_v35  ;;  %v4678_v0 = vrot.slane %v4634_v18, %v4649_v36 }
0x517c   :  { %v4662_v5 = vrot.slane %v4617_v41, %v4649_v36  ;;  %v4680_v30 = vsel %vm4679_vm4, %v4654_v42, %v4650_v43  ;;  %v4965_v51 = vrot.slane %v4617_v41, %v4952_v35  ;;  %v4982_v58 = vsel %vm4679_vm4, %v4957_v26, %v4953_v34 }
0x517d   :  { %v4682_v54 = vsel %vm4681_vm5, %v4658_v46, %v4680_v30  ;;  %v4983_v53 = vsel %vm4681_vm5, %v4961_v48, %v4982_v58  ;;  %v4981_v17 = vrot.slane %v4634_v18, %v4952_v35 }
0x517e   :  { %v4684_v6 = vsel %vm4683_vm6, %v4662_v5, %v4682_v54  ;;  %v4984_v60 = vsel %vm4683_vm6, %v4965_v51, %v4983_v53 }
0x517f   :  { %v4686_v63 = vsel %vm4685_vm7, %v4666_v29, %v4684_v6  ;;  %v4985_v8 = vsel %vm4685_vm7, %v4969_v50, %v4984_v60 }
0x5180   :  { %v4688_v61 = vsel %vm4687_vm8, %v4670_v31, %v4686_v63  ;;  %v4986_v22 = vsel %vm4687_vm8, %v4973_v59, %v4985_v8 }
0x5181   :  { %v4690_v7 = vsel %vm4689_vm9, %v4674_v20, %v4688_v61  ;;  %v4987_v28 = vsel %vm4689_vm9, %v4977_v55, %v4986_v22 }
0x5182   :  { %v4692_v16 = vsel %vm4691_vm10, %v4678_v0, %v4690_v7  ;;  %v4988_v1 = vsel %vm4691_vm10, %v4981_v17, %v4987_v28 }
0x5183   :  { %5989 = vmatpush3.msra.mxu1 %v4692_v16 }
0x5184   :  { %5991 = vmatmul.mubr.msk.f32.vlgmr.msra.gmra.mrb[38].mxu1 %vm4694_vm11, %v4635_v45  ;;  %6270 = vmatprep.subr.bf16.mxu1 %v6511_v4  ;;  %v5345_v4 = vld [vmem:[%s7658_s14] ss:$0 sm:$0xff]  ;;  %s6518_s14 = smov [#allocation2]  }
0x5185   :  { %6272 = vmatpush3.bf16.msra.mxu1 %v6271_v11  ;;  %5997 = vmatprep.mubr.msk.f32.mxu1 %vm6512_vm0, %v6513_v9  ;;  %s5232_s15 = sshll.u32 %s6518_s14, 4  ;;  %s5233_s15 = int_to_ptr.vmem [resolvable:$true] %s5232_s15 }
0x5186   :  { %6000 = vmatprep.subr.mxu1 %v6513_v9  ;;  %s6487_s16 = scalar_lea.vmem %s5233_s15, 128  ;;  %p6492_p1 = scmp.lt.s32.totalorder %s5233_s15, %s5233_s15 }
0x5187   :  { %p6488_p0 = scmp.ne.s32.totalorder %s5233_s15, %s6487_s16  ;;  %p6493_p2 = scmp.lt.s32.totalorder %s6487_s16, %s6487_s16 }
0x5189   :  { %p6494_p3 = por %p6493_p2, %p6492_p1 }
0x518b   :  { %p6495_p4 = pnand %p6494_p3, %p6488_p0 }
0x5257   :  { %v4764_v24 = vpop.f32.mrb[38].mxu1 }
0x5258   :  { %v4765_v21 = vadd.f32 %v4764_v24, %v4645_v3  ;;  %v5992_v19 = vpop.f32.mrb[39].mxu1 }
0x525a   :  { %5998 = vmatmul.mubr.msk.f32.vlgmr.msra.gmra.mrb[40].mxu1 %vm121_vm1, %v4765_v21 }
0x525b   :  { %6002 = vmatprep.mubr.msk.f32.mxu1 %vm6512_vm0, %v6513_v9 }
0x532d   :  { %v4843_v23 = vpop.f32.mrb[40].mxu1 }
0x532e   :  { %v4844_v52 = vadd.f32 %v5345_v4, %v4843_v23  ;;  %v5999_v10 = vpop.f32.mrb[41].mxu1 }
0x5330   :  { %6001 = vmatpush3.msk.msra.mxu1 %vm4856_vm12, %v4844_v52 }
0x5331   :  { %6003 = vmatmul.mubr.msk.f32.vlgmr.msra.gmra.mrb[42].mxu1 %vm4852_vm13, %v4640_v38  ;;  %6005 = vmatprep.subr.mxu1 %v6513_v9 }
0x5332   :  { %6006 = vmatpush3.msra.mxu1 %v4988_v1  ;;  %6007 = vmatprep.mubr.msk.f32.mxu1 %vm6512_vm0, %v6513_v9 }
0x5333   :  { %6017 = vmatprep.subr.mxu1 %v6513_v9 }
0x5335   :  { %6008 = vmatmul.mubr.msk.f32.vlgmr.msra.gmra.mrb[44].mxu1 %vm4694_vm11, %v4635_v45 }
0x5336   :  { %6019 = vmatprep.mubr.msk.f32.mxu1 %vm6512_vm0, %v6513_v9 }
0x5404   :  { %v4926_v56 = vpop.f32.mrb[42].mxu1 }
0x5405   :  { %v4927_v47 = vadd.f32 %v4926_v56, %v4850_v25  ;;  %v6004_v44 = vpop.f32.mrb[43].mxu1 }
0x5407   :  { %v4931_v11 = vsel %vm4930_vm14, %v4927_v47, -inf }
0x5408   :  { %v4932_v12 = vrot.slane %v4931_v11, 4  ;;  %v5056_v14 = vpop.f32.mrb[44].mxu1 }
0x5409   :  { %v5057_v49 = vadd.f32 %v5056_v14, %v4645_v3  ;;  %v6009_v57 = vpop.f32.mrb[45].mxu1 }
0x540a   :  { %v4933_v15 = vmax.f32 %v4931_v11, %v4932_v12 }
0x540b   :  { %6015 = vmatmul.mubr.msk.f32.vlgmr.msra.gmra.mrb[36].mxu0 %vm121_vm1, %v5057_v49 }
0x540c   :  { %v4934_v27 = vrot.slane %v4933_v15, 2 }
0x540e   :  { %v4935_v2 = vmax.f32 %v4933_v15, %v4934_v27 }
0x5410   :  { %v4936_v36 = vrot.slane %v4935_v2, 1 }
0x5412   :  { %v4937_v33 = vmax.f32 %v4935_v2, %v4936_v36 }
0x5414   :  { %v4938_v32 = vsub.f32 %v4927_v47, %v4937_v33 }
0x5416   :  { %v4939_v9 = vmul.f32 1.442695, %v4938_v32 }
0x5418   :  { %6479 = vpow2.f32 %v4939_v9 }
0x5422   :  { %v6480_v35 = vpop.eup %6479 }
0x5423   :  { %v4941_v13 = vsel %vm4930_vm14, %v6480_v35, 0.0 }
0x5424   :  { %v4942_v62 = vrot.slane %v4941_v13, 4 }
0x5426   :  { %v4943_v39 = vadd.f32 %v4942_v62, %v4941_v13 }
0x5428   :  { %v4944_v40 = vrot.slane %v4943_v39, 2 }
0x542a   :  { %v4945_v41 = vadd.f32 %v4944_v40, %v4943_v39 }
0x542c   :  { %v4946_v43 = vrot.slane %v4945_v41, 1 }
0x542e   :  { %v4947_v42 = vadd.f32 %v4946_v43, %v4945_v41 }
0x5430   :  { %6481 = vrcp.f32 %v4947_v42 }
0x543a   :  { %v6482_v46 = vpop.eup %6481 }
0x543b   :  { %v4949_v34 = vmul.f32 %v6482_v46, %v6480_v35 }
0x543d   :  { %5225 = vst.msk [vmem:[#allocation2] sm:$0xf] %vm4930_vm14, %v4949_v34 }
0x54de   :  { %v5129_v26 = vpop.f32.mrb[36].mxu0 }
0x54df   :  { %v5130_v48 = vadd.f32 %v5345_v4, %v5129_v26  ;;  %v6016_v18 = vpop.f32.mrb[37].mxu0 }
0x54e1   :  { %6018 = vmatpush3.msk.msra.mxu1 %vm4856_vm12, %v5130_v48 }
0x54e2   :  { %6020 = vmatmul.mubr.msk.f32.vlgmr.msra.gmra.mrb[46].mxu1 %vm4852_vm13, %v4640_v38 }
0x55b5   :  { %v5202_v5 = vpop.f32.mrb[46].mxu1 }
0x55b6   :  { %v5203_v30 = vadd.f32 %v5202_v5, %v4850_v25  ;;  %v6021_v51 = vpop.f32.mrb[47].mxu1 }
0x55b8   :  { %v5206_v29 = vsel %vm4930_vm14, %v5203_v30, -inf }
0x55b9   :  { %v5207_v54 = vrot.slane %v5206_v29, 4 }
0x55bb   :  { %v5208_v58 = vmax.f32 %v5206_v29, %v5207_v54 }
0x55bd   :  { %v5209_v31 = vrot.slane %v5208_v58, 2 }
0x55bf   :  { %v5210_v50 = vmax.f32 %v5208_v58, %v5209_v31 }
0x55c1   :  { %v5211_v53 = vrot.slane %v5210_v50, 1 }
0x55c3   :  { %v5212_v6 = vmax.f32 %v5210_v50, %v5211_v53 }
0x55c5   :  { %v5213_v20 = vsub.f32 %v5203_v30, %v5212_v6 }
0x55c7   :  { %v5214_v59 = vmul.f32 1.442695, %v5213_v20 }
0x55c9   :  { %6483 = vpow2.f32 %v5214_v59 }
0x55d3   :  { %v6484_v63 = vpop.eup %6483 }
0x55d4   :  { %v5216_v60 = vsel %vm4930_vm14, %v6484_v63, 0.0 }
0x55d5   :  { %v5217_v55 = vrot.slane %v5216_v60, 4 }
0x55d7   :  { %v5218_v0 = vadd.f32 %v5217_v55, %v5216_v60 }
0x55d9   :  { %v5219_v61 = vrot.slane %v5218_v0, 2 }
0x55db   :  { %v5220_v8 = vadd.f32 %v5219_v61, %v5218_v0 }
0x55dd   :  { %v5221_v7 = vrot.slane %v5220_v8, 1 }
0x55df   :  { %v5222_v45 = vadd.f32 %v5221_v7, %v5220_v8 }
0x55e1   :  { %6485 = vrcp.f32 %v5222_v45 }
0x55eb   :  { %v6486_v17 = vpop.eup %6485 }
0x55ec   :  { %v5224_v22 = vmul.f32 %v6486_v17, %v6484_v63 }
0x55ee   :  { %5226 = vst.msk [vmem:[#allocation2 + $0x4] sm:$0xf] %vm4930_vm14, %v5224_v22 }
0x55ef   :  { %6498 = shalt.err (!%p6495_p4)
}
0x55f0   :  { %s6499_s5 = scalar_lea.hbm %s7661_s17, 128 }
0x55f1   :  { %p6500_p5 = scmp.ne.s32.totalorder %s7661_s17, %s6499_s5  ;;  %p6503_p6 = scmp.lt.u32.totalorder %s6499_s5, %s7661_s17 }
0x55f3   :  { %p6505_p7 = pnand %p6503_p6, %p6500_p5 }
0x55f5   :  { %6508 = shalt.err (!%p6505_p7)
}
0x55f6   :  { %s6519_s4 = smov 4  }
0x55f7   :  { %5238 = dma.vmem_to_hbm [thread:$0]  %s5233_s15, 128, %s7661_s17, [#allocation3], %s6515_s28, %s6515_s28, %s6519_s4  }
0x55f8   :  { %6509 = dma.done.wait [#allocation3], 128  }
0x55f9   :  { %6510 = vsyncadd [#allocation3], 4294967168 }
0x55fa   :  { %5242 = vsyncpa [#allocation3], 1 }

</bundles_post_ra>
